<compile_context>
chip_gen: v6e
topology: v6e:2x2x1
jax: 0.10.0
libtpu: 0.0.40
codegen_flags: <defaults>
</compile_context>

<pallas_src>
import math

import jax
import jax.numpy as jnp
from jax.experimental import pallas as pl
from jax.experimental.pallas import tpu as pltpu


def _gelu(v):
    # exact (erf-based) GELU, matching torch.nn.GELU() default
    return 0.5 * v * (1.0 + jax.lax.erf(v * (1.0 / math.sqrt(2.0))))


def _inst_norm(v, eps=1e-5):
    # InstanceNorm1d (affine=False): per-channel over length, biased variance.
    # Single pass: E[x] and E[x^2] from one sweep, fused rsqrt.
    inv_n = 1.0 / v.shape[-1]
    mu = jnp.sum(v, axis=-1, keepdims=True) * inv_n
    ms = jnp.sum(v * v, axis=-1, keepdims=True) * inv_n
    var = jnp.maximum(ms - mu * mu, 0.0)
    return (v - mu) * jax.lax.rsqrt(var + eps)


def _fourier_unit(v, fwd, cr, ci, w_a, w_b, b):
    """FourierUnit forward on one (C, L) sample.

    v:   (C, L)   f32 activations
    fwd: (L, 2F)  bf16 fused [cos | -sin] forward rfft basis (ortho)
    cr:  (F, L)   bf16 inverse basis applied to Re
    ci:  (F, L)   bf16 inverse basis applied to Im
    w_a: (2C, C)  bf16 conv_fft weight acting on Re(rfft)
    w_b: (2C, C)  bf16 conv_fft weight acting on Im(rfft)
    b:   (2C, 1)  f32 conv_fft bias
    """
    c = v.shape[0]
    f = cr.shape[0]
    xf = jnp.dot(v.astype(jnp.bfloat16), fwd,
                 preferred_element_type=jnp.float32)                 # (C, 2F)
    xr = xf[:, :f].astype(jnp.bfloat16)
    xi = xf[:, f:].astype(jnp.bfloat16)
    z = (jnp.dot(w_a, xr, preferred_element_type=jnp.float32)
         + jnp.dot(w_b, xi, preferred_element_type=jnp.float32) + b)  # (2C, F)
    z = _gelu(_inst_norm(z))
    yr = z[:c].astype(jnp.bfloat16)
    yi = z[c:].astype(jnp.bfloat16)
    return (jnp.dot(yr, cr, preferred_element_type=jnp.float32)
            + jnp.dot(yi, ci, preferred_element_type=jnp.float32))    # (C, L)


def _spectral_transform_kernel(x_ref, w1_ref, wfa_ref, wfb_ref, bf_ref,
                               wla_ref, wlb_ref, bl_ref, w2_ref,
                               fwd1_ref, cr1_ref, ci1_ref,
                               fwd2_ref, cr2_ref, ci2_ref, o_ref):
    nb = x_ref.shape[0]
    L = x_ref.shape[-1]
    c2 = w1_ref.shape[0]
    half_c = c2 // 2
    half_l = L // 2

    # Constants are whole-array VMEM residents; load them once per grid step.
    w1 = w1_ref[...]
    w2 = w2_ref[...]
    wfa, wfb, bfv = wfa_ref[...], wfb_ref[...], bf_ref[...]
    wla, wlb, blv = wla_ref[...], wlb_ref[...], bl_ref[...]
    fwd1, cr1, ci1 = fwd1_ref[...], cr1_ref[...], ci1_ref[...]
    fwd2, cr2, ci2 = fwd2_ref[...], cr2_ref[...], ci2_ref[...]

    def one_sample(i, carry):
        # conv1: 1x1 conv (no bias) -> InstanceNorm -> GELU
        xb = x_ref[i].astype(jnp.bfloat16)                            # (Cin, L)
        h = jnp.dot(w1, xb, preferred_element_type=jnp.float32)       # (C2, L)
        h = _gelu(_inst_norm(h))

        # global Fourier unit
        fu = _fourier_unit(h, fwd1, cr1, ci1, wfa, wfb, bfv)          # (C2, L)

        # local Fourier unit: first half channels, length split in two and
        # stacked on the channel axis.
        xs_in = jnp.concatenate([h[:half_c, :half_l], h[:half_c, half_l:]],
                                axis=0)                               # (C2, L/2)
        xs = _fourier_unit(xs_in, fwd2, cr2, ci2, wla, wlb, blv)      # (C2, L/2)

        # conv2 on (h + fu + tile(xs, 2)); the tiling is folded into the output
        # adds, so the LFU branch is an L/2-wide matmul and no (C2, L) copy.
        s = (h + fu).astype(jnp.bfloat16)
        out_main = jnp.dot(w2, s, preferred_element_type=jnp.float32)             # (Cout, L)
        out_lfu = jnp.dot(w2, xs.astype(jnp.bfloat16),
                          preferred_element_type=jnp.float32)                     # (Cout, L/2)

        o_ref[i, :, pl.ds(0, half_l)] = (
            out_main[:, :half_l] + out_lfu).astype(o_ref.dtype)
        o_ref[i, :, pl.ds(half_l, half_l)] = (
            out_main[:, half_l:] + out_lfu).astype(o_ref.dtype)
        return carry

    jax.lax.fori_loop(0, nb, one_sample, 0, unroll=True)


def _make_dft_mats(L, dtype=jnp.bfloat16):
    """Ortho-normalized rfft/irfft as dense matrices for even L.

    Returns:
      fwd: (L, 2F)  fused [cos | -sin] forward basis (Re | Im of rfft)
      cr:  (F, L)   inverse basis applied to the real coefficients
      ci:  (F, L)   inverse basis applied to the imaginary coefficients
    """
    F = L // 2 + 1
    n = jnp.arange(L, dtype=jnp.float32)[:, None]
    k = jnp.arange(F, dtype=jnp.float32)[None, :]
    ang = 2.0 * jnp.pi * n * k / L
    scale = 1.0 / math.sqrt(L)
    cf = jnp.cos(ang) * scale                                   # (L, F)
    sf = -jnp.sin(ang) * scale                                  # (L, F)
    fwd = jnp.concatenate([cf, sf], axis=1).astype(dtype)       # (L, 2F)
    wr = jnp.ones((F,), jnp.float32).at[1:F - 1].set(2.0)       # DC/Nyquist weight 1
    wi = jnp.zeros((F,), jnp.float32).at[1:F - 1].set(2.0)      # imag DC/Nyquist dropped
    cr = ((wr[:, None] * jnp.cos(ang.T)) * scale).astype(dtype)     # (F, L)
    ci = ((wi[:, None] * (-jnp.sin(ang.T))) * scale).astype(dtype)  # (F, L)
    return fwd, cr, ci


def spectral_transform(x, params, *, batch_block=None):
    N, Cin, L = x.shape
    assert L % 4 == 0, "even L (and even L//2 for the LFU split) required"
    w1, wf, bfc, wl, blc, w2 = params
    C2 = w1.shape[0]
    Cout = w2.shape[0]

    # Several batch samples per grid step to amortize per-step overhead.
    nb = batch_block or next(n for n in (4, 2, 1) if N % n == 0)
    assert N % nb == 0

    fwd1, cr1, ci1 = _make_dft_mats(L)
    fwd2, cr2, ci2 = _make_dft_mats(L // 2)

    b16 = jnp.bfloat16
    # Split the FourierUnit 1x1-conv weights host-side (Re / Im halves of the
    # input channels) so the kernel never builds the (2C, F) channel concat.
    consts = (
        w1.astype(b16),
        wf[:, :C2].astype(b16), wf[:, C2:].astype(b16), bfc.astype(jnp.float32),
        wl[:, :C2].astype(b16), wl[:, C2:].astype(b16), blc.astype(jnp.float32),
        w2.astype(b16),
        fwd1, cr1, ci1, fwd2, cr2, ci2,
    )

    # VMEM budget: single-buffered constants + double-buffered x/out blocks +
    # rough per-sample intermediates. Only raise the scoped limit if needed.
    const_bytes = sum(int(a.size) * a.dtype.itemsize for a in consts)
    block_bytes = 2 * 4 * nb * (Cin + Cout) * L
    work_bytes = 32 * 4 * C2 * L
    vmem_est = const_bytes + block_bytes + work_bytes
    vmem_limit = None if vmem_est < 24 * 2 ** 20 else min(2 * vmem_est, 64 * 2 ** 20)

    def build(single_buffer_consts):
        if single_buffer_consts:
            # Whole-array VMEM residents: no block pipeline, one buffer each.
            const_specs = [pl.BlockSpec(memory_space=pltpu.MemorySpace.VMEM)
                           for _ in consts]
        else:
            # Compatibility fallback: full-shape blocked specs (fetched once via
            # the constant index_map, but double-buffered by the pipeline).
            const_specs = [pl.BlockSpec(a.shape, lambda *_, nd=a.ndim: (0,) * nd)
                           for a in consts]
        return pl.pallas_call(
            _spectral_transform_kernel,
            out_shape=jax.ShapeDtypeStruct((N, Cout, L), jnp.float32),
            grid_spec=pltpu.PrefetchScalarGridSpec(
                num_scalar_prefetch=0,
                grid=(N // nb,),
                in_specs=[pl.BlockSpec((nb, Cin, L), lambda b: (b, 0, 0))]
                         + const_specs,
                out_specs=pl.BlockSpec((nb, Cout, L), lambda b: (b, 0, 0))),
            compiler_params=pltpu.CompilerParams(
                dimension_semantics=("parallel",),
                vmem_limit_bytes=vmem_limit),
        )

    try:
        return build(True)(x, *consts)
    except Exception:  # pragma: no cover — older-Pallas fallback, never on error-free path
        return build(False)(x, *consts)


def reference(x, params):
    """Pure-JAX f32 reference mirroring the PyTorch forward (uses jnp.fft)."""
    w1, wf, bfc, wl, blc, w2 = params

    def inorm(v, eps=1e-5):
        mu = v.mean(-1, keepdims=True)
        var = ((v - mu) ** 2).mean(-1, keepdims=True)
        return (v - mu) / jnp.sqrt(var + eps)

    def gelu(v):
        return 0.5 * v * (1.0 + jax.lax.erf(v / jnp.sqrt(jnp.float32(2.0))))

    def fu(v, w, b):
        xf = jnp.fft.rfft(v, norm="ortho")
        z = jnp.concatenate([xf.real, xf.imag], axis=1)
        z = jnp.einsum("oc,ncf->nof", w, z) + b[None]
        z = gelu(inorm(z))
        c = v.shape[1]
        yr, yi = z[:, :c], z[:, c:]
        return jnp.fft.irfft(yr + 1j * yi, norm="ortho")

    h = gelu(inorm(jnp.einsum("oc,ncl->nol", w1, x)))
    fu_out = fu(h, wf, bfc)
    C2, L = h.shape[1], h.shape[-1]
    xs_in = jnp.concatenate([h[:, :C2 // 2, :L // 2], h[:, :C2 // 2, L // 2:]],
                            axis=1)
    xs = fu(xs_in, wl, blc)
    xs = jnp.concatenate([xs, xs], axis=-1)
    return jnp.einsum("oc,ncl->nol", w2, h + fu_out + xs)


if __name__ == "__main__":
    key = jax.random.PRNGKey(0)
    N, Cin, Cout, L = 2, 4, 8, 16
    C2 = Cout // 2

    ks = jax.random.split(key, 7)
    x = jax.random.normal(ks[0], (N, Cin, L), jnp.float32)
    # Deterministic synthetic parameters (shapes from the module's __init__).
    w1 = jax.random.normal(ks[1], (C2, Cin), jnp.float32) * 0.3          # conv1 weight
    wf = jax.random.normal(ks[2], (2 * C2, 2 * C2), jnp.float32) * 0.3   # fu.conv_fft weight
    bf = jax.random.normal(ks[3], (2 * C2, 1), jnp.float32) * 0.1        # fu.conv_fft bias
    wl = jax.random.normal(ks[4], (2 * C2, 2 * C2), jnp.float32) * 0.3   # lfu.conv_fft weight
    bl = jax.random.normal(ks[5], (2 * C2, 1), jnp.float32) * 0.1        # lfu.conv_fft bias
    w2 = jax.random.normal(ks[6], (Cout, C2), jnp.float32) * 0.3         # conv2 weight
    params = (w1, wf, bf, wl, bl, w2)

    out = jax.block_until_ready(spectral_transform(x, params))
    ref = reference(x, params)

    assert out.shape == (N, Cout, L)
    max_err = float(jnp.max(jnp.abs(out - ref)))
    # Tolerance sized for bf16 MXU operands with f32 accumulation.
    assert jnp.allclose(out, ref, atol=5e-2, rtol=2e-2), max_err
    print("KERNEL_OK")
</pallas_src>

<mosaic_0001>
module attributes {stable_mosaic.version = 11 : i64} {
  func.func @_spectral_transform_kernel(%arg0: i32, %arg1: memref<2x4x16xf32, #tpu.memory_space<vmem>>, %arg2: memref<4x4xbf16, #tpu.memory_space<vmem>>, %arg3: memref<8x4xbf16, #tpu.memory_space<vmem>>, %arg4: memref<8x4xbf16, #tpu.memory_space<vmem>>, %arg5: memref<8x1xf32, #tpu.memory_space<vmem>>, %arg6: memref<8x4xbf16, #tpu.memory_space<vmem>>, %arg7: memref<8x4xbf16, #tpu.memory_space<vmem>>, %arg8: memref<8x1xf32, #tpu.memory_space<vmem>>, %arg9: memref<8x4xbf16, #tpu.memory_space<vmem>>, %arg10: memref<16x18xbf16, #tpu.memory_space<vmem>>, %arg11: memref<9x16xbf16, #tpu.memory_space<vmem>>, %arg12: memref<9x16xbf16, #tpu.memory_space<vmem>>, %arg13: memref<8x10xbf16, #tpu.memory_space<vmem>>, %arg14: memref<5x8xbf16, #tpu.memory_space<vmem>>, %arg15: memref<5x8xbf16, #tpu.memory_space<vmem>>, %arg16: memref<2x8x16xf32, #tpu.memory_space<vmem>>) attributes {dimension_semantics = [#tpu.dimension_semantics<parallel>], iteration_bounds = array<i64: 1>, scalar_prefetch = 0 : i64, scratch_operands = 0 : i64, tpu.core_type = #tpu.core_type<tc>, window_params = [{transform_indices = @transform_0, window_bounds = array<i64: 2, 4, 16>}, {pipeline_mode = #tpu.pipeline_mode<synchronous>, transform_indices = @transform_1, window_bounds = array<i64: 4, 4>}, {pipeline_mode = #tpu.pipeline_mode<synchronous>, transform_indices = @transform_2, window_bounds = array<i64: 8, 4>}, {pipeline_mode = #tpu.pipeline_mode<synchronous>, transform_indices = @transform_3, window_bounds = array<i64: 8, 4>}, {pipeline_mode = #tpu.pipeline_mode<synchronous>, transform_indices = @transform_4, window_bounds = array<i64: 8, 1>}, {pipeline_mode = #tpu.pipeline_mode<synchronous>, transform_indices = @transform_5, window_bounds = array<i64: 8, 4>}, {pipeline_mode = #tpu.pipeline_mode<synchronous>, transform_indices = @transform_6, window_bounds = array<i64: 8, 4>}, {pipeline_mode = #tpu.pipeline_mode<synchronous>, transform_indices = @transform_7, window_bounds = array<i64: 8, 1>}, {pipeline_mode = #tpu.pipeline_mode<synchronous>, transform_indices = @transform_8, window_bounds = array<i64: 8, 4>}, {pipeline_mode = #tpu.pipeline_mode<synchronous>, transform_indices = @transform_9, window_bounds = array<i64: 16, 18>}, {pipeline_mode = #tpu.pipeline_mode<synchronous>, transform_indices = @transform_10, window_bounds = array<i64: 9, 16>}, {pipeline_mode = #tpu.pipeline_mode<synchronous>, transform_indices = @transform_11, window_bounds = array<i64: 9, 16>}, {pipeline_mode = #tpu.pipeline_mode<synchronous>, transform_indices = @transform_12, window_bounds = array<i64: 8, 10>}, {pipeline_mode = #tpu.pipeline_mode<synchronous>, transform_indices = @transform_13, window_bounds = array<i64: 5, 8>}, {pipeline_mode = #tpu.pipeline_mode<synchronous>, transform_indices = @transform_14, window_bounds = array<i64: 5, 8>}, {transform_indices = @transform_15, window_bounds = array<i64: 2, 8, 16>}]} {
    %c0 = arith.constant 0 : index
    %c0_0 = arith.constant 0 : index
    %0 = vector.load %arg2[%c0, %c0_0] : memref<4x4xbf16, #tpu.memory_space<vmem>>, vector<4x4xbf16>
    %c0_1 = arith.constant 0 : index
    %c0_2 = arith.constant 0 : index
    %1 = vector.load %arg9[%c0_1, %c0_2] : memref<8x4xbf16, #tpu.memory_space<vmem>>, vector<8x4xbf16>
    %c0_3 = arith.constant 0 : index
    %c0_4 = arith.constant 0 : index
    %2 = vector.load %arg3[%c0_3, %c0_4] : memref<8x4xbf16, #tpu.memory_space<vmem>>, vector<8x4xbf16>
    %c0_5 = arith.constant 0 : index
    %c0_6 = arith.constant 0 : index
    %3 = vector.load %arg4[%c0_5, %c0_6] : memref<8x4xbf16, #tpu.memory_space<vmem>>, vector<8x4xbf16>
    %c0_7 = arith.constant 0 : index
    %c0_8 = arith.constant 0 : index
    %4 = vector.load %arg5[%c0_7, %c0_8] : memref<8x1xf32, #tpu.memory_space<vmem>>, vector<8x1xf32>
    %c0_9 = arith.constant 0 : index
    %c0_10 = arith.constant 0 : index
    %5 = vector.load %arg6[%c0_9, %c0_10] : memref<8x4xbf16, #tpu.memory_space<vmem>>, vector<8x4xbf16>
    %c0_11 = arith.constant 0 : index
    %c0_12 = arith.constant 0 : index
    %6 = vector.load %arg7[%c0_11, %c0_12] : memref<8x4xbf16, #tpu.memory_space<vmem>>, vector<8x4xbf16>
    %c0_13 = arith.constant 0 : index
    %c0_14 = arith.constant 0 : index
    %7 = vector.load %arg8[%c0_13, %c0_14] : memref<8x1xf32, #tpu.memory_space<vmem>>, vector<8x1xf32>
    %c0_15 = arith.constant 0 : index
    %c0_16 = arith.constant 0 : index
    %8 = vector.load %arg10[%c0_15, %c0_16] : memref<16x18xbf16, #tpu.memory_space<vmem>>, vector<16x18xbf16>
    %c0_17 = arith.constant 0 : index
    %c0_18 = arith.constant 0 : index
    %9 = vector.load %arg11[%c0_17, %c0_18] : memref<9x16xbf16, #tpu.memory_space<vmem>>, vector<9x16xbf16>
    %c0_19 = arith.constant 0 : index
    %c0_20 = arith.constant 0 : index
    %10 = vector.load %arg12[%c0_19, %c0_20] : memref<9x16xbf16, #tpu.memory_space<vmem>>, vector<9x16xbf16>
    %c0_21 = arith.constant 0 : index
    %c0_22 = arith.constant 0 : index
    %11 = vector.load %arg13[%c0_21, %c0_22] : memref<8x10xbf16, #tpu.memory_space<vmem>>, vector<8x10xbf16>
    %c0_23 = arith.constant 0 : index
    %c0_24 = arith.constant 0 : index
    %12 = vector.load %arg14[%c0_23, %c0_24] : memref<5x8xbf16, #tpu.memory_space<vmem>>, vector<5x8xbf16>
    %c0_25 = arith.constant 0 : index
    %c0_26 = arith.constant 0 : index
    %13 = vector.load %arg15[%c0_25, %c0_26] : memref<5x8xbf16, #tpu.memory_space<vmem>>, vector<5x8xbf16>
    %c0_i32 = arith.constant 0 : i32
    %14 = arith.index_cast %c0_i32 : i32 to index
    %c0_27 = arith.constant 0 : index
    %c0_28 = arith.constant 0 : index
    %15 = vector.load %arg1[%14, %c0_27, %c0_28] : memref<2x4x16xf32, #tpu.memory_space<vmem>>, vector<1x4x16xf32>
    %16 = vector.shape_cast %15 : vector<1x4x16xf32> to vector<4x16xf32>
    %17 = arith.truncf %16 : vector<4x16xf32> to vector<4x16xbf16>
    %cst = arith.constant dense<0.000000e+00> : vector<4x16xf32>
    %18 = tpu.matmul %0, %17, %cst {dimension_numbers = #tpu.dot_dimension_numbers<[1], [0], [0], [1], [0, 0, 1, 1], [], []>} : vector<4x4xbf16>, vector<4x16xbf16>, vector<4x16xf32> -> vector<4x16xf32>
    %cst_29 = arith.constant dense<0.000000e+00> : vector<4xf32>
    %19 = vector.multi_reduction <add>, %18, %cst_29 [1] : vector<4x16xf32> to vector<4xf32>
    %20 = vector.shape_cast %19 : vector<4xf32> to vector<4x1xf32>
    %cst_30 = arith.constant 6.250000e-02 : f32
    %21 = vector.broadcast %cst_30 : f32 to vector<4x1xf32>
    %22 = arith.mulf %20, %21 : vector<4x1xf32>
    %23 = arith.mulf %18, %18 : vector<4x16xf32>
    %cst_31 = arith.constant dense<0.000000e+00> : vector<4xf32>
    %24 = vector.multi_reduction <add>, %23, %cst_31 [1] : vector<4x16xf32> to vector<4xf32>
    %25 = vector.shape_cast %24 : vector<4xf32> to vector<4x1xf32>
    %cst_32 = arith.constant 6.250000e-02 : f32
    %26 = vector.broadcast %cst_32 : f32 to vector<4x1xf32>
    %27 = arith.mulf %25, %26 : vector<4x1xf32>
    %28 = arith.mulf %22, %22 : vector<4x1xf32>
    %29 = arith.subf %27, %28 : vector<4x1xf32>
    %cst_33 = arith.constant 0.000000e+00 : f32
    %30 = vector.broadcast %cst_33 : f32 to vector<4x1xf32>
    %31 = arith.maximumf %29, %30 : vector<4x1xf32>
    %32 = vector.broadcast %22 : vector<4x1xf32> to vector<4x16xf32>
    %33 = arith.subf %18, %32 : vector<4x16xf32>
    %cst_34 = arith.constant 9.99999974E-6 : f32
    %34 = vector.broadcast %cst_34 : f32 to vector<4x1xf32>
    %35 = arith.addf %31, %34 : vector<4x1xf32>
    %36 = math.rsqrt %35 : vector<4x1xf32>
    %37 = vector.broadcast %36 : vector<4x1xf32> to vector<4x16xf32>
    %38 = arith.mulf %33, %37 : vector<4x16xf32>
    %cst_35 = arith.constant 5.000000e-01 : f32
    %39 = vector.broadcast %cst_35 : f32 to vector<4x16xf32>
    %40 = arith.mulf %39, %38 : vector<4x16xf32>
    %cst_36 = arith.constant 0.707106769 : f32
    %41 = vector.broadcast %cst_36 : f32 to vector<4x16xf32>
    %42 = arith.mulf %38, %41 : vector<4x16xf32>
    %43 = math.erf %42 : vector<4x16xf32>
    %cst_37 = arith.constant 1.000000e+00 : f32
    %44 = vector.broadcast %cst_37 : f32 to vector<4x16xf32>
    %45 = arith.addf %44, %43 : vector<4x16xf32>
    %46 = arith.mulf %40, %45 : vector<4x16xf32>
    %47 = arith.truncf %46 : vector<4x16xf32> to vector<4x16xbf16>
    %cst_38 = arith.constant dense<0.000000e+00> : vector<4x18xf32>
    %48 = tpu.matmul %47, %8, %cst_38 {dimension_numbers = #tpu.dot_dimension_numbers<[1], [0], [0], [1], [0, 0, 1, 1], [], []>} : vector<4x16xbf16>, vector<16x18xbf16>, vector<4x18xf32> -> vector<4x18xf32>
    %49 = vector.extract_strided_slice %48 {offsets = [0, 0], sizes = [4, 9], strides = [1, 1]} : vector<4x18xf32> to vector<4x9xf32>
    %50 = arith.truncf %49 : vector<4x9xf32> to vector<4x9xbf16>
    %51 = vector.extract_strided_slice %48 {offsets = [0, 9], sizes = [4, 9], strides = [1, 1]} : vector<4x18xf32> to vector<4x9xf32>
    %52 = arith.truncf %51 : vector<4x9xf32> to vector<4x9xbf16>
    %cst_39 = arith.constant dense<0.000000e+00> : vector<8x9xf32>
    %53 = tpu.matmul %2, %50, %cst_39 {dimension_numbers = #tpu.dot_dimension_numbers<[1], [0], [0], [1], [0, 0, 1, 1], [], []>} : vector<8x4xbf16>, vector<4x9xbf16>, vector<8x9xf32> -> vector<8x9xf32>
    %cst_40 = arith.constant dense<0.000000e+00> : vector<8x9xf32>
    %54 = tpu.matmul %3, %52, %cst_40 {dimension_numbers = #tpu.dot_dimension_numbers<[1], [0], [0], [1], [0, 0, 1, 1], [], []>} : vector<8x4xbf16>, vector<4x9xbf16>, vector<8x9xf32> -> vector<8x9xf32>
    %55 = arith.addf %53, %54 : vector<8x9xf32>
    %56 = vector.broadcast %4 : vector<8x1xf32> to vector<8x9xf32>
    %57 = arith.addf %55, %56 : vector<8x9xf32>
    %cst_41 = arith.constant dense<0.000000e+00> : vector<8xf32>
    %58 = vector.multi_reduction <add>, %57, %cst_41 [1] : vector<8x9xf32> to vector<8xf32>
    %59 = vector.shape_cast %58 : vector<8xf32> to vector<8x1xf32>
    %cst_42 = arith.constant 0.111111112 : f32
    %60 = vector.broadcast %cst_42 : f32 to vector<8x1xf32>
    %61 = arith.mulf %59, %60 : vector<8x1xf32>
    %62 = arith.mulf %57, %57 : vector<8x9xf32>
    %cst_43 = arith.constant dense<0.000000e+00> : vector<8xf32>
    %63 = vector.multi_reduction <add>, %62, %cst_43 [1] : vector<8x9xf32> to vector<8xf32>
    %64 = vector.shape_cast %63 : vector<8xf32> to vector<8x1xf32>
    %cst_44 = arith.constant 0.111111112 : f32
    %65 = vector.broadcast %cst_44 : f32 to vector<8x1xf32>
    %66 = arith.mulf %64, %65 : vector<8x1xf32>
    %67 = arith.mulf %61, %61 : vector<8x1xf32>
    %68 = arith.subf %66, %67 : vector<8x1xf32>
    %cst_45 = arith.constant 0.000000e+00 : f32
    %69 = vector.broadcast %cst_45 : f32 to vector<8x1xf32>
    %70 = arith.maximumf %68, %69 : vector<8x1xf32>
    %71 = vector.broadcast %61 : vector<8x1xf32> to vector<8x9xf32>
    %72 = arith.subf %57, %71 : vector<8x9xf32>
    %cst_46 = arith.constant 9.99999974E-6 : f32
    %73 = vector.broadcast %cst_46 : f32 to vector<8x1xf32>
    %74 = arith.addf %70, %73 : vector<8x1xf32>
    %75 = math.rsqrt %74 : vector<8x1xf32>
    %76 = vector.broadcast %75 : vector<8x1xf32> to vector<8x9xf32>
    %77 = arith.mulf %72, %76 : vector<8x9xf32>
    %cst_47 = arith.constant 5.000000e-01 : f32
    %78 = vector.broadcast %cst_47 : f32 to vector<8x9xf32>
    %79 = arith.mulf %78, %77 : vector<8x9xf32>
    %cst_48 = arith.constant 0.707106769 : f32
    %80 = vector.broadcast %cst_48 : f32 to vector<8x9xf32>
    %81 = arith.mulf %77, %80 : vector<8x9xf32>
    %82 = math.erf %81 : vector<8x9xf32>
    %cst_49 = arith.constant 1.000000e+00 : f32
    %83 = vector.broadcast %cst_49 : f32 to vector<8x9xf32>
    %84 = arith.addf %83, %82 : vector<8x9xf32>
    %85 = arith.mulf %79, %84 : vector<8x9xf32>
    %86 = vector.extract_strided_slice %85 {offsets = [0, 0], sizes = [4, 9], strides = [1, 1]} : vector<8x9xf32> to vector<4x9xf32>
    %87 = arith.truncf %86 : vector<4x9xf32> to vector<4x9xbf16>
    %88 = vector.extract_strided_slice %85 {offsets = [4, 0], sizes = [4, 9], strides = [1, 1]} : vector<8x9xf32> to vector<4x9xf32>
    %89 = arith.truncf %88 : vector<4x9xf32> to vector<4x9xbf16>
    %cst_50 = arith.constant dense<0.000000e+00> : vector<4x16xf32>
    %90 = tpu.matmul %87, %9, %cst_50 {dimension_numbers = #tpu.dot_dimension_numbers<[1], [0], [0], [1], [0, 0, 1, 1], [], []>} : vector<4x9xbf16>, vector<9x16xbf16>, vector<4x16xf32> -> vector<4x16xf32>
    %cst_51 = arith.constant dense<0.000000e+00> : vector<4x16xf32>
    %91 = tpu.matmul %89, %10, %cst_51 {dimension_numbers = #tpu.dot_dimension_numbers<[1], [0], [0], [1], [0, 0, 1, 1], [], []>} : vector<4x9xbf16>, vector<9x16xbf16>, vector<4x16xf32> -> vector<4x16xf32>
    %92 = arith.addf %90, %91 : vector<4x16xf32>
    %93 = vector.extract_strided_slice %46 {offsets = [0, 0], sizes = [2, 8], strides = [1, 1]} : vector<4x16xf32> to vector<2x8xf32>
    %94 = vector.extract_strided_slice %46 {offsets = [0, 8], sizes = [2, 8], strides = [1, 1]} : vector<4x16xf32> to vector<2x8xf32>
    %95 = tpu.concatenate %93, %94 in 0 : vector<2x8xf32>, vector<2x8xf32> -> vector<4x8xf32>
    %96 = arith.truncf %95 : vector<4x8xf32> to vector<4x8xbf16>
    %cst_52 = arith.constant dense<0.000000e+00> : vector<4x10xf32>
    %97 = tpu.matmul %96, %11, %cst_52 {dimension_numbers = #tpu.dot_dimension_numbers<[1], [0], [0], [1], [0, 0, 1, 1], [], []>} : vector<4x8xbf16>, vector<8x10xbf16>, vector<4x10xf32> -> vector<4x10xf32>
    %98 = vector.extract_strided_slice %97 {offsets = [0, 0], sizes = [4, 5], strides = [1, 1]} : vector<4x10xf32> to vector<4x5xf32>
    %99 = arith.truncf %98 : vector<4x5xf32> to vector<4x5xbf16>
    %100 = vector.extract_strided_slice %97 {offsets = [0, 5], sizes = [4, 5], strides = [1, 1]} : vector<4x10xf32> to vector<4x5xf32>
    %101 = arith.truncf %100 : vector<4x5xf32> to vector<4x5xbf16>
    %cst_53 = arith.constant dense<0.000000e+00> : vector<8x5xf32>
    %102 = tpu.matmul %5, %99, %cst_53 {dimension_numbers = #tpu.dot_dimension_numbers<[1], [0], [0], [1], [0, 0, 1, 1], [], []>} : vector<8x4xbf16>, vector<4x5xbf16>, vector<8x5xf32> -> vector<8x5xf32>
    %cst_54 = arith.constant dense<0.000000e+00> : vector<8x5xf32>
    %103 = tpu.matmul %6, %101, %cst_54 {dimension_numbers = #tpu.dot_dimension_numbers<[1], [0], [0], [1], [0, 0, 1, 1], [], []>} : vector<8x4xbf16>, vector<4x5xbf16>, vector<8x5xf32> -> vector<8x5xf32>
    %104 = arith.addf %102, %103 : vector<8x5xf32>
    %105 = vector.broadcast %7 : vector<8x1xf32> to vector<8x5xf32>
    %106 = arith.addf %104, %105 : vector<8x5xf32>
    %cst_55 = arith.constant dense<0.000000e+00> : vector<8xf32>
    %107 = vector.multi_reduction <add>, %106, %cst_55 [1] : vector<8x5xf32> to vector<8xf32>
    %108 = vector.shape_cast %107 : vector<8xf32> to vector<8x1xf32>
    %cst_56 = arith.constant 2.000000e-01 : f32
    %109 = vector.broadcast %cst_56 : f32 to vector<8x1xf32>
    %110 = arith.mulf %108, %109 : vector<8x1xf32>
    %111 = arith.mulf %106, %106 : vector<8x5xf32>
    %cst_57 = arith.constant dense<0.000000e+00> : vector<8xf32>
    %112 = vector.multi_reduction <add>, %111, %cst_57 [1] : vector<8x5xf32> to vector<8xf32>
    %113 = vector.shape_cast %112 : vector<8xf32> to vector<8x1xf32>
    %cst_58 = arith.constant 2.000000e-01 : f32
    %114 = vector.broadcast %cst_58 : f32 to vector<8x1xf32>
    %115 = arith.mulf %113, %114 : vector<8x1xf32>
    %116 = arith.mulf %110, %110 : vector<8x1xf32>
    %117 = arith.subf %115, %116 : vector<8x1xf32>
    %cst_59 = arith.constant 0.000000e+00 : f32
    %118 = vector.broadcast %cst_59 : f32 to vector<8x1xf32>
    %119 = arith.maximumf %117, %118 : vector<8x1xf32>
    %120 = vector.broadcast %110 : vector<8x1xf32> to vector<8x5xf32>
    %121 = arith.subf %106, %120 : vector<8x5xf32>
    %cst_60 = arith.constant 9.99999974E-6 : f32
    %122 = vector.broadcast %cst_60 : f32 to vector<8x1xf32>
    %123 = arith.addf %119, %122 : vector<8x1xf32>
    %124 = math.rsqrt %123 : vector<8x1xf32>
    %125 = vector.broadcast %124 : vector<8x1xf32> to vector<8x5xf32>
    %126 = arith.mulf %121, %125 : vector<8x5xf32>
    %cst_61 = arith.constant 5.000000e-01 : f32
    %127 = vector.broadcast %cst_61 : f32 to vector<8x5xf32>
    %128 = arith.mulf %127, %126 : vector<8x5xf32>
    %cst_62 = arith.constant 0.707106769 : f32
    %129 = vector.broadcast %cst_62 : f32 to vector<8x5xf32>
    %130 = arith.mulf %126, %129 : vector<8x5xf32>
    %131 = math.erf %130 : vector<8x5xf32>
    %cst_63 = arith.constant 1.000000e+00 : f32
    %132 = vector.broadcast %cst_63 : f32 to vector<8x5xf32>
    %133 = arith.addf %132, %131 : vector<8x5xf32>
    %134 = arith.mulf %128, %133 : vector<8x5xf32>
    %135 = vector.extract_strided_slice %134 {offsets = [0, 0], sizes = [4, 5], strides = [1, 1]} : vector<8x5xf32> to vector<4x5xf32>
    %136 = arith.truncf %135 : vector<4x5xf32> to vector<4x5xbf16>
    %137 = vector.extract_strided_slice %134 {offsets = [4, 0], sizes = [4, 5], strides = [1, 1]} : vector<8x5xf32> to vector<4x5xf32>
    %138 = arith.truncf %137 : vector<4x5xf32> to vector<4x5xbf16>
    %cst_64 = arith.constant dense<0.000000e+00> : vector<4x8xf32>
    %139 = tpu.matmul %136, %12, %cst_64 {dimension_numbers = #tpu.dot_dimension_numbers<[1], [0], [0], [1], [0, 0, 1, 1], [], []>} : vector<4x5xbf16>, vector<5x8xbf16>, vector<4x8xf32> -> vector<4x8xf32>
    %cst_65 = arith.constant dense<0.000000e+00> : vector<4x8xf32>
    %140 = tpu.matmul %138, %13, %cst_65 {dimension_numbers = #tpu.dot_dimension_numbers<[1], [0], [0], [1], [0, 0, 1, 1], [], []>} : vector<4x5xbf16>, vector<5x8xbf16>, vector<4x8xf32> -> vector<4x8xf32>
    %141 = arith.addf %139, %140 : vector<4x8xf32>
    %142 = arith.addf %46, %92 : vector<4x16xf32>
    %143 = arith.truncf %142 : vector<4x16xf32> to vector<4x16xbf16>
    %cst_66 = arith.constant dense<0.000000e+00> : vector<8x16xf32>
    %144 = tpu.matmul %1, %143, %cst_66 {dimension_numbers = #tpu.dot_dimension_numbers<[1], [0], [0], [1], [0, 0, 1, 1], [], []>} : vector<8x4xbf16>, vector<4x16xbf16>, vector<8x16xf32> -> vector<8x16xf32>
    %145 = arith.truncf %141 : vector<4x8xf32> to vector<4x8xbf16>
    %cst_67 = arith.constant dense<0.000000e+00> : vector<8x8xf32>
    %146 = tpu.matmul %1, %145, %cst_67 {dimension_numbers = #tpu.dot_dimension_numbers<[1], [0], [0], [1], [0, 0, 1, 1], [], []>} : vector<8x4xbf16>, vector<4x8xbf16>, vector<8x8xf32> -> vector<8x8xf32>
    %147 = vector.extract_strided_slice %144 {offsets = [0, 0], sizes = [8, 8], strides = [1, 1]} : vector<8x16xf32> to vector<8x8xf32>
    %148 = arith.addf %147, %146 : vector<8x8xf32>
    %149 = arith.index_cast %c0_i32 : i32 to index
    %c0_68 = arith.constant 0 : index
    %c0_69 = arith.constant 0 : index
    %150 = vector.load %arg16[%149, %c0_68, %c0_69] : memref<2x8x16xf32, #tpu.memory_space<vmem>>, vector<1x8x8xf32>
    %151 = vector.shape_cast %150 : vector<1x8x8xf32> to vector<8x8xf32>
    %152 = vector.shape_cast %148 : vector<8x8xf32> to vector<1x8x8xf32>
    tpu.vector_store %arg16[%149, %c0_68, %c0_69], %152 {strides = array<i32>} : memref<2x8x16xf32, #tpu.memory_space<vmem>>, vector<1x8x8xf32>,
    %153 = vector.extract_strided_slice %144 {offsets = [0, 8], sizes = [8, 8], strides = [1, 1]} : vector<8x16xf32> to vector<8x8xf32>
    %154 = arith.addf %153, %146 : vector<8x8xf32>
    %155 = arith.index_cast %c0_i32 : i32 to index
    %c0_70 = arith.constant 0 : index
    %c8 = arith.constant 8 : index
    %156 = vector.load %arg16[%155, %c0_70, %c8] : memref<2x8x16xf32, #tpu.memory_space<vmem>>, vector<1x8x8xf32>
    %157 = vector.shape_cast %156 : vector<1x8x8xf32> to vector<8x8xf32>
    %158 = vector.shape_cast %154 : vector<8x8xf32> to vector<1x8x8xf32>
    tpu.vector_store %arg16[%155, %c0_70, %c8], %158 {strides = array<i32>} : memref<2x8x16xf32, #tpu.memory_space<vmem>>, vector<1x8x8xf32>,
    %c1_i32 = arith.constant 1 : i32
    %159 = arith.index_cast %c1_i32 : i32 to index
    %c0_71 = arith.constant 0 : index
    %c0_72 = arith.constant 0 : index
    %160 = vector.load %arg1[%159, %c0_71, %c0_72] : memref<2x4x16xf32, #tpu.memory_space<vmem>>, vector<1x4x16xf32>
    %161 = vector.shape_cast %160 : vector<1x4x16xf32> to vector<4x16xf32>
    %162 = arith.truncf %161 : vector<4x16xf32> to vector<4x16xbf16>
    %cst_73 = arith.constant dense<0.000000e+00> : vector<4x16xf32>
    %163 = tpu.matmul %0, %162, %cst_73 {dimension_numbers = #tpu.dot_dimension_numbers<[1], [0], [0], [1], [0, 0, 1, 1], [], []>} : vector<4x4xbf16>, vector<4x16xbf16>, vector<4x16xf32> -> vector<4x16xf32>
    %cst_74 = arith.constant dense<0.000000e+00> : vector<4xf32>
    %164 = vector.multi_reduction <add>, %163, %cst_74 [1] : vector<4x16xf32> to vector<4xf32>
    %165 = vector.shape_cast %164 : vector<4xf32> to vector<4x1xf32>
    %cst_75 = arith.constant 6.250000e-02 : f32
    %166 = vector.broadcast %cst_75 : f32 to vector<4x1xf32>
    %167 = arith.mulf %165, %166 : vector<4x1xf32>
    %168 = arith.mulf %163, %163 : vector<4x16xf32>
    %cst_76 = arith.constant dense<0.000000e+00> : vector<4xf32>
    %169 = vector.multi_reduction <add>, %168, %cst_76 [1] : vector<4x16xf32> to vector<4xf32>
    %170 = vector.shape_cast %169 : vector<4xf32> to vector<4x1xf32>
    %cst_77 = arith.constant 6.250000e-02 : f32
    %171 = vector.broadcast %cst_77 : f32 to vector<4x1xf32>
    %172 = arith.mulf %170, %171 : vector<4x1xf32>
    %173 = arith.mulf %167, %167 : vector<4x1xf32>
    %174 = arith.subf %172, %173 : vector<4x1xf32>
    %cst_78 = arith.constant 0.000000e+00 : f32
    %175 = vector.broadcast %cst_78 : f32 to vector<4x1xf32>
    %176 = arith.maximumf %174, %175 : vector<4x1xf32>
    %177 = vector.broadcast %167 : vector<4x1xf32> to vector<4x16xf32>
    %178 = arith.subf %163, %177 : vector<4x16xf32>
    %cst_79 = arith.constant 9.99999974E-6 : f32
    %179 = vector.broadcast %cst_79 : f32 to vector<4x1xf32>
    %180 = arith.addf %176, %179 : vector<4x1xf32>
    %181 = math.rsqrt %180 : vector<4x1xf32>
    %182 = vector.broadcast %181 : vector<4x1xf32> to vector<4x16xf32>
    %183 = arith.mulf %178, %182 : vector<4x16xf32>
    %cst_80 = arith.constant 5.000000e-01 : f32
    %184 = vector.broadcast %cst_80 : f32 to vector<4x16xf32>
    %185 = arith.mulf %184, %183 : vector<4x16xf32>
    %cst_81 = arith.constant 0.707106769 : f32
    %186 = vector.broadcast %cst_81 : f32 to vector<4x16xf32>
    %187 = arith.mulf %183, %186 : vector<4x16xf32>
    %188 = math.erf %187 : vector<4x16xf32>
    %cst_82 = arith.constant 1.000000e+00 : f32
    %189 = vector.broadcast %cst_82 : f32 to vector<4x16xf32>
    %190 = arith.addf %189, %188 : vector<4x16xf32>
    %191 = arith.mulf %185, %190 : vector<4x16xf32>
    %192 = arith.truncf %191 : vector<4x16xf32> to vector<4x16xbf16>
    %cst_83 = arith.constant dense<0.000000e+00> : vector<4x18xf32>
    %193 = tpu.matmul %192, %8, %cst_83 {dimension_numbers = #tpu.dot_dimension_numbers<[1], [0], [0], [1], [0, 0, 1, 1], [], []>} : vector<4x16xbf16>, vector<16x18xbf16>, vector<4x18xf32> -> vector<4x18xf32>
    %194 = vector.extract_strided_slice %193 {offsets = [0, 0], sizes = [4, 9], strides = [1, 1]} : vector<4x18xf32> to vector<4x9xf32>
    %195 = arith.truncf %194 : vector<4x9xf32> to vector<4x9xbf16>
    %196 = vector.extract_strided_slice %193 {offsets = [0, 9], sizes = [4, 9], strides = [1, 1]} : vector<4x18xf32> to vector<4x9xf32>
    %197 = arith.truncf %196 : vector<4x9xf32> to vector<4x9xbf16>
    %cst_84 = arith.constant dense<0.000000e+00> : vector<8x9xf32>
    %198 = tpu.matmul %2, %195, %cst_84 {dimension_numbers = #tpu.dot_dimension_numbers<[1], [0], [0], [1], [0, 0, 1, 1], [], []>} : vector<8x4xbf16>, vector<4x9xbf16>, vector<8x9xf32> -> vector<8x9xf32>
    %cst_85 = arith.constant dense<0.000000e+00> : vector<8x9xf32>
    %199 = tpu.matmul %3, %197, %cst_85 {dimension_numbers = #tpu.dot_dimension_numbers<[1], [0], [0], [1], [0, 0, 1, 1], [], []>} : vector<8x4xbf16>, vector<4x9xbf16>, vector<8x9xf32> -> vector<8x9xf32>
    %200 = arith.addf %198, %199 : vector<8x9xf32>
    %201 = vector.broadcast %4 : vector<8x1xf32> to vector<8x9xf32>
    %202 = arith.addf %200, %201 : vector<8x9xf32>
    %cst_86 = arith.constant dense<0.000000e+00> : vector<8xf32>
    %203 = vector.multi_reduction <add>, %202, %cst_86 [1] : vector<8x9xf32> to vector<8xf32>
    %204 = vector.shape_cast %203 : vector<8xf32> to vector<8x1xf32>
    %cst_87 = arith.constant 0.111111112 : f32
    %205 = vector.broadcast %cst_87 : f32 to vector<8x1xf32>
    %206 = arith.mulf %204, %205 : vector<8x1xf32>
    %207 = arith.mulf %202, %202 : vector<8x9xf32>
    %cst_88 = arith.constant dense<0.000000e+00> : vector<8xf32>
    %208 = vector.multi_reduction <add>, %207, %cst_88 [1] : vector<8x9xf32> to vector<8xf32>
    %209 = vector.shape_cast %208 : vector<8xf32> to vector<8x1xf32>
    %cst_89 = arith.constant 0.111111112 : f32
    %210 = vector.broadcast %cst_89 : f32 to vector<8x1xf32>
    %211 = arith.mulf %209, %210 : vector<8x1xf32>
    %212 = arith.mulf %206, %206 : vector<8x1xf32>
    %213 = arith.subf %211, %212 : vector<8x1xf32>
    %cst_90 = arith.constant 0.000000e+00 : f32
    %214 = vector.broadcast %cst_90 : f32 to vector<8x1xf32>
    %215 = arith.maximumf %213, %214 : vector<8x1xf32>
    %216 = vector.broadcast %206 : vector<8x1xf32> to vector<8x9xf32>
    %217 = arith.subf %202, %216 : vector<8x9xf32>
    %cst_91 = arith.constant 9.99999974E-6 : f32
    %218 = vector.broadcast %cst_91 : f32 to vector<8x1xf32>
    %219 = arith.addf %215, %218 : vector<8x1xf32>
    %220 = math.rsqrt %219 : vector<8x1xf32>
    %221 = vector.broadcast %220 : vector<8x1xf32> to vector<8x9xf32>
    %222 = arith.mulf %217, %221 : vector<8x9xf32>
    %cst_92 = arith.constant 5.000000e-01 : f32
    %223 = vector.broadcast %cst_92 : f32 to vector<8x9xf32>
    %224 = arith.mulf %223, %222 : vector<8x9xf32>
    %cst_93 = arith.constant 0.707106769 : f32
    %225 = vector.broadcast %cst_93 : f32 to vector<8x9xf32>
    %226 = arith.mulf %222, %225 : vector<8x9xf32>
    %227 = math.erf %226 : vector<8x9xf32>
    %cst_94 = arith.constant 1.000000e+00 : f32
    %228 = vector.broadcast %cst_94 : f32 to vector<8x9xf32>
    %229 = arith.addf %228, %227 : vector<8x9xf32>
    %230 = arith.mulf %224, %229 : vector<8x9xf32>
    %231 = vector.extract_strided_slice %230 {offsets = [0, 0], sizes = [4, 9], strides = [1, 1]} : vector<8x9xf32> to vector<4x9xf32>
    %232 = arith.truncf %231 : vector<4x9xf32> to vector<4x9xbf16>
    %233 = vector.extract_strided_slice %230 {offsets = [4, 0], sizes = [4, 9], strides = [1, 1]} : vector<8x9xf32> to vector<4x9xf32>
    %234 = arith.truncf %233 : vector<4x9xf32> to vector<4x9xbf16>
    %cst_95 = arith.constant dense<0.000000e+00> : vector<4x16xf32>
    %235 = tpu.matmul %232, %9, %cst_95 {dimension_numbers = #tpu.dot_dimension_numbers<[1], [0], [0], [1], [0, 0, 1, 1], [], []>} : vector<4x9xbf16>, vector<9x16xbf16>, vector<4x16xf32> -> vector<4x16xf32>
    %cst_96 = arith.constant dense<0.000000e+00> : vector<4x16xf32>
    %236 = tpu.matmul %234, %10, %cst_96 {dimension_numbers = #tpu.dot_dimension_numbers<[1], [0], [0], [1], [0, 0, 1, 1], [], []>} : vector<4x9xbf16>, vector<9x16xbf16>, vector<4x16xf32> -> vector<4x16xf32>
    %237 = arith.addf %235, %236 : vector<4x16xf32>
    %238 = vector.extract_strided_slice %191 {offsets = [0, 0], sizes = [2, 8], strides = [1, 1]} : vector<4x16xf32> to vector<2x8xf32>
    %239 = vector.extract_strided_slice %191 {offsets = [0, 8], sizes = [2, 8], strides = [1, 1]} : vector<4x16xf32> to vector<2x8xf32>
    %240 = tpu.concatenate %238, %239 in 0 : vector<2x8xf32>, vector<2x8xf32> -> vector<4x8xf32>
    %241 = arith.truncf %240 : vector<4x8xf32> to vector<4x8xbf16>
    %cst_97 = arith.constant dense<0.000000e+00> : vector<4x10xf32>
    %242 = tpu.matmul %241, %11, %cst_97 {dimension_numbers = #tpu.dot_dimension_numbers<[1], [0], [0], [1], [0, 0, 1, 1], [], []>} : vector<4x8xbf16>, vector<8x10xbf16>, vector<4x10xf32> -> vector<4x10xf32>
    %243 = vector.extract_strided_slice %242 {offsets = [0, 0], sizes = [4, 5], strides = [1, 1]} : vector<4x10xf32> to vector<4x5xf32>
    %244 = arith.truncf %243 : vector<4x5xf32> to vector<4x5xbf16>
    %245 = vector.extract_strided_slice %242 {offsets = [0, 5], sizes = [4, 5], strides = [1, 1]} : vector<4x10xf32> to vector<4x5xf32>
    %246 = arith.truncf %245 : vector<4x5xf32> to vector<4x5xbf16>
    %cst_98 = arith.constant dense<0.000000e+00> : vector<8x5xf32>
    %247 = tpu.matmul %5, %244, %cst_98 {dimension_numbers = #tpu.dot_dimension_numbers<[1], [0], [0], [1], [0, 0, 1, 1], [], []>} : vector<8x4xbf16>, vector<4x5xbf16>, vector<8x5xf32> -> vector<8x5xf32>
    %cst_99 = arith.constant dense<0.000000e+00> : vector<8x5xf32>
    %248 = tpu.matmul %6, %246, %cst_99 {dimension_numbers = #tpu.dot_dimension_numbers<[1], [0], [0], [1], [0, 0, 1, 1], [], []>} : vector<8x4xbf16>, vector<4x5xbf16>, vector<8x5xf32> -> vector<8x5xf32>
    %249 = arith.addf %247, %248 : vector<8x5xf32>
    %250 = vector.broadcast %7 : vector<8x1xf32> to vector<8x5xf32>
    %251 = arith.addf %249, %250 : vector<8x5xf32>
    %cst_100 = arith.constant dense<0.000000e+00> : vector<8xf32>
    %252 = vector.multi_reduction <add>, %251, %cst_100 [1] : vector<8x5xf32> to vector<8xf32>
    %253 = vector.shape_cast %252 : vector<8xf32> to vector<8x1xf32>
    %cst_101 = arith.constant 2.000000e-01 : f32
    %254 = vector.broadcast %cst_101 : f32 to vector<8x1xf32>
    %255 = arith.mulf %253, %254 : vector<8x1xf32>
    %256 = arith.mulf %251, %251 : vector<8x5xf32>
    %cst_102 = arith.constant dense<0.000000e+00> : vector<8xf32>
    %257 = vector.multi_reduction <add>, %256, %cst_102 [1] : vector<8x5xf32> to vector<8xf32>
    %258 = vector.shape_cast %257 : vector<8xf32> to vector<8x1xf32>
    %cst_103 = arith.constant 2.000000e-01 : f32
    %259 = vector.broadcast %cst_103 : f32 to vector<8x1xf32>
    %260 = arith.mulf %258, %259 : vector<8x1xf32>
    %261 = arith.mulf %255, %255 : vector<8x1xf32>
    %262 = arith.subf %260, %261 : vector<8x1xf32>
    %cst_104 = arith.constant 0.000000e+00 : f32
    %263 = vector.broadcast %cst_104 : f32 to vector<8x1xf32>
    %264 = arith.maximumf %262, %263 : vector<8x1xf32>
    %265 = vector.broadcast %255 : vector<8x1xf32> to vector<8x5xf32>
    %266 = arith.subf %251, %265 : vector<8x5xf32>
    %cst_105 = arith.constant 9.99999974E-6 : f32
    %267 = vector.broadcast %cst_105 : f32 to vector<8x1xf32>
    %268 = arith.addf %264, %267 : vector<8x1xf32>
    %269 = math.rsqrt %268 : vector<8x1xf32>
    %270 = vector.broadcast %269 : vector<8x1xf32> to vector<8x5xf32>
    %271 = arith.mulf %266, %270 : vector<8x5xf32>
    %cst_106 = arith.constant 5.000000e-01 : f32
    %272 = vector.broadcast %cst_106 : f32 to vector<8x5xf32>
    %273 = arith.mulf %272, %271 : vector<8x5xf32>
    %cst_107 = arith.constant 0.707106769 : f32
    %274 = vector.broadcast %cst_107 : f32 to vector<8x5xf32>
    %275 = arith.mulf %271, %274 : vector<8x5xf32>
    %276 = math.erf %275 : vector<8x5xf32>
    %cst_108 = arith.constant 1.000000e+00 : f32
    %277 = vector.broadcast %cst_108 : f32 to vector<8x5xf32>
    %278 = arith.addf %277, %276 : vector<8x5xf32>
    %279 = arith.mulf %273, %278 : vector<8x5xf32>
    %280 = vector.extract_strided_slice %279 {offsets = [0, 0], sizes = [4, 5], strides = [1, 1]} : vector<8x5xf32> to vector<4x5xf32>
    %281 = arith.truncf %280 : vector<4x5xf32> to vector<4x5xbf16>
    %282 = vector.extract_strided_slice %279 {offsets = [4, 0], sizes = [4, 5], strides = [1, 1]} : vector<8x5xf32> to vector<4x5xf32>
    %283 = arith.truncf %282 : vector<4x5xf32> to vector<4x5xbf16>
    %cst_109 = arith.constant dense<0.000000e+00> : vector<4x8xf32>
    %284 = tpu.matmul %281, %12, %cst_109 {dimension_numbers = #tpu.dot_dimension_numbers<[1], [0], [0], [1], [0, 0, 1, 1], [], []>} : vector<4x5xbf16>, vector<5x8xbf16>, vector<4x8xf32> -> vector<4x8xf32>
    %cst_110 = arith.constant dense<0.000000e+00> : vector<4x8xf32>
    %285 = tpu.matmul %283, %13, %cst_110 {dimension_numbers = #tpu.dot_dimension_numbers<[1], [0], [0], [1], [0, 0, 1, 1], [], []>} : vector<4x5xbf16>, vector<5x8xbf16>, vector<4x8xf32> -> vector<4x8xf32>
    %286 = arith.addf %284, %285 : vector<4x8xf32>
    %287 = arith.addf %191, %237 : vector<4x16xf32>
    %288 = arith.truncf %287 : vector<4x16xf32> to vector<4x16xbf16>
    %cst_111 = arith.constant dense<0.000000e+00> : vector<8x16xf32>
    %289 = tpu.matmul %1, %288, %cst_111 {dimension_numbers = #tpu.dot_dimension_numbers<[1], [0], [0], [1], [0, 0, 1, 1], [], []>} : vector<8x4xbf16>, vector<4x16xbf16>, vector<8x16xf32> -> vector<8x16xf32>
    %290 = arith.truncf %286 : vector<4x8xf32> to vector<4x8xbf16>
    %cst_112 = arith.constant dense<0.000000e+00> : vector<8x8xf32>
    %291 = tpu.matmul %1, %290, %cst_112 {dimension_numbers = #tpu.dot_dimension_numbers<[1], [0], [0], [1], [0, 0, 1, 1], [], []>} : vector<8x4xbf16>, vector<4x8xbf16>, vector<8x8xf32> -> vector<8x8xf32>
    %292 = vector.extract_strided_slice %289 {offsets = [0, 0], sizes = [8, 8], strides = [1, 1]} : vector<8x16xf32> to vector<8x8xf32>
    %293 = arith.addf %292, %291 : vector<8x8xf32>
    %294 = arith.index_cast %c1_i32 : i32 to index
    %c0_113 = arith.constant 0 : index
    %c0_114 = arith.constant 0 : index
    %295 = vector.load %arg16[%294, %c0_113, %c0_114] : memref<2x8x16xf32, #tpu.memory_space<vmem>>, vector<1x8x8xf32>
    %296 = vector.shape_cast %295 : vector<1x8x8xf32> to vector<8x8xf32>
    %297 = vector.shape_cast %293 : vector<8x8xf32> to vector<1x8x8xf32>
    tpu.vector_store %arg16[%294, %c0_113, %c0_114], %297 {strides = array<i32>} : memref<2x8x16xf32, #tpu.memory_space<vmem>>, vector<1x8x8xf32>,
    %298 = vector.extract_strided_slice %289 {offsets = [0, 8], sizes = [8, 8], strides = [1, 1]} : vector<8x16xf32> to vector<8x8xf32>
    %299 = arith.addf %298, %291 : vector<8x8xf32>
    %300 = arith.index_cast %c1_i32 : i32 to index
    %c0_115 = arith.constant 0 : index
    %c8_116 = arith.constant 8 : index
    %301 = vector.load %arg16[%300, %c0_115, %c8_116] : memref<2x8x16xf32, #tpu.memory_space<vmem>>, vector<1x8x8xf32>
    %302 = vector.shape_cast %301 : vector<1x8x8xf32> to vector<8x8xf32>
    %303 = vector.shape_cast %299 : vector<8x8xf32> to vector<1x8x8xf32>
    tpu.vector_store %arg16[%300, %c0_115, %c8_116], %303 {strides = array<i32>} : memref<2x8x16xf32, #tpu.memory_space<vmem>>, vector<1x8x8xf32>,
    %c2_i32 = arith.constant 2 : i32
    return
  }
  func.func @transform_0(%arg0: i32) -> (i32, i32, i32) {
    %c0_i32 = arith.constant 0 : i32
    %c0_i32_0 = arith.constant 0 : i32
    %c0_i32_1 = arith.constant 0 : i32
    return %arg0, %c0_i32, %c0_i32_0 : i32, i32, i32
  }
  func.func @transform_1(%arg0: i32) -> (i32, i32) {
    %c0_i32 = arith.constant 0 : i32
    %c0_i32_0 = arith.constant 0 : i32
    %c0_i32_1 = arith.constant 0 : i32
    return %c0_i32, %c0_i32_0 : i32, i32
  }
  func.func @transform_2(%arg0: i32) -> (i32, i32) {
    %c0_i32 = arith.constant 0 : i32
    %c0_i32_0 = arith.constant 0 : i32
    %c0_i32_1 = arith.constant 0 : i32
    return %c0_i32, %c0_i32_0 : i32, i32
  }
  func.func @transform_3(%arg0: i32) -> (i32, i32) {
    %c0_i32 = arith.constant 0 : i32
    %c0_i32_0 = arith.constant 0 : i32
    %c0_i32_1 = arith.constant 0 : i32
    return %c0_i32, %c0_i32_0 : i32, i32
  }
  func.func @transform_4(%arg0: i32) -> (i32, i32) {
    %c0_i32 = arith.constant 0 : i32
    %c0_i32_0 = arith.constant 0 : i32
    %c0_i32_1 = arith.constant 0 : i32
    return %c0_i32, %c0_i32_0 : i32, i32
  }
  func.func @transform_5(%arg0: i32) -> (i32, i32) {
    %c0_i32 = arith.constant 0 : i32
    %c0_i32_0 = arith.constant 0 : i32
    %c0_i32_1 = arith.constant 0 : i32
    return %c0_i32, %c0_i32_0 : i32, i32
  }
  func.func @transform_6(%arg0: i32) -> (i32, i32) {
    %c0_i32 = arith.constant 0 : i32
    %c0_i32_0 = arith.constant 0 : i32
    %c0_i32_1 = arith.constant 0 : i32
    return %c0_i32, %c0_i32_0 : i32, i32
  }
  func.func @transform_7(%arg0: i32) -> (i32, i32) {
    %c0_i32 = arith.constant 0 : i32
    %c0_i32_0 = arith.constant 0 : i32
    %c0_i32_1 = arith.constant 0 : i32
    return %c0_i32, %c0_i32_0 : i32, i32
  }
  func.func @transform_8(%arg0: i32) -> (i32, i32) {
    %c0_i32 = arith.constant 0 : i32
    %c0_i32_0 = arith.constant 0 : i32
    %c0_i32_1 = arith.constant 0 : i32
    return %c0_i32, %c0_i32_0 : i32, i32
  }
  func.func @transform_9(%arg0: i32) -> (i32, i32) {
    %c0_i32 = arith.constant 0 : i32
    %c0_i32_0 = arith.constant 0 : i32
    %c0_i32_1 = arith.constant 0 : i32
    return %c0_i32, %c0_i32_0 : i32, i32
  }
  func.func @transform_10(%arg0: i32) -> (i32, i32) {
    %c0_i32 = arith.constant 0 : i32
    %c0_i32_0 = arith.constant 0 : i32
    %c0_i32_1 = arith.constant 0 : i32
    return %c0_i32, %c0_i32_0 : i32, i32
  }
  func.func @transform_11(%arg0: i32) -> (i32, i32) {
    %c0_i32 = arith.constant 0 : i32
    %c0_i32_0 = arith.constant 0 : i32
    %c0_i32_1 = arith.constant 0 : i32
    return %c0_i32, %c0_i32_0 : i32, i32
  }
  func.func @transform_12(%arg0: i32) -> (i32, i32) {
    %c0_i32 = arith.constant 0 : i32
    %c0_i32_0 = arith.constant 0 : i32
    %c0_i32_1 = arith.constant 0 : i32
    return %c0_i32, %c0_i32_0 : i32, i32
  }
  func.func @transform_13(%arg0: i32) -> (i32, i32) {
    %c0_i32 = arith.constant 0 : i32
    %c0_i32_0 = arith.constant 0 : i32
    %c0_i32_1 = arith.constant 0 : i32
    return %c0_i32, %c0_i32_0 : i32, i32
  }
  func.func @transform_14(%arg0: i32) -> (i32, i32) {
    %c0_i32 = arith.constant 0 : i32
    %c0_i32_0 = arith.constant 0 : i32
    %c0_i32_1 = arith.constant 0 : i32
    return %c0_i32, %c0_i32_0 : i32, i32
  }
  func.func @transform_15(%arg0: i32) -> (i32, i32, i32) {
    %c0_i32 = arith.constant 0 : i32
    %c0_i32_0 = arith.constant 0 : i32
    %c0_i32_1 = arith.constant 0 : i32
    return %arg0, %c0_i32, %c0_i32_0 : i32, i32, i32
  }
}

module attributes {stable_mosaic.version = 11 : i64} {
  func.func @_spectral_transform_kernel(%arg0: i32, %arg1: memref<2x4x16xf32, #tpu.memory_space<vmem>>, %arg2: memref<4x4xbf16, #tpu.memory_space<vmem>>, %arg3: memref<8x4xbf16, #tpu.memory_space<vmem>>, %arg4: memref<8x4xbf16, #tpu.memory_space<vmem>>, %arg5: memref<8x1xf32, #tpu.memory_space<vmem>>, %arg6: memref<8x4xbf16, #tpu.memory_space<vmem>>, %arg7: memref<8x4xbf16, #tpu.memory_space<vmem>>, %arg8: memref<8x1xf32, #tpu.memory_space<vmem>>, %arg9: memref<8x4xbf16, #tpu.memory_space<vmem>>, %arg10: memref<16x18xbf16, #tpu.memory_space<vmem>>, %arg11: memref<9x16xbf16, #tpu.memory_space<vmem>>, %arg12: memref<9x16xbf16, #tpu.memory_space<vmem>>, %arg13: memref<8x10xbf16, #tpu.memory_space<vmem>>, %arg14: memref<5x8xbf16, #tpu.memory_space<vmem>>, %arg15: memref<5x8xbf16, #tpu.memory_space<vmem>>, %arg16: memref<2x8x16xf32, #tpu.memory_space<vmem>>) attributes {dimension_semantics = [#tpu.dimension_semantics<parallel>], iteration_bounds = array<i64: 1>, scalar_prefetch = 0 : i64, scratch_operands = 0 : i64, tpu.core_type = #tpu.core_type<tc>, window_params = [{transform_indices = @transform_0, window_bounds = array<i64: 2, 4, 16>}, {pipeline_mode = #tpu.pipeline_mode<synchronous>, transform_indices = @transform_1, window_bounds = array<i64: 4, 4>}, {pipeline_mode = #tpu.pipeline_mode<synchronous>, transform_indices = @transform_2, window_bounds = array<i64: 8, 4>}, {pipeline_mode = #tpu.pipeline_mode<synchronous>, transform_indices = @transform_3, window_bounds = array<i64: 8, 4>}, {pipeline_mode = #tpu.pipeline_mode<synchronous>, transform_indices = @transform_4, window_bounds = array<i64: 8, 1>}, {pipeline_mode = #tpu.pipeline_mode<synchronous>, transform_indices = @transform_5, window_bounds = array<i64: 8, 4>}, {pipeline_mode = #tpu.pipeline_mode<synchronous>, transform_indices = @transform_6, window_bounds = array<i64: 8, 4>}, {pipeline_mode = #tpu.pipeline_mode<synchronous>, transform_indices = @transform_7, window_bounds = array<i64: 8, 1>}, {pipeline_mode = #tpu.pipeline_mode<synchronous>, transform_indices = @transform_8, window_bounds = array<i64: 8, 4>}, {pipeline_mode = #tpu.pipeline_mode<synchronous>, transform_indices = @transform_9, window_bounds = array<i64: 16, 18>}, {pipeline_mode = #tpu.pipeline_mode<synchronous>, transform_indices = @transform_10, window_bounds = array<i64: 9, 16>}, {pipeline_mode = #tpu.pipeline_mode<synchronous>, transform_indices = @transform_11, window_bounds = array<i64: 9, 16>}, {pipeline_mode = #tpu.pipeline_mode<synchronous>, transform_indices = @transform_12, window_bounds = array<i64: 8, 10>}, {pipeline_mode = #tpu.pipeline_mode<synchronous>, transform_indices = @transform_13, window_bounds = array<i64: 5, 8>}, {pipeline_mode = #tpu.pipeline_mode<synchronous>, transform_indices = @transform_14, window_bounds = array<i64: 5, 8>}, {transform_indices = @transform_15, window_bounds = array<i64: 2, 8, 16>}]} {
    %c0 = arith.constant 0 : index
    %c0_0 = arith.constant 0 : index
    %0 = vector.load %arg2[%c0, %c0_0] : memref<4x4xbf16, #tpu.memory_space<vmem>>, vector<4x4xbf16>
    %c0_1 = arith.constant 0 : index
    %c0_2 = arith.constant 0 : index
    %1 = vector.load %arg9[%c0_1, %c0_2] : memref<8x4xbf16, #tpu.memory_space<vmem>>, vector<8x4xbf16>
    %c0_3 = arith.constant 0 : index
    %c0_4 = arith.constant 0 : index
    %2 = vector.load %arg3[%c0_3, %c0_4] : memref<8x4xbf16, #tpu.memory_space<vmem>>, vector<8x4xbf16>
    %c0_5 = arith.constant 0 : index
    %c0_6 = arith.constant 0 : index
    %3 = vector.load %arg4[%c0_5, %c0_6] : memref<8x4xbf16, #tpu.memory_space<vmem>>, vector<8x4xbf16>
    %c0_7 = arith.constant 0 : index
    %c0_8 = arith.constant 0 : index
    %4 = vector.load %arg5[%c0_7, %c0_8] : memref<8x1xf32, #tpu.memory_space<vmem>>, vector<8x1xf32>
    %c0_9 = arith.constant 0 : index
    %c0_10 = arith.constant 0 : index
    %5 = vector.load %arg6[%c0_9, %c0_10] : memref<8x4xbf16, #tpu.memory_space<vmem>>, vector<8x4xbf16>
    %c0_11 = arith.constant 0 : index
    %c0_12 = arith.constant 0 : index
    %6 = vector.load %arg7[%c0_11, %c0_12] : memref<8x4xbf16, #tpu.memory_space<vmem>>, vector<8x4xbf16>
    %c0_13 = arith.constant 0 : index
    %c0_14 = arith.constant 0 : index
    %7 = vector.load %arg8[%c0_13, %c0_14] : memref<8x1xf32, #tpu.memory_space<vmem>>, vector<8x1xf32>
    %c0_15 = arith.constant 0 : index
    %c0_16 = arith.constant 0 : index
    %8 = vector.load %arg10[%c0_15, %c0_16] : memref<16x18xbf16, #tpu.memory_space<vmem>>, vector<16x18xbf16>
    %c0_17 = arith.constant 0 : index
    %c0_18 = arith.constant 0 : index
    %9 = vector.load %arg11[%c0_17, %c0_18] : memref<9x16xbf16, #tpu.memory_space<vmem>>, vector<9x16xbf16>
    %c0_19 = arith.constant 0 : index
    %c0_20 = arith.constant 0 : index
    %10 = vector.load %arg12[%c0_19, %c0_20] : memref<9x16xbf16, #tpu.memory_space<vmem>>, vector<9x16xbf16>
    %c0_21 = arith.constant 0 : index
    %c0_22 = arith.constant 0 : index
    %11 = vector.load %arg13[%c0_21, %c0_22] : memref<8x10xbf16, #tpu.memory_space<vmem>>, vector<8x10xbf16>
    %c0_23 = arith.constant 0 : index
    %c0_24 = arith.constant 0 : index
    %12 = vector.load %arg14[%c0_23, %c0_24] : memref<5x8xbf16, #tpu.memory_space<vmem>>, vector<5x8xbf16>
    %c0_25 = arith.constant 0 : index
    %c0_26 = arith.constant 0 : index
    %13 = vector.load %arg15[%c0_25, %c0_26] : memref<5x8xbf16, #tpu.memory_space<vmem>>, vector<5x8xbf16>
    %c0_i32 = arith.constant 0 : i32
    %14 = arith.index_cast %c0_i32 : i32 to index
    %c0_27 = arith.constant 0 : index
    %c0_28 = arith.constant 0 : index
    %15 = vector.load %arg1[%14, %c0_27, %c0_28] : memref<2x4x16xf32, #tpu.memory_space<vmem>>, vector<1x4x16xf32>
    %16 = vector.shape_cast %15 : vector<1x4x16xf32> to vector<4x16xf32>
    %17 = arith.truncf %16 : vector<4x16xf32> to vector<4x16xbf16>
    %cst = arith.constant dense<0.000000e+00> : vector<4x16xf32>
    %18 = tpu.matmul %0, %17, %cst {dimension_numbers = #tpu.dot_dimension_numbers<[1], [0], [0], [1], [0, 0, 1, 1], [], []>} : vector<4x4xbf16>, vector<4x16xbf16>, vector<4x16xf32> -> vector<4x16xf32>
    %cst_29 = arith.constant dense<0.000000e+00> : vector<4xf32>
    %19 = vector.multi_reduction <add>, %18, %cst_29 [1] : vector<4x16xf32> to vector<4xf32>
    %20 = vector.shape_cast %19 : vector<4xf32> to vector<4x1xf32>
    %cst_30 = arith.constant 6.250000e-02 : f32
    %21 = vector.broadcast %cst_30 : f32 to vector<4x1xf32>
    %22 = arith.mulf %20, %21 : vector<4x1xf32>
    %23 = arith.mulf %18, %18 : vector<4x16xf32>
    %cst_31 = arith.constant dense<0.000000e+00> : vector<4xf32>
    %24 = vector.multi_reduction <add>, %23, %cst_31 [1] : vector<4x16xf32> to vector<4xf32>
    %25 = vector.shape_cast %24 : vector<4xf32> to vector<4x1xf32>
    %cst_32 = arith.constant 6.250000e-02 : f32
    %26 = vector.broadcast %cst_32 : f32 to vector<4x1xf32>
    %27 = arith.mulf %25, %26 : vector<4x1xf32>
    %28 = arith.mulf %22, %22 : vector<4x1xf32>
    %29 = arith.subf %27, %28 : vector<4x1xf32>
    %cst_33 = arith.constant 0.000000e+00 : f32
    %30 = vector.broadcast %cst_33 : f32 to vector<4x1xf32>
    %31 = arith.maximumf %29, %30 : vector<4x1xf32>
    %32 = vector.broadcast %22 : vector<4x1xf32> to vector<4x16xf32>
    %33 = arith.subf %18, %32 : vector<4x16xf32>
    %cst_34 = arith.constant 9.99999974E-6 : f32
    %34 = vector.broadcast %cst_34 : f32 to vector<4x1xf32>
    %35 = arith.addf %31, %34 : vector<4x1xf32>
    %36 = math.rsqrt %35 : vector<4x1xf32>
    %37 = vector.broadcast %36 : vector<4x1xf32> to vector<4x16xf32>
    %38 = arith.mulf %33, %37 : vector<4x16xf32>
    %cst_35 = arith.constant 5.000000e-01 : f32
    %39 = vector.broadcast %cst_35 : f32 to vector<4x16xf32>
    %40 = arith.mulf %39, %38 : vector<4x16xf32>
    %cst_36 = arith.constant 0.707106769 : f32
    %41 = vector.broadcast %cst_36 : f32 to vector<4x16xf32>
    %42 = arith.mulf %38, %41 : vector<4x16xf32>
    %43 = math.erf %42 : vector<4x16xf32>
    %cst_37 = arith.constant 1.000000e+00 : f32
    %44 = vector.broadcast %cst_37 : f32 to vector<4x16xf32>
    %45 = arith.addf %44, %43 : vector<4x16xf32>
    %46 = arith.mulf %40, %45 : vector<4x16xf32>
    %47 = arith.truncf %46 : vector<4x16xf32> to vector<4x16xbf16>
    %cst_38 = arith.constant dense<0.000000e+00> : vector<4x18xf32>
    %48 = tpu.matmul %47, %8, %cst_38 {dimension_numbers = #tpu.dot_dimension_numbers<[1], [0], [0], [1], [0, 0, 1, 1], [], []>} : vector<4x16xbf16>, vector<16x18xbf16>, vector<4x18xf32> -> vector<4x18xf32>
    %49 = vector.extract_strided_slice %48 {offsets = [0, 0], sizes = [4, 9], strides = [1, 1]} : vector<4x18xf32> to vector<4x9xf32>
    %50 = arith.truncf %49 : vector<4x9xf32> to vector<4x9xbf16>
    %51 = vector.extract_strided_slice %48 {offsets = [0, 9], sizes = [4, 9], strides = [1, 1]} : vector<4x18xf32> to vector<4x9xf32>
    %52 = arith.truncf %51 : vector<4x9xf32> to vector<4x9xbf16>
    %cst_39 = arith.constant dense<0.000000e+00> : vector<8x9xf32>
    %53 = tpu.matmul %2, %50, %cst_39 {dimension_numbers = #tpu.dot_dimension_numbers<[1], [0], [0], [1], [0, 0, 1, 1], [], []>} : vector<8x4xbf16>, vector<4x9xbf16>, vector<8x9xf32> -> vector<8x9xf32>
    %cst_40 = arith.constant dense<0.000000e+00> : vector<8x9xf32>
    %54 = tpu.matmul %3, %52, %cst_40 {dimension_numbers = #tpu.dot_dimension_numbers<[1], [0], [0], [1], [0, 0, 1, 1], [], []>} : vector<8x4xbf16>, vector<4x9xbf16>, vector<8x9xf32> -> vector<8x9xf32>
    %55 = arith.addf %53, %54 : vector<8x9xf32>
    %56 = vector.broadcast %4 : vector<8x1xf32> to vector<8x9xf32>
    %57 = arith.addf %55, %56 : vector<8x9xf32>
    %cst_41 = arith.constant dense<0.000000e+00> : vector<8xf32>
    %58 = vector.multi_reduction <add>, %57, %cst_41 [1] : vector<8x9xf32> to vector<8xf32>
    %59 = vector.shape_cast %58 : vector<8xf32> to vector<8x1xf32>
    %cst_42 = arith.constant 0.111111112 : f32
    %60 = vector.broadcast %cst_42 : f32 to vector<8x1xf32>
    %61 = arith.mulf %59, %60 : vector<8x1xf32>
    %62 = arith.mulf %57, %57 : vector<8x9xf32>
    %cst_43 = arith.constant dense<0.000000e+00> : vector<8xf32>
    %63 = vector.multi_reduction <add>, %62, %cst_43 [1] : vector<8x9xf32> to vector<8xf32>
    %64 = vector.shape_cast %63 : vector<8xf32> to vector<8x1xf32>
    %cst_44 = arith.constant 0.111111112 : f32
    %65 = vector.broadcast %cst_44 : f32 to vector<8x1xf32>
    %66 = arith.mulf %64, %65 : vector<8x1xf32>
    %67 = arith.mulf %61, %61 : vector<8x1xf32>
    %68 = arith.subf %66, %67 : vector<8x1xf32>
    %cst_45 = arith.constant 0.000000e+00 : f32
    %69 = vector.broadcast %cst_45 : f32 to vector<8x1xf32>
    %70 = arith.maximumf %68, %69 : vector<8x1xf32>
    %71 = vector.broadcast %61 : vector<8x1xf32> to vector<8x9xf32>
    %72 = arith.subf %57, %71 : vector<8x9xf32>
    %cst_46 = arith.constant 9.99999974E-6 : f32
    %73 = vector.broadcast %cst_46 : f32 to vector<8x1xf32>
    %74 = arith.addf %70, %73 : vector<8x1xf32>
    %75 = math.rsqrt %74 : vector<8x1xf32>
    %76 = vector.broadcast %75 : vector<8x1xf32> to vector<8x9xf32>
    %77 = arith.mulf %72, %76 : vector<8x9xf32>
    %cst_47 = arith.constant 5.000000e-01 : f32
    %78 = vector.broadcast %cst_47 : f32 to vector<8x9xf32>
    %79 = arith.mulf %78, %77 : vector<8x9xf32>
    %cst_48 = arith.constant 0.707106769 : f32
    %80 = vector.broadcast %cst_48 : f32 to vector<8x9xf32>
    %81 = arith.mulf %77, %80 : vector<8x9xf32>
    %82 = math.erf %81 : vector<8x9xf32>
    %cst_49 = arith.constant 1.000000e+00 : f32
    %83 = vector.broadcast %cst_49 : f32 to vector<8x9xf32>
    %84 = arith.addf %83, %82 : vector<8x9xf32>
    %85 = arith.mulf %79, %84 : vector<8x9xf32>
    %86 = vector.extract_strided_slice %85 {offsets = [0, 0], sizes = [4, 9], strides = [1, 1]} : vector<8x9xf32> to vector<4x9xf32>
    %87 = arith.truncf %86 : vector<4x9xf32> to vector<4x9xbf16>
    %88 = vector.extract_strided_slice %85 {offsets = [4, 0], sizes = [4, 9], strides = [1, 1]} : vector<8x9xf32> to vector<4x9xf32>
    %89 = arith.truncf %88 : vector<4x9xf32> to vector<4x9xbf16>
    %cst_50 = arith.constant dense<0.000000e+00> : vector<4x16xf32>
    %90 = tpu.matmul %87, %9, %cst_50 {dimension_numbers = #tpu.dot_dimension_numbers<[1], [0], [0], [1], [0, 0, 1, 1], [], []>} : vector<4x9xbf16>, vector<9x16xbf16>, vector<4x16xf32> -> vector<4x16xf32>
    %cst_51 = arith.constant dense<0.000000e+00> : vector<4x16xf32>
    %91 = tpu.matmul %89, %10, %cst_51 {dimension_numbers = #tpu.dot_dimension_numbers<[1], [0], [0], [1], [0, 0, 1, 1], [], []>} : vector<4x9xbf16>, vector<9x16xbf16>, vector<4x16xf32> -> vector<4x16xf32>
    %92 = arith.addf %90, %91 : vector<4x16xf32>
    %93 = vector.extract_strided_slice %46 {offsets = [0, 0], sizes = [2, 8], strides = [1, 1]} : vector<4x16xf32> to vector<2x8xf32>
    %94 = vector.extract_strided_slice %46 {offsets = [0, 8], sizes = [2, 8], strides = [1, 1]} : vector<4x16xf32> to vector<2x8xf32>
    %95 = tpu.concatenate %93, %94 in 0 : vector<2x8xf32>, vector<2x8xf32> -> vector<4x8xf32>
    %96 = arith.truncf %95 : vector<4x8xf32> to vector<4x8xbf16>
    %cst_52 = arith.constant dense<0.000000e+00> : vector<4x10xf32>
    %97 = tpu.matmul %96, %11, %cst_52 {dimension_numbers = #tpu.dot_dimension_numbers<[1], [0], [0], [1], [0, 0, 1, 1], [], []>} : vector<4x8xbf16>, vector<8x10xbf16>, vector<4x10xf32> -> vector<4x10xf32>
    %98 = vector.extract_strided_slice %97 {offsets = [0, 0], sizes = [4, 5], strides = [1, 1]} : vector<4x10xf32> to vector<4x5xf32>
    %99 = arith.truncf %98 : vector<4x5xf32> to vector<4x5xbf16>
    %100 = vector.extract_strided_slice %97 {offsets = [0, 5], sizes = [4, 5], strides = [1, 1]} : vector<4x10xf32> to vector<4x5xf32>
    %101 = arith.truncf %100 : vector<4x5xf32> to vector<4x5xbf16>
    %cst_53 = arith.constant dense<0.000000e+00> : vector<8x5xf32>
    %102 = tpu.matmul %5, %99, %cst_53 {dimension_numbers = #tpu.dot_dimension_numbers<[1], [0], [0], [1], [0, 0, 1, 1], [], []>} : vector<8x4xbf16>, vector<4x5xbf16>, vector<8x5xf32> -> vector<8x5xf32>
    %cst_54 = arith.constant dense<0.000000e+00> : vector<8x5xf32>
    %103 = tpu.matmul %6, %101, %cst_54 {dimension_numbers = #tpu.dot_dimension_numbers<[1], [0], [0], [1], [0, 0, 1, 1], [], []>} : vector<8x4xbf16>, vector<4x5xbf16>, vector<8x5xf32> -> vector<8x5xf32>
    %104 = arith.addf %102, %103 : vector<8x5xf32>
    %105 = vector.broadcast %7 : vector<8x1xf32> to vector<8x5xf32>
    %106 = arith.addf %104, %105 : vector<8x5xf32>
    %cst_55 = arith.constant dense<0.000000e+00> : vector<8xf32>
    %107 = vector.multi_reduction <add>, %106, %cst_55 [1] : vector<8x5xf32> to vector<8xf32>
    %108 = vector.shape_cast %107 : vector<8xf32> to vector<8x1xf32>
    %cst_56 = arith.constant 2.000000e-01 : f32
    %109 = vector.broadcast %cst_56 : f32 to vector<8x1xf32>
    %110 = arith.mulf %108, %109 : vector<8x1xf32>
    %111 = arith.mulf %106, %106 : vector<8x5xf32>
    %cst_57 = arith.constant dense<0.000000e+00> : vector<8xf32>
    %112 = vector.multi_reduction <add>, %111, %cst_57 [1] : vector<8x5xf32> to vector<8xf32>
    %113 = vector.shape_cast %112 : vector<8xf32> to vector<8x1xf32>
    %cst_58 = arith.constant 2.000000e-01 : f32
    %114 = vector.broadcast %cst_58 : f32 to vector<8x1xf32>
    %115 = arith.mulf %113, %114 : vector<8x1xf32>
    %116 = arith.mulf %110, %110 : vector<8x1xf32>
    %117 = arith.subf %115, %116 : vector<8x1xf32>
    %cst_59 = arith.constant 0.000000e+00 : f32
    %118 = vector.broadcast %cst_59 : f32 to vector<8x1xf32>
    %119 = arith.maximumf %117, %118 : vector<8x1xf32>
    %120 = vector.broadcast %110 : vector<8x1xf32> to vector<8x5xf32>
    %121 = arith.subf %106, %120 : vector<8x5xf32>
    %cst_60 = arith.constant 9.99999974E-6 : f32
    %122 = vector.broadcast %cst_60 : f32 to vector<8x1xf32>
    %123 = arith.addf %119, %122 : vector<8x1xf32>
    %124 = math.rsqrt %123 : vector<8x1xf32>
    %125 = vector.broadcast %124 : vector<8x1xf32> to vector<8x5xf32>
    %126 = arith.mulf %121, %125 : vector<8x5xf32>
    %cst_61 = arith.constant 5.000000e-01 : f32
    %127 = vector.broadcast %cst_61 : f32 to vector<8x5xf32>
    %128 = arith.mulf %127, %126 : vector<8x5xf32>
    %cst_62 = arith.constant 0.707106769 : f32
    %129 = vector.broadcast %cst_62 : f32 to vector<8x5xf32>
    %130 = arith.mulf %126, %129 : vector<8x5xf32>
    %131 = math.erf %130 : vector<8x5xf32>
    %cst_63 = arith.constant 1.000000e+00 : f32
    %132 = vector.broadcast %cst_63 : f32 to vector<8x5xf32>
    %133 = arith.addf %132, %131 : vector<8x5xf32>
    %134 = arith.mulf %128, %133 : vector<8x5xf32>
    %135 = vector.extract_strided_slice %134 {offsets = [0, 0], sizes = [4, 5], strides = [1, 1]} : vector<8x5xf32> to vector<4x5xf32>
    %136 = arith.truncf %135 : vector<4x5xf32> to vector<4x5xbf16>
    %137 = vector.extract_strided_slice %134 {offsets = [4, 0], sizes = [4, 5], strides = [1, 1]} : vector<8x5xf32> to vector<4x5xf32>
    %138 = arith.truncf %137 : vector<4x5xf32> to vector<4x5xbf16>
    %cst_64 = arith.constant dense<0.000000e+00> : vector<4x8xf32>
    %139 = tpu.matmul %136, %12, %cst_64 {dimension_numbers = #tpu.dot_dimension_numbers<[1], [0], [0], [1], [0, 0, 1, 1], [], []>} : vector<4x5xbf16>, vector<5x8xbf16>, vector<4x8xf32> -> vector<4x8xf32>
    %cst_65 = arith.constant dense<0.000000e+00> : vector<4x8xf32>
    %140 = tpu.matmul %138, %13, %cst_65 {dimension_numbers = #tpu.dot_dimension_numbers<[1], [0], [0], [1], [0, 0, 1, 1], [], []>} : vector<4x5xbf16>, vector<5x8xbf16>, vector<4x8xf32> -> vector<4x8xf32>
    %141 = arith.addf %139, %140 : vector<4x8xf32>
    %142 = arith.addf %46, %92 : vector<4x16xf32>
    %143 = arith.truncf %142 : vector<4x16xf32> to vector<4x16xbf16>
    %cst_66 = arith.constant dense<0.000000e+00> : vector<8x16xf32>
    %144 = tpu.matmul %1, %143, %cst_66 {dimension_numbers = #tpu.dot_dimension_numbers<[1], [0], [0], [1], [0, 0, 1, 1], [], []>} : vector<8x4xbf16>, vector<4x16xbf16>, vector<8x16xf32> -> vector<8x16xf32>
    %145 = arith.truncf %141 : vector<4x8xf32> to vector<4x8xbf16>
    %cst_67 = arith.constant dense<0.000000e+00> : vector<8x8xf32>
    %146 = tpu.matmul %1, %145, %cst_67 {dimension_numbers = #tpu.dot_dimension_numbers<[1], [0], [0], [1], [0, 0, 1, 1], [], []>} : vector<8x4xbf16>, vector<4x8xbf16>, vector<8x8xf32> -> vector<8x8xf32>
    %147 = vector.extract_strided_slice %144 {offsets = [0, 0], sizes = [8, 8], strides = [1, 1]} : vector<8x16xf32> to vector<8x8xf32>
    %148 = arith.addf %147, %146 : vector<8x8xf32>
    %149 = arith.index_cast %c0_i32 : i32 to index
    %c0_68 = arith.constant 0 : index
    %c0_69 = arith.constant 0 : index
    %150 = vector.load %arg16[%149, %c0_68, %c0_69] : memref<2x8x16xf32, #tpu.memory_space<vmem>>, vector<1x8x8xf32>
    %151 = vector.shape_cast %150 : vector<1x8x8xf32> to vector<8x8xf32>
    %152 = vector.shape_cast %148 : vector<8x8xf32> to vector<1x8x8xf32>
    tpu.vector_store %arg16[%149, %c0_68, %c0_69], %152 {strides = array<i32>} : memref<2x8x16xf32, #tpu.memory_space<vmem>>, vector<1x8x8xf32>,
    %153 = vector.extract_strided_slice %144 {offsets = [0, 8], sizes = [8, 8], strides = [1, 1]} : vector<8x16xf32> to vector<8x8xf32>
    %154 = arith.addf %153, %146 : vector<8x8xf32>
    %155 = arith.index_cast %c0_i32 : i32 to index
    %c0_70 = arith.constant 0 : index
    %c8 = arith.constant 8 : index
    %156 = vector.load %arg16[%155, %c0_70, %c8] : memref<2x8x16xf32, #tpu.memory_space<vmem>>, vector<1x8x8xf32>
    %157 = vector.shape_cast %156 : vector<1x8x8xf32> to vector<8x8xf32>
    %158 = vector.shape_cast %154 : vector<8x8xf32> to vector<1x8x8xf32>
    tpu.vector_store %arg16[%155, %c0_70, %c8], %158 {strides = array<i32>} : memref<2x8x16xf32, #tpu.memory_space<vmem>>, vector<1x8x8xf32>,
    %c1_i32 = arith.constant 1 : i32
    %159 = arith.index_cast %c1_i32 : i32 to index
    %c0_71 = arith.constant 0 : index
    %c0_72 = arith.constant 0 : index
    %160 = vector.load %arg1[%159, %c0_71, %c0_72] : memref<2x4x16xf32, #tpu.memory_space<vmem>>, vector<1x4x16xf32>
    %161 = vector.shape_cast %160 : vector<1x4x16xf32> to vector<4x16xf32>
    %162 = arith.truncf %161 : vector<4x16xf32> to vector<4x16xbf16>
    %cst_73 = arith.constant dense<0.000000e+00> : vector<4x16xf32>
    %163 = tpu.matmul %0, %162, %cst_73 {dimension_numbers = #tpu.dot_dimension_numbers<[1], [0], [0], [1], [0, 0, 1, 1], [], []>} : vector<4x4xbf16>, vector<4x16xbf16>, vector<4x16xf32> -> vector<4x16xf32>
    %cst_74 = arith.constant dense<0.000000e+00> : vector<4xf32>
    %164 = vector.multi_reduction <add>, %163, %cst_74 [1] : vector<4x16xf32> to vector<4xf32>
    %165 = vector.shape_cast %164 : vector<4xf32> to vector<4x1xf32>
    %cst_75 = arith.constant 6.250000e-02 : f32
    %166 = vector.broadcast %cst_75 : f32 to vector<4x1xf32>
    %167 = arith.mulf %165, %166 : vector<4x1xf32>
    %168 = arith.mulf %163, %163 : vector<4x16xf32>
    %cst_76 = arith.constant dense<0.000000e+00> : vector<4xf32>
    %169 = vector.multi_reduction <add>, %168, %cst_76 [1] : vector<4x16xf32> to vector<4xf32>
    %170 = vector.shape_cast %169 : vector<4xf32> to vector<4x1xf32>
    %cst_77 = arith.constant 6.250000e-02 : f32
    %171 = vector.broadcast %cst_77 : f32 to vector<4x1xf32>
    %172 = arith.mulf %170, %171 : vector<4x1xf32>
    %173 = arith.mulf %167, %167 : vector<4x1xf32>
    %174 = arith.subf %172, %173 : vector<4x1xf32>
    %cst_78 = arith.constant 0.000000e+00 : f32
    %175 = vector.broadcast %cst_78 : f32 to vector<4x1xf32>
    %176 = arith.maximumf %174, %175 : vector<4x1xf32>
    %177 = vector.broadcast %167 : vector<4x1xf32> to vector<4x16xf32>
    %178 = arith.subf %163, %177 : vector<4x16xf32>
    %cst_79 = arith.constant 9.99999974E-6 : f32
    %179 = vector.broadcast %cst_79 : f32 to vector<4x1xf32>
    %180 = arith.addf %176, %179 : vector<4x1xf32>
    %181 = math.rsqrt %180 : vector<4x1xf32>
    %182 = vector.broadcast %181 : vector<4x1xf32> to vector<4x16xf32>
    %183 = arith.mulf %178, %182 : vector<4x16xf32>
    %cst_80 = arith.constant 5.000000e-01 : f32
    %184 = vector.broadcast %cst_80 : f32 to vector<4x16xf32>
    %185 = arith.mulf %184, %183 : vector<4x16xf32>
    %cst_81 = arith.constant 0.707106769 : f32
    %186 = vector.broadcast %cst_81 : f32 to vector<4x16xf32>
    %187 = arith.mulf %183, %186 : vector<4x16xf32>
    %188 = math.erf %187 : vector<4x16xf32>
    %cst_82 = arith.constant 1.000000e+00 : f32
    %189 = vector.broadcast %cst_82 : f32 to vector<4x16xf32>
    %190 = arith.addf %189, %188 : vector<4x16xf32>
    %191 = arith.mulf %185, %190 : vector<4x16xf32>
    %192 = arith.truncf %191 : vector<4x16xf32> to vector<4x16xbf16>
    %cst_83 = arith.constant dense<0.000000e+00> : vector<4x18xf32>
    %193 = tpu.matmul %192, %8, %cst_83 {dimension_numbers = #tpu.dot_dimension_numbers<[1], [0], [0], [1], [0, 0, 1, 1], [], []>} : vector<4x16xbf16>, vector<16x18xbf16>, vector<4x18xf32> -> vector<4x18xf32>
    %194 = vector.extract_strided_slice %193 {offsets = [0, 0], sizes = [4, 9], strides = [1, 1]} : vector<4x18xf32> to vector<4x9xf32>
    %195 = arith.truncf %194 : vector<4x9xf32> to vector<4x9xbf16>
    %196 = vector.extract_strided_slice %193 {offsets = [0, 9], sizes = [4, 9], strides = [1, 1]} : vector<4x18xf32> to vector<4x9xf32>
    %197 = arith.truncf %196 : vector<4x9xf32> to vector<4x9xbf16>
    %cst_84 = arith.constant dense<0.000000e+00> : vector<8x9xf32>
    %198 = tpu.matmul %2, %195, %cst_84 {dimension_numbers = #tpu.dot_dimension_numbers<[1], [0], [0], [1], [0, 0, 1, 1], [], []>} : vector<8x4xbf16>, vector<4x9xbf16>, vector<8x9xf32> -> vector<8x9xf32>
    %cst_85 = arith.constant dense<0.000000e+00> : vector<8x9xf32>
    %199 = tpu.matmul %3, %197, %cst_85 {dimension_numbers = #tpu.dot_dimension_numbers<[1], [0], [0], [1], [0, 0, 1, 1], [], []>} : vector<8x4xbf16>, vector<4x9xbf16>, vector<8x9xf32> -> vector<8x9xf32>
    %200 = arith.addf %198, %199 : vector<8x9xf32>
    %201 = vector.broadcast %4 : vector<8x1xf32> to vector<8x9xf32>
    %202 = arith.addf %200, %201 : vector<8x9xf32>
    %cst_86 = arith.constant dense<0.000000e+00> : vector<8xf32>
    %203 = vector.multi_reduction <add>, %202, %cst_86 [1] : vector<8x9xf32> to vector<8xf32>
    %204 = vector.shape_cast %203 : vector<8xf32> to vector<8x1xf32>
    %cst_87 = arith.constant 0.111111112 : f32
    %205 = vector.broadcast %cst_87 : f32 to vector<8x1xf32>
    %206 = arith.mulf %204, %205 : vector<8x1xf32>
    %207 = arith.mulf %202, %202 : vector<8x9xf32>
    %cst_88 = arith.constant dense<0.000000e+00> : vector<8xf32>
    %208 = vector.multi_reduction <add>, %207, %cst_88 [1] : vector<8x9xf32> to vector<8xf32>
    %209 = vector.shape_cast %208 : vector<8xf32> to vector<8x1xf32>
    %cst_89 = arith.constant 0.111111112 : f32
    %210 = vector.broadcast %cst_89 : f32 to vector<8x1xf32>
    %211 = arith.mulf %209, %210 : vector<8x1xf32>
    %212 = arith.mulf %206, %206 : vector<8x1xf32>
    %213 = arith.subf %211, %212 : vector<8x1xf32>
    %cst_90 = arith.constant 0.000000e+00 : f32
    %214 = vector.broadcast %cst_90 : f32 to vector<8x1xf32>
    %215 = arith.maximumf %213, %214 : vector<8x1xf32>
    %216 = vector.broadcast %206 : vector<8x1xf32> to vector<8x9xf32>
    %217 = arith.subf %202, %216 : vector<8x9xf32>
    %cst_91 = arith.constant 9.99999974E-6 : f32
    %218 = vector.broadcast %cst_91 : f32 to vector<8x1xf32>
    %219 = arith.addf %215, %218 : vector<8x1xf32>
    %220 = math.rsqrt %219 : vector<8x1xf32>
    %221 = vector.broadcast %220 : vector<8x1xf32> to vector<8x9xf32>
    %222 = arith.mulf %217, %221 : vector<8x9xf32>
    %cst_92 = arith.constant 5.000000e-01 : f32
    %223 = vector.broadcast %cst_92 : f32 to vector<8x9xf32>
    %224 = arith.mulf %223, %222 : vector<8x9xf32>
    %cst_93 = arith.constant 0.707106769 : f32
    %225 = vector.broadcast %cst_93 : f32 to vector<8x9xf32>
    %226 = arith.mulf %222, %225 : vector<8x9xf32>
    %227 = math.erf %226 : vector<8x9xf32>
    %cst_94 = arith.constant 1.000000e+00 : f32
    %228 = vector.broadcast %cst_94 : f32 to vector<8x9xf32>
    %229 = arith.addf %228, %227 : vector<8x9xf32>
    %230 = arith.mulf %224, %229 : vector<8x9xf32>
    %231 = vector.extract_strided_slice %230 {offsets = [0, 0], sizes = [4, 9], strides = [1, 1]} : vector<8x9xf32> to vector<4x9xf32>
    %232 = arith.truncf %231 : vector<4x9xf32> to vector<4x9xbf16>
    %233 = vector.extract_strided_slice %230 {offsets = [4, 0], sizes = [4, 9], strides = [1, 1]} : vector<8x9xf32> to vector<4x9xf32>
    %234 = arith.truncf %233 : vector<4x9xf32> to vector<4x9xbf16>
    %cst_95 = arith.constant dense<0.000000e+00> : vector<4x16xf32>
    %235 = tpu.matmul %232, %9, %cst_95 {dimension_numbers = #tpu.dot_dimension_numbers<[1], [0], [0], [1], [0, 0, 1, 1], [], []>} : vector<4x9xbf16>, vector<9x16xbf16>, vector<4x16xf32> -> vector<4x16xf32>
    %cst_96 = arith.constant dense<0.000000e+00> : vector<4x16xf32>
    %236 = tpu.matmul %234, %10, %cst_96 {dimension_numbers = #tpu.dot_dimension_numbers<[1], [0], [0], [1], [0, 0, 1, 1], [], []>} : vector<4x9xbf16>, vector<9x16xbf16>, vector<4x16xf32> -> vector<4x16xf32>
    %237 = arith.addf %235, %236 : vector<4x16xf32>
    %238 = vector.extract_strided_slice %191 {offsets = [0, 0], sizes = [2, 8], strides = [1, 1]} : vector<4x16xf32> to vector<2x8xf32>
    %239 = vector.extract_strided_slice %191 {offsets = [0, 8], sizes = [2, 8], strides = [1, 1]} : vector<4x16xf32> to vector<2x8xf32>
    %240 = tpu.concatenate %238, %239 in 0 : vector<2x8xf32>, vector<2x8xf32> -> vector<4x8xf32>
    %241 = arith.truncf %240 : vector<4x8xf32> to vector<4x8xbf16>
    %cst_97 = arith.constant dense<0.000000e+00> : vector<4x10xf32>
    %242 = tpu.matmul %241, %11, %cst_97 {dimension_numbers = #tpu.dot_dimension_numbers<[1], [0], [0], [1], [0, 0, 1, 1], [], []>} : vector<4x8xbf16>, vector<8x10xbf16>, vector<4x10xf32> -> vector<4x10xf32>
    %243 = vector.extract_strided_slice %242 {offsets = [0, 0], sizes = [4, 5], strides = [1, 1]} : vector<4x10xf32> to vector<4x5xf32>
    %244 = arith.truncf %243 : vector<4x5xf32> to vector<4x5xbf16>
    %245 = vector.extract_strided_slice %242 {offsets = [0, 5], sizes = [4, 5], strides = [1, 1]} : vector<4x10xf32> to vector<4x5xf32>
    %246 = arith.truncf %245 : vector<4x5xf32> to vector<4x5xbf16>
    %cst_98 = arith.constant dense<0.000000e+00> : vector<8x5xf32>
    %247 = tpu.matmul %5, %244, %cst_98 {dimension_numbers = #tpu.dot_dimension_numbers<[1], [0], [0], [1], [0, 0, 1, 1], [], []>} : vector<8x4xbf16>, vector<4x5xbf16>, vector<8x5xf32> -> vector<8x5xf32>
    %cst_99 = arith.constant dense<0.000000e+00> : vector<8x5xf32>
    %248 = tpu.matmul %6, %246, %cst_99 {dimension_numbers = #tpu.dot_dimension_numbers<[1], [0], [0], [1], [0, 0, 1, 1], [], []>} : vector<8x4xbf16>, vector<4x5xbf16>, vector<8x5xf32> -> vector<8x5xf32>
    %249 = arith.addf %247, %248 : vector<8x5xf32>
    %250 = vector.broadcast %7 : vector<8x1xf32> to vector<8x5xf32>
    %251 = arith.addf %249, %250 : vector<8x5xf32>
    %cst_100 = arith.constant dense<0.000000e+00> : vector<8xf32>
    %252 = vector.multi_reduction <add>, %251, %cst_100 [1] : vector<8x5xf32> to vector<8xf32>
    %253 = vector.shape_cast %252 : vector<8xf32> to vector<8x1xf32>
    %cst_101 = arith.constant 2.000000e-01 : f32
    %254 = vector.broadcast %cst_101 : f32 to vector<8x1xf32>
    %255 = arith.mulf %253, %254 : vector<8x1xf32>
    %256 = arith.mulf %251, %251 : vector<8x5xf32>
    %cst_102 = arith.constant dense<0.000000e+00> : vector<8xf32>
    %257 = vector.multi_reduction <add>, %256, %cst_102 [1] : vector<8x5xf32> to vector<8xf32>
    %258 = vector.shape_cast %257 : vector<8xf32> to vector<8x1xf32>
    %cst_103 = arith.constant 2.000000e-01 : f32
    %259 = vector.broadcast %cst_103 : f32 to vector<8x1xf32>
    %260 = arith.mulf %258, %259 : vector<8x1xf32>
    %261 = arith.mulf %255, %255 : vector<8x1xf32>
    %262 = arith.subf %260, %261 : vector<8x1xf32>
    %cst_104 = arith.constant 0.000000e+00 : f32
    %263 = vector.broadcast %cst_104 : f32 to vector<8x1xf32>
    %264 = arith.maximumf %262, %263 : vector<8x1xf32>
    %265 = vector.broadcast %255 : vector<8x1xf32> to vector<8x5xf32>
    %266 = arith.subf %251, %265 : vector<8x5xf32>
    %cst_105 = arith.constant 9.99999974E-6 : f32
    %267 = vector.broadcast %cst_105 : f32 to vector<8x1xf32>
    %268 = arith.addf %264, %267 : vector<8x1xf32>
    %269 = math.rsqrt %268 : vector<8x1xf32>
    %270 = vector.broadcast %269 : vector<8x1xf32> to vector<8x5xf32>
    %271 = arith.mulf %266, %270 : vector<8x5xf32>
    %cst_106 = arith.constant 5.000000e-01 : f32
    %272 = vector.broadcast %cst_106 : f32 to vector<8x5xf32>
    %273 = arith.mulf %272, %271 : vector<8x5xf32>
    %cst_107 = arith.constant 0.707106769 : f32
    %274 = vector.broadcast %cst_107 : f32 to vector<8x5xf32>
    %275 = arith.mulf %271, %274 : vector<8x5xf32>
    %276 = math.erf %275 : vector<8x5xf32>
    %cst_108 = arith.constant 1.000000e+00 : f32
    %277 = vector.broadcast %cst_108 : f32 to vector<8x5xf32>
    %278 = arith.addf %277, %276 : vector<8x5xf32>
    %279 = arith.mulf %273, %278 : vector<8x5xf32>
    %280 = vector.extract_strided_slice %279 {offsets = [0, 0], sizes = [4, 5], strides = [1, 1]} : vector<8x5xf32> to vector<4x5xf32>
    %281 = arith.truncf %280 : vector<4x5xf32> to vector<4x5xbf16>
    %282 = vector.extract_strided_slice %279 {offsets = [4, 0], sizes = [4, 5], strides = [1, 1]} : vector<8x5xf32> to vector<4x5xf32>
    %283 = arith.truncf %282 : vector<4x5xf32> to vector<4x5xbf16>
    %cst_109 = arith.constant dense<0.000000e+00> : vector<4x8xf32>
    %284 = tpu.matmul %281, %12, %cst_109 {dimension_numbers = #tpu.dot_dimension_numbers<[1], [0], [0], [1], [0, 0, 1, 1], [], []>} : vector<4x5xbf16>, vector<5x8xbf16>, vector<4x8xf32> -> vector<4x8xf32>
    %cst_110 = arith.constant dense<0.000000e+00> : vector<4x8xf32>
    %285 = tpu.matmul %283, %13, %cst_110 {dimension_numbers = #tpu.dot_dimension_numbers<[1], [0], [0], [1], [0, 0, 1, 1], [], []>} : vector<4x5xbf16>, vector<5x8xbf16>, vector<4x8xf32> -> vector<4x8xf32>
    %286 = arith.addf %284, %285 : vector<4x8xf32>
    %287 = arith.addf %191, %237 : vector<4x16xf32>
    %288 = arith.truncf %287 : vector<4x16xf32> to vector<4x16xbf16>
    %cst_111 = arith.constant dense<0.000000e+00> : vector<8x16xf32>
    %289 = tpu.matmul %1, %288, %cst_111 {dimension_numbers = #tpu.dot_dimension_numbers<[1], [0], [0], [1], [0, 0, 1, 1], [], []>} : vector<8x4xbf16>, vector<4x16xbf16>, vector<8x16xf32> -> vector<8x16xf32>
    %290 = arith.truncf %286 : vector<4x8xf32> to vector<4x8xbf16>
    %cst_112 = arith.constant dense<0.000000e+00> : vector<8x8xf32>
    %291 = tpu.matmul %1, %290, %cst_112 {dimension_numbers = #tpu.dot_dimension_numbers<[1], [0], [0], [1], [0, 0, 1, 1], [], []>} : vector<8x4xbf16>, vector<4x8xbf16>, vector<8x8xf32> -> vector<8x8xf32>
    %292 = vector.extract_strided_slice %289 {offsets = [0, 0], sizes = [8, 8], strides = [1, 1]} : vector<8x16xf32> to vector<8x8xf32>
    %293 = arith.addf %292, %291 : vector<8x8xf32>
    %294 = arith.index_cast %c1_i32 : i32 to index
    %c0_113 = arith.constant 0 : index
    %c0_114 = arith.constant 0 : index
    %295 = vector.load %arg16[%294, %c0_113, %c0_114] : memref<2x8x16xf32, #tpu.memory_space<vmem>>, vector<1x8x8xf32>
    %296 = vector.shape_cast %295 : vector<1x8x8xf32> to vector<8x8xf32>
    %297 = vector.shape_cast %293 : vector<8x8xf32> to vector<1x8x8xf32>
    tpu.vector_store %arg16[%294, %c0_113, %c0_114], %297 {strides = array<i32>} : memref<2x8x16xf32, #tpu.memory_space<vmem>>, vector<1x8x8xf32>,
    %298 = vector.extract_strided_slice %289 {offsets = [0, 8], sizes = [8, 8], strides = [1, 1]} : vector<8x16xf32> to vector<8x8xf32>
    %299 = arith.addf %298, %291 : vector<8x8xf32>
    %300 = arith.index_cast %c1_i32 : i32 to index
    %c0_115 = arith.constant 0 : index
    %c8_116 = arith.constant 8 : index
    %301 = vector.load %arg16[%300, %c0_115, %c8_116] : memref<2x8x16xf32, #tpu.memory_space<vmem>>, vector<1x8x8xf32>
    %302 = vector.shape_cast %301 : vector<1x8x8xf32> to vector<8x8xf32>
    %303 = vector.shape_cast %299 : vector<8x8xf32> to vector<1x8x8xf32>
    tpu.vector_store %arg16[%300, %c0_115, %c8_116], %303 {strides = array<i32>} : memref<2x8x16xf32, #tpu.memory_space<vmem>>, vector<1x8x8xf32>,
    %c2_i32 = arith.constant 2 : i32
    return
  }
  func.func @transform_0(%arg0: i32) -> (i32, i32, i32) {
    %c0_i32 = arith.constant 0 : i32
    %c0_i32_0 = arith.constant 0 : i32
    %c0_i32_1 = arith.constant 0 : i32
    return %arg0, %c0_i32, %c0_i32_0 : i32, i32, i32
  }
  func.func @transform_1(%arg0: i32) -> (i32, i32) {
    %c0_i32 = arith.constant 0 : i32
    %c0_i32_0 = arith.constant 0 : i32
    %c0_i32_1 = arith.constant 0 : i32
    return %c0_i32, %c0_i32_0 : i32, i32
  }
  func.func @transform_2(%arg0: i32) -> (i32, i32) {
    %c0_i32 = arith.constant 0 : i32
    %c0_i32_0 = arith.constant 0 : i32
    %c0_i32_1 = arith.constant 0 : i32
    return %c0_i32, %c0_i32_0 : i32, i32
  }
  func.func @transform_3(%arg0: i32) -> (i32, i32) {
    %c0_i32 = arith.constant 0 : i32
    %c0_i32_0 = arith.constant 0 : i32
    %c0_i32_1 = arith.constant 0 : i32
    return %c0_i32, %c0_i32_0 : i32, i32
  }
  func.func @transform_4(%arg0: i32) -> (i32, i32) {
    %c0_i32 = arith.constant 0 : i32
    %c0_i32_0 = arith.constant 0 : i32
    %c0_i32_1 = arith.constant 0 : i32
    return %c0_i32, %c0_i32_0 : i32, i32
  }
  func.func @transform_5(%arg0: i32) -> (i32, i32) {
    %c0_i32 = arith.constant 0 : i32
    %c0_i32_0 = arith.constant 0 : i32
    %c0_i32_1 = arith.constant 0 : i32
    return %c0_i32, %c0_i32_0 : i32, i32
  }
  func.func @transform_6(%arg0: i32) -> (i32, i32) {
    %c0_i32 = arith.constant 0 : i32
    %c0_i32_0 = arith.constant 0 : i32
    %c0_i32_1 = arith.constant 0 : i32
    return %c0_i32, %c0_i32_0 : i32, i32
  }
  func.func @transform_7(%arg0: i32) -> (i32, i32) {
    %c0_i32 = arith.constant 0 : i32
    %c0_i32_0 = arith.constant 0 : i32
    %c0_i32_1 = arith.constant 0 : i32
    return %c0_i32, %c0_i32_0 : i32, i32
  }
  func.func @transform_8(%arg0: i32) -> (i32, i32) {
    %c0_i32 = arith.constant 0 : i32
    %c0_i32_0 = arith.constant 0 : i32
    %c0_i32_1 = arith.constant 0 : i32
    return %c0_i32, %c0_i32_0 : i32, i32
  }
  func.func @transform_9(%arg0: i32) -> (i32, i32) {
    %c0_i32 = arith.constant 0 : i32
    %c0_i32_0 = arith.constant 0 : i32
    %c0_i32_1 = arith.constant 0 : i32
    return %c0_i32, %c0_i32_0 : i32, i32
  }
  func.func @transform_10(%arg0: i32) -> (i32, i32) {
    %c0_i32 = arith.constant 0 : i32
    %c0_i32_0 = arith.constant 0 : i32
    %c0_i32_1 = arith.constant 0 : i32
    return %c0_i32, %c0_i32_0 : i32, i32
  }
  func.func @transform_11(%arg0: i32) -> (i32, i32) {
    %c0_i32 = arith.constant 0 : i32
    %c0_i32_0 = arith.constant 0 : i32
    %c0_i32_1 = arith.constant 0 : i32
    return %c0_i32, %c0_i32_0 : i32, i32
  }
  func.func @transform_12(%arg0: i32) -> (i32, i32) {
    %c0_i32 = arith.constant 0 : i32
    %c0_i32_0 = arith.constant 0 : i32
    %c0_i32_1 = arith.constant 0 : i32
    return %c0_i32, %c0_i32_0 : i32, i32
  }
  func.func @transform_13(%arg0: i32) -> (i32, i32) {
    %c0_i32 = arith.constant 0 : i32
    %c0_i32_0 = arith.constant 0 : i32
    %c0_i32_1 = arith.constant 0 : i32
    return %c0_i32, %c0_i32_0 : i32, i32
  }
  func.func @transform_14(%arg0: i32) -> (i32, i32) {
    %c0_i32 = arith.constant 0 : i32
    %c0_i32_0 = arith.constant 0 : i32
    %c0_i32_1 = arith.constant 0 : i32
    return %c0_i32, %c0_i32_0 : i32, i32
  }
  func.func @transform_15(%arg0: i32) -> (i32, i32, i32) {
    %c0_i32 = arith.constant 0 : i32
    %c0_i32_0 = arith.constant 0 : i32
    %c0_i32_1 = arith.constant 0 : i32
    return %arg0, %c0_i32, %c0_i32_0 : i32, i32, i32
  }
}

</mosaic_0001>

<bundles_post_ra>
// kernel: tpu_custom_call.1
= control target key start
LH: loop header
LB: loop body
LE: loop exit
PB: predicated region body
PF: predicated region fallthrough
CT: control target
= control target key end

     0   :  { %20 = vsyncpa [#allocation3], 0  ;;  %s2192_s0 = inlined_call_operand.vmem [shape: f32[2,4,16], index: 0, kind: input, shape index: {}]   ;;  %s2193_s1 = inlined_call_operand.hbm [shape: bf16[4,4], index: 1, kind: input, shape index: {}]   ;;  %s2194_s2 = inlined_call_operand.vmem [shape: bf16[8,4], index: 2, kind: input, shape index: {}]   ;;  %s2195_s3 = inlined_call_operand.vmem [shape: bf16[8,4], index: 3, kind: input, shape index: {}]   ;;  %s2196_s4 = inlined_call_operand.vmem [shape: f32[8,1], index: 4, kind: input, shape index: {}]   ;;  %s2197_s5 = inlined_call_operand.vmem [shape: bf16[8,4], index: 5, kind: input, shape index: {}]   ;;  %s2198_s6 = inlined_call_operand.vmem [shape: bf16[8,4], index: 6, kind: input, shape index: {}]   ;;  %s2199_s7 = inlined_call_operand.vmem [shape: f32[8,1], index: 7, kind: input, shape index: {}]   ;;  %s2200_s8 = inlined_call_operand.vmem [shape: bf16[8,4], index: 8, kind: input, shape index: {}]   ;;  %s2201_s9 = inlined_call_operand.vmem [shape: bf16[16,18], index: 9, kind: input, shape index: {}]   ;;  %s2202_s10 = inlined_call_operand.vmem [shape: bf16[9,16], index: 10, kind: input, shape index: {}]   ;;  %s2203_s11 = inlined_call_operand.vmem [shape: bf16[9,16], index: 11, kind: input, shape index: {}]   ;;  %s2204_s12 = inlined_call_operand.vmem [shape: bf16[8,10], index: 12, kind: input, shape index: {}]   ;;  %s2205_s13 = inlined_call_operand.vmem [shape: bf16[5,8], index: 13, kind: input, shape index: {}]   ;;  %s2206_s14 = inlined_call_operand.vmem [shape: bf16[5,8], index: 14, kind: input, shape index: {}]   ;;  %s2207_s15 = inlined_call_operand.hbm [shape: f32[2,8,16], index: 15, kind: output, shape index: {}]  }
   0x1   :  { %21 = vsyncpa [#allocation4], 0  ;;  %s1814_s18 = smov [#allocation2]  }
   0x2   :  { %s30_s19 = sshll.u32 %s1814_s18, 4  ;;  %s31_s19 = int_to_ptr.vmem [resolvable:$true] %s30_s19 }
   0x3   :  { %s1778_s20 = scalar_lea.vmem %s31_s19, 32  ;;  %p1783_p1 = scmp.lt.s32.totalorder %s31_s19, %s31_s19 }
   0x4   :  { %p1779_p0 = scmp.ne.s32.totalorder %s31_s19, %s1778_s20  ;;  %p1784_p2 = scmp.lt.s32.totalorder %s1778_s20, %s1778_s20 }
   0x6   :  { %p1785_p3 = por %p1784_p2, %p1783_p1 }
   0x8   :  { %p1786_p4 = pnand %p1785_p3, %p1779_p0 }
   0xa   :  { %1789 = shalt.err (!%p1786_p4)
}
   0xb   :  { %33 = dma.hbm_to_vmem [thread:$0]  %s2193_s1, 32, %s31_s19, [#allocation3]  }
   0xc   :  { %1810 = dma.done.wait [#allocation3], 32  }
   0xd   :  { %1811 = vsyncadd [#allocation3], 4294967264  ;;  %v1815_v0 = vmov 0.0   ;;  %vm1816_vm0 = vmmov 0   ;;  %v81_v1 = vld [vmem:[%s2192_s0] sm:$0xf] }
   0xe   :  { %1574 = vmatprep.subr.bf16.mxu0 %v1815_v0  ;;  %1576 = vmatprep.mubr.msk.bf16.mxu0 %vm1816_vm0, %v1815_v0  ;;  %vm87_vm1 = vcmask 1041408   ;;  %v82_v2 = vpack.c.bf16 %v81_v1, %v81_v1  ;;  %v1918_v4 = vld [vmem:[#allocation2] sm:$0x3]  ;;  %vm83_vm2 = vcmask 31744   ;;  %vm131_vm3 = vcmask 125952   ;;  %s1820_s18 = smov 120  }
   0xf   :  { %1580 = vmatprep.subr.bf16.mxu1 %v1815_v0  ;;  %1582 = vmatprep.mubr.msk.bf16.mxu1 %vm1816_vm0, %v1815_v0  ;;  %v1930_v12 = vld [vmem:[%s2201_s9] sm:$0xff]   ;;  %vm160_vm4 = vcmask 130048   ;;  %v1817_v30 = vmov 0   ;;  %s1818_s9 = smov 119   ;;  %vm306_vm5 = vcmask 72704   ;;  %vm339_vm6 = vcmask 1043456  }
  0x10   :  { %v89_v3 = vsel %vm87_vm1, %v82_v2, 0  ;;  %1581 = vmatpush3.bf16.msra.mxu1 %v1930_v12  ;;  %1741 = vset.pattern.permute.xlu1 %v1817_v30  ;;  %v1946_v36 = vld [vmem:[%s2194_s2] sm:$0xf]  ;;  %vm340_vm7 = vcmask 1044480   ;;  %v1819_v58 = vmov 65535   ;;  %vm444_vm8 = vcmask 64512  }
  0x11   :  { %1575 = vmatpush3.bf16.msra.mxu0 %v89_v3  ;;  %1592 = vmatprep.subr.bf16.mxu1 %v1815_v0  ;;  %v68_v37 = vld [vmem:[%s2196_s4] sm:$0xff]  ;;  %v341_v59 = vsel %vm339_vm6, 4294967295, %v1819_v58  ;;  %vm593_vm9 = vcmask 39936   ;;  %vm621_vm10 = vcmask 1042432   ;;  %vm812_vm11 = vcmask 130112  }
  0x12   :  { %1586 = vmatprep.subr.bf16.mxu0 %v1815_v0  ;;  %1742 = vset.pattern.permute.xlu0 %v1817_v30  ;;  %v1960_v41 = vld [vmem:[%s2195_s3] sm:$0xf]  ;;  %v342_v61 = vsel %vm340_vm7, %v341_v59, 0 }
  0x13   :  { %v1744_v57 = vld [vmem:[%s2202_s10] sm:$0x1f]  }
  0x14   :  { %1577 = vmatmul.mubr.msk.bf16.vlgmr.msra.gmra.mxu0 %vm83_vm2, %v1918_v4  ;;  %v1745_v60 = vld [vmem:[%s2203_s11] sm:$0x1f]   ;;  %v1982_v62 = vand.u32 %v1744_v57, %v342_v61 }
  0x15   :  { %1588 = vmatprep.mubr.msk.bf16.mxu0 %vm1816_vm0, %v1815_v0  ;;  %v1984_v63 = vand.u32 %v1745_v60, %v342_v61 }
  0xd4   :  { %v125_v5 = vpop.f32.mrf.mxu0 }
  0xd5   :  { %v132_v6 = vsel %vm131_vm3, %v125_v5, 0.0  ;;  %v136_v7 = vmul.f32 %v125_v5, %v125_v5 }
  0xd6   :  { %133 = vadd.xlane.f32.xlu0 %v132_v6  ;;  %v1578_v8 = vpop.f32.mrf.mxu0 }
  0xd7   :  { %v137_v10 = vsel %vm131_vm3, %v136_v7, 0.0 }
  0xd8   :  { %v128_v9 = vpop.f32.mrf.mxu0 }
  0xda   :  { %138 = vadd.xlane.f32.xlu0 %v137_v10  ;;  %v1579_v11 = vpop.f32.mrf.mxu0 }
 0x15f   :  { %v134_v13 = vpop.xlane.xlu0 %133 }
 0x160   :  { %v135_v14 = vmul.f32 0.0625, %v134_v13 }
 0x162   :  { %v141_v16 = vmul.f32 %v135_v14, %v135_v14  ;;  %v144_v21 = vsub.f32 %v125_v5, %v135_v14 }
 0x163   :  { %v139_v15 = vpop.xlane.xlu0 %138 }
 0x164   :  { %v140_v17 = vmul.f32 0.0625, %v139_v15 }
 0x166   :  { %v142_v18 = vsub.f32 %v140_v17, %v141_v16 }
 0x168   :  { %v143_v19 = vmax.f32 %v142_v18, 0.0 }
 0x16a   :  { %v145_v20 = vadd.f32 1e-05, %v143_v19  ;;  %v78_v19 = vld [vmem:[%s2204_s12] sm:$0xf]  ;;  %s1821_s12 = smov 123  }
 0x16c   :  { %1746 = vrsqrt.f32 %v145_v20 }
 0x179   :  { %v1747_v22 = vpop.eup %1746 }
 0x17a   :  { %v147_v23 = vmul.f32 %v1747_v22, %v144_v21  ;;  %v1995_v22 = vsel %vm339_vm6, %v78_v19, 0 }
 0x17c   :  { %v149_v24 = vmul.f32 0.70710677, %v147_v23  ;;  %v148_v26 = vmul.f32 0.5, %v147_v23 }
 0x17e   :  { %1748 = verf.f32 %v149_v24 }
 0x18b   :  { %v1749_v25 = vpop.eup %1748 }
 0x18c   :  { %v151_v27 = vadd.f32 1.0, %v1749_v25 }
 0x18e   :  { %v1934_v28 = vmul.f32 %v151_v27, %v148_v26 }
 0x190   :  { %v153_v29 = vpack.c.bf16 %v1934_v28, %v1934_v28  ;;  %v438_v56 = vrot.slane %v1934_v28, 6 }
 0x192   :  { %1583 = vmatmul.mubr.msk.bf16.vlgmr.msra.gmra.mxu1 %vm160_vm4, %v153_v29 }
 0x193   :  { %1594 = vmatprep.mubr.msk.bf16.mxu1 %vm1816_vm0, %v1815_v0 }
 0x252   :  { %v198_v31 = vpop.f32.mrf.mxu1 }
 0x253   :  { %v204_v32 = vpack.c.bf16 %v198_v31, %v198_v31 }
 0x254   :  { %v1584_v33 = vpop.f32.mrf.mxu1 }
 0x255   :  { %v258_v34 = vsel %vm87_vm1, %v204_v32, 0  ;;  %206 = vrot.lane.b32.xlu1 %v204_v32, %s1818_s9 }
 0x256   :  { %v201_v35 = vpop.f32.mrf.mxu1  ;;  %1593 = vmatpush3.bf16.msra.mxu1 %v258_v34 }
 0x257   :  { %1604 = vmatprep.subr.bf16.mxu1 %v1815_v0 }
 0x258   :  { %v1585_v38 = vpop.f32.mrf.mxu1 }
 0x259   :  { %1595 = vmatmul.mubr.msk.bf16.vlgmr.msra.gmra.mxu1 %vm83_vm2, %v1946_v36  ;;  %302 = vperm.xlu1 %1741, %v68_v37  }
 0x25a   :  { %1606 = vmatprep.mubr.msk.bf16.mxu1 %vm1816_vm0, %v1815_v0  ;;  %1605 = vmatpush3.bf16.msra.mxu1 %v1982_v62 }
 0x25b   :  { %1616 = vmatprep.subr.bf16.mxu1 %v1815_v0 }
 0x2c7   :  { %v207_v39 = vpop.permute.xlu1 %206 }
 0x2c8   :  { %v212_v40 = vsel %vm87_vm1, %v207_v39, 0 }
 0x2c9   :  { %1587 = vmatpush3.bf16.msra.mxu0 %v212_v40 }
 0x2ca   :  { %1598 = vmatprep.subr.bf16.mxu0 %v1815_v0 }
 0x2cc   :  { %1589 = vmatmul.mubr.msk.bf16.vlgmr.msra.gmra.mxu0 %vm83_vm2, %v1960_v41 }
 0x2cd   :  { %1600 = vmatprep.mubr.msk.bf16.mxu0 %vm1816_vm0, %v1815_v0  ;;  %1599 = vmatpush3.bf16.msra.mxu0 %v1984_v63 }
 0x2ce   :  { %1610 = vmatprep.subr.bf16.mxu0 %v1815_v0 }
 0x2d4   :  { %v1967_v47 = vpop.permute.xlu1 %302 }
 0x319   :  { %v294_v42 = vpop.f32.mrf.mxu1 }
 0x31b   :  { %v1596_v43 = vpop.f32.mrf.mxu1 }
 0x31c   :  { %v2016_v43 = vld [vmem:[%s2197_s5] sm:$0xf] }
 0x31d   :  { %v297_v44 = vpop.f32.mrf.mxu1 }
 0x31e   :  { %v71_v44 = vld [vmem:[%s2199_s7] sm:$0xff] }
 0x31f   :  { %v1597_v45 = vpop.f32.mrf.mxu1 }
 0x38c   :  { %v248_v46 = vpop.f32.mrf.mxu0 }
 0x38d   :  { %v295_v48 = vadd.f32 %v294_v42, %v248_v46 }
 0x38e   :  { %v1590_v49 = vpop.f32.mrf.mxu0 }
 0x38f   :  { %v305_v50 = vadd.f32 %v1967_v47, %v295_v48  ;;  %v2030_v49 = vld [vmem:[%s2198_s6] sm:$0xf] }
 0x390   :  { %v251_v51 = vpop.f32.mrf.mxu0 }
 0x391   :  { %v307_v52 = vsel %vm306_vm5, %v305_v50, 0.0  ;;  %v311_v53 = vmul.f32 %v305_v50, %v305_v50 }
 0x392   :  { %308 = vadd.xlane.f32.xlu0 %v307_v52  ;;  %v1591_v54 = vpop.f32.mrf.mxu0 }
 0x393   :  { %v312_v55 = vsel %vm306_vm5, %v311_v53, 0.0 }
 0x394   :  { %313 = vadd.xlane.f32.xlu1 %v312_v55 }
 0x3a8   :  { %439 = vrot.lane.b32.xlu0 %v438_v56, %s1820_s18 }
 0x41b   :  { %v309_v1 = vpop.xlane.xlu0 %308 }
 0x41c   :  { %v310_v2 = vmul.f32 0.11111111, %v309_v1 }
 0x41d   :  { %v314_v3 = vpop.xlane.xlu1 %313 }
 0x41e   :  { %v316_v5 = vmul.f32 %v310_v2, %v310_v2  ;;  %v315_v6 = vmul.f32 0.11111111, %v314_v3  ;;  %v319_v10 = vsub.f32 %v305_v50, %v310_v2 }
 0x41f   :  { %v440_v23 = vpop.permute.xlu0 %439 }
 0x420   :  { %v317_v7 = vsub.f32 %v315_v6, %v316_v5  ;;  %v442_v24 = vsel %vm87_vm1, %v1934_v28, %v440_v23  ;;  %v79_v5 = vld [vmem:[%s2205_s13] sm:$0x7]  ;;  %v622_v6 = vsel %vm87_vm1, 4294967295, %v1819_v58 }
 0x421   :  { %v443_v25 = vpack.c.bf16 %v442_v24, %v442_v24 }
 0x422   :  { %v318_v8 = vmax.f32 %v317_v7, 0.0  ;;  %v80_v7 = vld [vmem:[%s2206_s14] sm:$0x7] }
 0x424   :  { %v320_v9 = vadd.f32 1e-05, %v318_v8  ;;  %v623_v8 = vsel %vm621_vm10, %v622_v6, 0 }
 0x426   :  { %1750 = vrsqrt.f32 %v320_v9  ;;  %v2050_v9 = vand.u32 %v623_v8, %v79_v5 }
 0x433   :  { %v1751_v11 = vpop.eup %1750 }
 0x434   :  { %v322_v13 = vmul.f32 %v1751_v11, %v319_v10  ;;  %v2052_v10 = vand.u32 %v623_v8, %v80_v7 }
 0x436   :  { %v324_v14 = vmul.f32 0.70710677, %v322_v13  ;;  %v323_v16 = vmul.f32 0.5, %v322_v13 }
 0x438   :  { %1752 = verf.f32 %v324_v14 }
 0x445   :  { %v1753_v15 = vpop.eup %1752 }
 0x446   :  { %v326_v17 = vadd.f32 1.0, %v1753_v15 }
 0x448   :  { %v327_v18 = vmul.f32 %v326_v17, %v323_v16 }
 0x44a   :  { %v328_v20 = vpack.c.bf16 %v327_v18, %v327_v18 }
 0x44c   :  { %1607 = vmatmul.mubr.msk.bf16.vlgmr.msra.gmra.mxu1 %vm306_vm5, %v328_v20  ;;  %v330_v21 = vrot.slane %v328_v20, 2 }
 0x44d   :  { %1618 = vmatprep.mubr.msk.bf16.mxu1 %vm1816_vm0, %v1815_v0 }
 0x44e   :  { %1601 = vmatmul.mubr.msk.bf16.vlgmr.msra.gmra.mxu0 %vm306_vm5, %v330_v21 }
 0x44f   :  { %1611 = vmatpush3.bf16.msra.mxu0 %v1995_v22  ;;  %1612 = vmatprep.mubr.msk.bf16.mxu0 %vm1816_vm0, %v1815_v0 }
 0x450   :  { %1622 = vmatprep.subr.bf16.mxu0 %v1815_v0 }
 0x456   :  { %1613 = vmatmul.mubr.msk.bf16.vlgmr.msra.gmra.mxu0 %vm444_vm8, %v443_v25 }
 0x457   :  { %1624 = vmatprep.mubr.msk.bf16.mxu0 %vm1816_vm0, %v1815_v0 }
 0x50c   :  { %v431_v26 = vpop.f32.mrf.mxu1 }
 0x50e   :  { %v380_v27 = vpop.f32.mrf.mxu0  ;;  %v1608_v29 = vpop.f32.mrf.mxu1 }
 0x50f   :  { %v2009_v30 = vadd.f32 %v431_v26, %v380_v27 }
 0x510   :  { %v1602_v31 = vpop.f32.mrf.mxu0  ;;  %v434_v32 = vpop.f32.mrf.mxu1 }
 0x511   :  { %v713_v25 = vadd.f32 %v2009_v30, %v1934_v28  ;;  %v2074_v30 = vld [vmem:[%s2200_s8] sm:$0xf]  ;;  %s1823_s8 = smov [#allocation5]  }
 0x512   :  { %v383_v33 = vpop.f32.mrf.mxu0  ;;  %v1609_v34 = vpop.f32.mrf.mxu1 }
 0x513   :  { %v714_v31 = vpack.c.bf16 %v713_v25, %v713_v25  ;;  %v1508_v34 = vld [vmem:[%s2192_s0 + $0x4] sm:$0xf]  ;;  %s1822_s0 = smov 8  }
 0x514   :  { %v1603_v35 = vpop.f32.mrf.mxu0  ;;  %v816_v28 = vpack.c.bf16 %v1508_v34, %v1508_v34 }
 0x515   :  { %v719_v35 = vsel %vm87_vm1, %v714_v31, 0 }
 0x516   :  { %v485_v37 = vpop.f32.mrf.mxu0 }
 0x517   :  { %v491_v38 = vpack.c.bf16 %v485_v37, %v485_v37  ;;  %v818_v37 = vsel %vm87_vm1, %v816_v28, 0 }
 0x518   :  { %v1614_v39 = vpop.f32.mrf.mxu0 }
 0x519   :  { %v545_v40 = vsel %vm87_vm1, %v491_v38, 0  ;;  %493 = vrot.lane.b32.xlu0 %v491_v38, %s1821_s12 }
 0x51a   :  { %v488_v42 = vpop.f32.mrf.mxu0  ;;  %1623 = vmatpush3.bf16.msra.mxu0 %v545_v40 }
 0x51b   :  { %1634 = vmatprep.subr.bf16.mxu0 %v1815_v0 }
 0x51c   :  { %v1615_v45 = vpop.f32.mrf.mxu0 }
 0x51d   :  { %1625 = vmatmul.mubr.msk.bf16.vlgmr.msra.gmra.mxu0 %vm83_vm2, %v2016_v43  ;;  %589 = vperm.xlu0 %1742, %v71_v44  }
 0x51e   :  { %1636 = vmatprep.mubr.msk.bf16.mxu0 %vm1816_vm0, %v1815_v0  ;;  %1635 = vmatpush3.bf16.msra.mxu0 %v2050_v9 }
 0x51f   :  { %1646 = vmatprep.subr.bf16.mxu0 %v1815_v0 }
 0x58b   :  { %v494_v46 = vpop.permute.xlu0 %493 }
 0x58c   :  { %v499_v48 = vsel %vm87_vm1, %v494_v46, 0 }
 0x58d   :  { %1617 = vmatpush3.bf16.msra.mxu1 %v499_v48 }
 0x58e   :  { %1628 = vmatprep.subr.bf16.mxu1 %v1815_v0 }
 0x590   :  { %1619 = vmatmul.mubr.msk.bf16.vlgmr.msra.gmra.mxu1 %vm83_vm2, %v2030_v49 }
 0x591   :  { %1630 = vmatprep.mubr.msk.bf16.mxu1 %vm1816_vm0, %v1815_v0  ;;  %1629 = vmatpush3.bf16.msra.mxu1 %v2052_v10 }
 0x592   :  { %1640 = vmatprep.subr.bf16.mxu1 %v1815_v0 }
 0x598   :  { %v2037_v55 = vpop.permute.xlu0 %589 }
 0x5dd   :  { %v581_v50 = vpop.f32.mrf.mxu0 }
 0x5df   :  { %v1626_v51 = vpop.f32.mrf.mxu0 }
 0x5e1   :  { %v584_v52 = vpop.f32.mrf.mxu0 }
 0x5e3   :  { %v1627_v53 = vpop.f32.mrf.mxu0 }
 0x650   :  { %v535_v54 = vpop.f32.mrf.mxu1 }
 0x651   :  { %v582_v56 = vadd.f32 %v581_v50, %v535_v54 }
 0x652   :  { %v1620_v57 = vpop.f32.mrf.mxu1 }
 0x653   :  { %v592_v59 = vadd.f32 %v2037_v55, %v582_v56 }
 0x654   :  { %v538_v60 = vpop.f32.mrf.mxu1 }
 0x655   :  { %v594_v61 = vsel %vm593_vm9, %v592_v59, 0.0  ;;  %v598_v1 = vmul.f32 %v592_v59, %v592_v59 }
 0x656   :  { %v1621_v2 = vpop.f32.mrf.mxu1  ;;  %595 = vadd.xlane.f32.xlu1 %v594_v61 }
 0x657   :  { %v599_v3 = vsel %vm593_vm9, %v598_v1, 0.0 }
 0x658   :  { %600 = vadd.xlane.f32.xlu0 %v599_v3 }
 0x6df   :  { %v596_v11 = vpop.xlane.xlu1 %595 }
 0x6e0   :  { %v597_v13 = vmul.f32 0.2, %v596_v11 }
 0x6e1   :  { %v601_v58 = vpop.xlane.xlu0 %600 }
 0x6e2   :  { %v603_v14 = vmul.f32 %v597_v13, %v597_v13  ;;  %v602_v15 = vmul.f32 0.2, %v601_v58  ;;  %v606_v19 = vsub.f32 %v592_v59, %v597_v13 }
 0x6e4   :  { %v604_v16 = vsub.f32 %v602_v15, %v603_v14 }
 0x6e6   :  { %v605_v17 = vmax.f32 %v604_v16, 0.0 }
 0x6e8   :  { %v607_v18 = vadd.f32 1e-05, %v605_v17 }
 0x6ea   :  { %1754 = vrsqrt.f32 %v607_v18 }
 0x6f7   :  { %v1755_v20 = vpop.eup %1754 }
 0x6f8   :  { %v609_v21 = vmul.f32 %v1755_v20, %v606_v19 }
 0x6fa   :  { %v611_v23 = vmul.f32 0.70710677, %v609_v21  ;;  %v610_v26 = vmul.f32 0.5, %v609_v21 }
 0x6fc   :  { %1756 = verf.f32 %v611_v23 }
 0x709   :  { %v1757_v24 = vpop.eup %1756 }
 0x70a   :  { %v613_v27 = vadd.f32 1.0, %v1757_v24 }
 0x70c   :  { %v614_v29 = vmul.f32 %v613_v27, %v610_v26 }
 0x70e   :  { %v615_v32 = vpack.c.bf16 %v614_v29, %v614_v29 }
 0x710   :  { %1637 = vmatmul.mubr.msk.bf16.vlgmr.msra.gmra.mxu0 %vm593_vm9, %v615_v32  ;;  %v617_v33 = vrot.slane %v615_v32, 2 }
 0x711   :  { %1648 = vmatprep.mubr.msk.bf16.mxu0 %vm1816_vm0, %v1815_v0 }
 0x712   :  { %1631 = vmatmul.mubr.msk.bf16.vlgmr.msra.gmra.mxu1 %vm593_vm9, %v617_v33 }
 0x713   :  { %1641 = vmatpush3.bf16.msra.mxu1 %v719_v35  ;;  %1642 = vmatprep.mubr.msk.bf16.mxu1 %vm1816_vm0, %v1815_v0 }
 0x714   :  { %1652 = vmatprep.subr.bf16.mxu1 %v1815_v0 }
 0x71a   :  { %1643 = vmatmul.mubr.msk.bf16.vlgmr.msra.gmra.mxu1 %vm83_vm2, %v2074_v30 }
 0x71b   :  { %1653 = vmatpush3.bf16.msra.mxu1 %v818_v37  ;;  %1654 = vmatprep.mubr.msk.bf16.mxu1 %vm1816_vm0, %v1815_v0 }
 0x71c   :  { %1664 = vmatprep.subr.bf16.mxu1 %v1815_v0 }
 0x722   :  { %1655 = vmatmul.mubr.msk.bf16.vlgmr.msra.gmra.mxu1 %vm83_vm2, %v1918_v4 }
 0x723   :  { %1666 = vmatprep.mubr.msk.bf16.mxu1 %vm1816_vm0, %v1815_v0 }
 0x7d0   :  { %v707_v38 = vpop.f32.mrf.mxu0 }
 0x7d2   :  { %v661_v39 = vpop.f32.mrf.mxu1  ;;  %v1638_v40 = vpop.f32.mrf.mxu0 }
 0x7d3   :  { %v708_v42 = vadd.f32 %v707_v38, %v661_v39 }
 0x7d4   :  { %v1632_v44 = vpop.f32.mrf.mxu1  ;;  %v710_v45 = vpop.f32.mrf.mxu0 }
 0x7d5   :  { %v761_v46 = vpack.c.bf16 %v708_v42, %v708_v42 }
 0x7d6   :  { %v664_v48 = vpop.f32.mrf.mxu1  ;;  %v1639_v50 = vpop.f32.mrf.mxu0 }
 0x7d7   :  { %v763_v51 = vsel %vm87_vm1, %v761_v46, 0 }
 0x7d8   :  { %v1633_v52 = vpop.f32.mrf.mxu1  ;;  %1647 = vmatpush3.bf16.msra.mxu0 %v763_v51 }
 0x7d9   :  { %1658 = vmatprep.subr.bf16.mxu0 %v1815_v0 }
 0x7da   :  { %v2088_v53 = vpop.f32.mrf.mxu1 }
 0x7db   :  { %1649 = vmatmul.mubr.msk.bf16.vlgmr.msra.gmra.mxu0 %vm83_vm2, %v2074_v30 }
 0x7dc   :  { %v1644_v4 = vpop.f32.mrf.mxu1  ;;  %1659 = vmatpush3.bf16.msra.mxu0 %v1930_v12  ;;  %1660 = vmatprep.mubr.msk.bf16.mxu0 %vm1816_vm0, %v1815_v0 }
 0x7dd   :  { %1670 = vmatprep.subr.bf16.mxu0 %v1815_v0 }
 0x7de   :  { %v758_v54 = vpop.f32.mrf.mxu1 }
 0x7e0   :  { %v1645_v56 = vpop.f32.mrf.mxu1 }
 0x7e2   :  { %v854_v57 = vpop.f32.mrf.mxu1 }
 0x7e3   :  { %v860_v59 = vsel %vm131_vm3, %v854_v57, 0.0  ;;  %v864_v60 = vmul.f32 %v854_v57, %v854_v57 }
 0x7e4   :  { %861 = vadd.xlane.f32.xlu1 %v860_v59  ;;  %v1656_v61 = vpop.f32.mrf.mxu1 }
 0x7e5   :  { %v865_v2 = vsel %vm131_vm3, %v864_v60, 0.0 }
 0x7e6   :  { %v857_v1 = vpop.f32.mrf.mxu1 }
 0x7e8   :  { %866 = vadd.xlane.f32.xlu1 %v865_v2  ;;  %v1657_v3 = vpop.f32.mrf.mxu1 }
 0x86d   :  { %v862_v5 = vpop.xlane.xlu1 %861 }
 0x86e   :  { %v863_v12 = vmul.f32 0.0625, %v862_v5 }
 0x870   :  { %v869_v7 = vmul.f32 %v863_v12, %v863_v12  ;;  %v872_v14 = vsub.f32 %v854_v57, %v863_v12 }
 0x871   :  { %v867_v6 = vpop.xlane.xlu1 %866 }
 0x872   :  { %v868_v8 = vmul.f32 0.0625, %v867_v6 }
 0x874   :  { %v870_v11 = vsub.f32 %v868_v8, %v869_v7 }
 0x876   :  { %v871_v13 = vmax.f32 %v870_v11, 0.0 }
 0x878   :  { %v873_v58 = vadd.f32 1e-05, %v871_v13 }
 0x87a   :  { %1758 = vrsqrt.f32 %v873_v58 }
 0x887   :  { %v1759_v15 = vpop.eup %1758 }
 0x888   :  { %v875_v16 = vmul.f32 %v1759_v15, %v872_v14 }
 0x88a   :  { %v877_v17 = vmul.f32 0.70710677, %v875_v16  ;;  %v876_v19 = vmul.f32 0.5, %v875_v16 }
 0x88c   :  { %1760 = verf.f32 %v877_v17 }
 0x899   :  { %v1761_v18 = vpop.eup %1760 }
 0x89a   :  { %v879_v20 = vadd.f32 1.0, %v1761_v18 }
 0x89b   :  { %v2098_v21 = vpop.f32.mrf.mxu0 }
 0x89c   :  { %v805_v23 = vadd.f32 %v2098_v21, %v2088_v53  ;;  %v2102_v24 = vmul.f32 %v879_v20, %v876_v19 }
 0x89d   :  { %v1650_v25 = vpop.f32.mrf.mxu0 }
 0x89e   :  { %806 = vst.msk [vmem:[#allocation5] sm:$0xff] %vm444_vm8, %v805_v23  ;;  %v881_v26 = vpack.c.bf16 %v2102_v24, %v2102_v24  ;;  %v1127_v52 = vrot.slane %v2102_v24, 6 }
 0x89f   :  { %v802_v27 = vpop.f32.mrf.mxu0 }
 0x8a0   :  { %1661 = vmatmul.mubr.msk.bf16.vlgmr.msra.gmra.mxu0 %vm160_vm4, %v881_v26 }
 0x8a1   :  { %v1651_v29 = vpop.f32.mrf.mxu0  ;;  %1672 = vmatprep.mubr.msk.bf16.mxu0 %vm1816_vm0, %v1815_v0 }
 0x960   :  { %v919_v31 = vpop.f32.mrf.mxu0 }
 0x961   :  { %v925_v32 = vpack.c.bf16 %v919_v31, %v919_v31 }
 0x962   :  { %v1662_v33 = vpop.f32.mrf.mxu0 }
 0x963   :  { %v973_v34 = vsel %vm87_vm1, %v925_v32, 0  ;;  %927 = vrot.lane.b32.xlu1 %v925_v32, %s1818_s9  ;;  %s1480_s9 = sshll.u32 %s1823_s8, 4  ;;  %s1481_s9 = int_to_ptr.vmem [resolvable:$true] %s1480_s9 }
 0x964   :  { %v922_v35 = vpop.f32.mrf.mxu0  ;;  %1671 = vmatpush3.bf16.msra.mxu0 %v973_v34  ;;  %s1790_s27 = scalar_lea.vmem %s1481_s9, 256  ;;  %p1795_p6 = scmp.lt.s32.totalorder %s1481_s9, %s1481_s9 }
 0x965   :  { %1682 = vmatprep.subr.bf16.mxu0 %v1815_v0  ;;  %p1791_p5 = scmp.ne.s32.totalorder %s1481_s9, %s1790_s27  ;;  %p1796_p7 = scmp.lt.s32.totalorder %s1790_s27, %s1790_s27 }
 0x966   :  { %v1663_v28 = vpop.f32.mrf.mxu0 }
 0x967   :  { %1673 = vmatmul.mubr.msk.bf16.vlgmr.msra.gmra.mxu0 %vm83_vm2, %v1946_v36  ;;  %p1797_p8 = por %p1796_p7, %p1795_p6 }
 0x968   :  { %1683 = vmatpush3.bf16.msra.mxu0 %v1982_v62  ;;  %1684 = vmatprep.mubr.msk.bf16.mxu0 %vm1816_vm0, %v1815_v0 }
 0x969   :  { %1694 = vmatprep.subr.bf16.mxu0 %v1815_v0  ;;  %p1798_p9 = pnand %p1797_p8, %p1791_p5 }
 0x9d5   :  { %v928_v37 = vpop.permute.xlu1 %927 }
 0x9d6   :  { %v930_v38 = vsel %vm87_vm1, %v928_v37, 0 }
 0x9d7   :  { %1665 = vmatpush3.bf16.msra.mxu1 %v930_v38 }
 0x9d8   :  { %1676 = vmatprep.subr.bf16.mxu1 %v1815_v0 }
 0x9da   :  { %1667 = vmatmul.mubr.msk.bf16.vlgmr.msra.gmra.mxu1 %vm83_vm2, %v1960_v41 }
 0x9db   :  { %1677 = vmatpush3.bf16.msra.mxu1 %v1984_v63  ;;  %1678 = vmatprep.mubr.msk.bf16.mxu1 %vm1816_vm0, %v1815_v0 }
 0x9dc   :  { %1688 = vmatprep.subr.bf16.mxu1 %v1815_v0 }
 0xa27   :  { %v1009_v36 = vpop.f32.mrf.mxu0 }
 0xa29   :  { %v1674_v62 = vpop.f32.mrf.mxu0 }
 0xa2b   :  { %v1012_v39 = vpop.f32.mrf.mxu0 }
 0xa2d   :  { %v1675_v40 = vpop.f32.mrf.mxu0 }
 0xa9a   :  { %v966_v42 = vpop.f32.mrf.mxu1 }
 0xa9b   :  { %v1010_v44 = vadd.f32 %v1009_v36, %v966_v42 }
 0xa9c   :  { %v1668_v45 = vpop.f32.mrf.mxu1 }
 0xa9d   :  { %v1015_v46 = vadd.f32 %v1010_v44, %v1967_v47 }
 0xa9e   :  { %v969_v48 = vpop.f32.mrf.mxu1 }
 0xa9f   :  { %v1016_v50 = vsel %vm306_vm5, %v1015_v46, 0.0  ;;  %v1020_v41 = vmul.f32 %v1015_v46, %v1015_v46 }
 0xaa0   :  { %v1669_v51 = vpop.f32.mrf.mxu1  ;;  %1017 = vadd.xlane.f32.xlu1 %v1016_v50 }
 0xaa1   :  { %v1021_v63 = vsel %vm306_vm5, %v1020_v41, 0.0 }
 0xaa2   :  { %1022 = vadd.xlane.f32.xlu0 %v1021_v63 }
 0xab8   :  { %1128 = vrot.lane.b32.xlu0 %v1127_v52, %s1820_s18 }
 0xb29   :  { %v1018_v4 = vpop.xlane.xlu1 %1017 }
 0xb2a   :  { %v1019_v54 = vmul.f32 0.11111111, %v1018_v4 }
 0xb2b   :  { %v1023_v56 = vpop.xlane.xlu0 %1022 }
 0xb2c   :  { %v1025_v57 = vmul.f32 %v1019_v54, %v1019_v54  ;;  %v1024_v59 = vmul.f32 0.11111111, %v1023_v56  ;;  %v1028_v1 = vsub.f32 %v1015_v46, %v1019_v54 }
 0xb2e   :  { %v1026_v60 = vsub.f32 %v1024_v59, %v1025_v57 }
 0xb2f   :  { %v1129_v58 = vpop.permute.xlu0 %1128 }
 0xb30   :  { %v1027_v47 = vmax.f32 %v1026_v60, 0.0  ;;  %v1131_v14 = vsel %vm87_vm1, %v2102_v24, %v1129_v58 }
 0xb31   :  { %v1132_v15 = vpack.c.bf16 %v1131_v14, %v1131_v14 }
 0xb32   :  { %v1029_v61 = vadd.f32 1e-05, %v1027_v47 }
 0xb34   :  { %1762 = vrsqrt.f32 %v1029_v61 }
 0xb41   :  { %v1763_v2 = vpop.eup %1762 }
 0xb42   :  { %v1031_v3 = vmul.f32 %v1763_v2, %v1028_v1 }
 0xb44   :  { %v1033_v5 = vmul.f32 0.70710677, %v1031_v3  ;;  %v1032_v6 = vmul.f32 0.5, %v1031_v3 }
 0xb46   :  { %1764 = verf.f32 %v1033_v5 }
 0xb53   :  { %v1765_v12 = vpop.eup %1764 }
 0xb54   :  { %v1035_v7 = vadd.f32 1.0, %v1765_v12 }
 0xb56   :  { %v1036_v8 = vmul.f32 %v1035_v7, %v1032_v6 }
 0xb58   :  { %v1037_v11 = vpack.c.bf16 %v1036_v8, %v1036_v8 }
 0xb5a   :  { %1685 = vmatmul.mubr.msk.bf16.vlgmr.msra.gmra.mxu0 %vm306_vm5, %v1037_v11  ;;  %v1039_v13 = vrot.slane %v1037_v11, 2 }
 0xb5b   :  { %1696 = vmatprep.mubr.msk.bf16.mxu0 %vm1816_vm0, %v1815_v0 }
 0xb5c   :  { %1679 = vmatmul.mubr.msk.bf16.vlgmr.msra.gmra.mxu1 %vm306_vm5, %v1039_v13 }
 0xb5d   :  { %1689 = vmatpush3.bf16.msra.mxu1 %v1995_v22  ;;  %1690 = vmatprep.mubr.msk.bf16.mxu1 %vm1816_vm0, %v1815_v0 }
 0xb5e   :  { %1700 = vmatprep.subr.bf16.mxu1 %v1815_v0 }
 0xb64   :  { %1691 = vmatmul.mubr.msk.bf16.vlgmr.msra.gmra.mxu1 %vm444_vm8, %v1132_v15 }
 0xb65   :  { %1702 = vmatprep.mubr.msk.bf16.mxu1 %vm1816_vm0, %v1815_v0 }
 0xc1a   :  { %v1120_v16 = vpop.f32.mrf.mxu0 }
 0xc1c   :  { %v1077_v17 = vpop.f32.mrf.mxu1  ;;  %v1686_v18 = vpop.f32.mrf.mxu0 }
 0xc1d   :  { %v2145_v19 = vadd.f32 %v1120_v16, %v1077_v17 }
 0xc1e   :  { %v1680_v22 = vpop.f32.mrf.mxu1  ;;  %v1123_v20 = vpop.f32.mrf.mxu0 }
 0xc1f   :  { %v1377_v47 = vadd.f32 %v2145_v19, %v2102_v24 }
 0xc20   :  { %v1080_v23 = vpop.f32.mrf.mxu1  ;;  %v1687_v25 = vpop.f32.mrf.mxu0 }
 0xc21   :  { %v1378_v3 = vpack.c.bf16 %v1377_v47, %v1377_v47 }
 0xc22   :  { %v1681_v26 = vpop.f32.mrf.mxu1 }
 0xc23   :  { %v1380_v12 = vsel %vm87_vm1, %v1378_v3, 0 }
 0xc24   :  { %v1170_v27 = vpop.f32.mrf.mxu1 }
 0xc25   :  { %v1176_v29 = vpack.c.bf16 %v1170_v27, %v1170_v27 }
 0xc26   :  { %v1692_v31 = vpop.f32.mrf.mxu1 }
 0xc27   :  { %v1224_v32 = vsel %vm87_vm1, %v1176_v29, 0  ;;  %1178 = vrot.lane.b32.xlu0 %v1176_v29, %s1821_s12 }
 0xc28   :  { %v1173_v33 = vpop.f32.mrf.mxu1  ;;  %1701 = vmatpush3.bf16.msra.mxu1 %v1224_v32 }
 0xc29   :  { %1712 = vmatprep.subr.bf16.mxu1 %v1815_v0 }
 0xc2a   :  { %v1693_v34 = vpop.f32.mrf.mxu1 }
 0xc2b   :  { %1703 = vmatmul.mubr.msk.bf16.vlgmr.msra.gmra.mxu1 %vm83_vm2, %v2016_v43 }
 0xc2c   :  { %1713 = vmatpush3.bf16.msra.mxu1 %v2050_v9  ;;  %1714 = vmatprep.mubr.msk.bf16.mxu1 %vm1816_vm0, %v1815_v0 }
 0xc2d   :  { %1724 = vmatprep.subr.bf16.mxu1 %v1815_v0 }
 0xc99   :  { %v1179_v35 = vpop.permute.xlu0 %1178 }
 0xc9a   :  { %v1181_v28 = vsel %vm87_vm1, %v1179_v35, 0 }
 0xc9b   :  { %1695 = vmatpush3.bf16.msra.mxu0 %v1181_v28 }
 0xc9c   :  { %1706 = vmatprep.subr.bf16.mxu0 %v1815_v0 }
 0xc9e   :  { %1697 = vmatmul.mubr.msk.bf16.vlgmr.msra.gmra.mxu0 %vm83_vm2, %v2030_v49 }
 0xc9f   :  { %1707 = vmatpush3.bf16.msra.mxu0 %v2052_v10  ;;  %1708 = vmatprep.mubr.msk.bf16.mxu0 %vm1816_vm0, %v1815_v0 }
 0xca0   :  { %1718 = vmatprep.subr.bf16.mxu0 %v1815_v0 }
 0xceb   :  { %v1260_v43 = vpop.f32.mrf.mxu1 }
 0xced   :  { %v1704_v9 = vpop.f32.mrf.mxu1 }
 0xcef   :  { %v1263_v37 = vpop.f32.mrf.mxu1 }
 0xcf1   :  { %v1705_v38 = vpop.f32.mrf.mxu1 }
 0xd5e   :  { %v1217_v36 = vpop.f32.mrf.mxu0 }
 0xd5f   :  { %v1261_v62 = vadd.f32 %v1260_v43, %v1217_v36 }
 0xd60   :  { %v1698_v39 = vpop.f32.mrf.mxu0 }
 0xd61   :  { %v1266_v40 = vadd.f32 %v1261_v62, %v2037_v55 }
 0xd62   :  { %v1220_v42 = vpop.f32.mrf.mxu0 }
 0xd63   :  { %v1267_v44 = vsel %vm593_vm9, %v1266_v40, 0.0  ;;  %v1271_v49 = vmul.f32 %v1266_v40, %v1266_v40 }
 0xd64   :  { %1268 = vadd.xlane.f32.xlu0 %v1267_v44  ;;  %v1699_v10 = vpop.f32.mrf.mxu0 }
 0xd65   :  { %v1272_v45 = vsel %vm593_vm9, %v1271_v49, 0.0 }
 0xd66   :  { %1273 = vadd.xlane.f32.xlu1 %v1272_v45 }
 0xd77   :  { %808 = vrot.lane.b32.xlu1 %v2098_v21, %s1822_s0 }
 0xded   :  { %v1269_v46 = vpop.xlane.xlu0 %1268 }
 0xdee   :  { %v1270_v48 = vmul.f32 0.2, %v1269_v46 }
 0xdef   :  { %v1274_v50 = vpop.xlane.xlu1 %1273 }
 0xdf0   :  { %v1276_v41 = vmul.f32 %v1270_v48, %v1270_v48  ;;  %v1275_v51 = vmul.f32 0.2, %v1274_v50  ;;  %v1279_v56 = vsub.f32 %v1266_v40, %v1270_v48 }
 0xdf2   :  { %v1277_v63 = vsub.f32 %v1275_v51, %v1276_v41 }
 0xdf3   :  { %v809_v55 = vpop.permute.xlu1 %808 }
 0xdf4   :  { %v1278_v52 = vmax.f32 %v1277_v63, 0.0  ;;  %v811_v4 = vadd.f32 %v809_v55, %v2088_v53 }
 0xdf6   :  { %v1280_v54 = vadd.f32 1e-05, %v1278_v52  ;;  %813 = vst.msk [vmem:[#allocation5] sm:$0xff] %vm812_vm11, %v811_v4 }
 0xdf8   :  { %1766 = vrsqrt.f32 %v1280_v54 }
 0xe05   :  { %v1767_v57 = vpop.eup %1766 }
 0xe06   :  { %v1282_v59 = vmul.f32 %v1767_v57, %v1279_v56 }
 0xe08   :  { %v1284_v60 = vmul.f32 0.70710677, %v1282_v59  ;;  %v1283_v61 = vmul.f32 0.5, %v1282_v59 }
 0xe0a   :  { %1768 = verf.f32 %v1284_v60 }
 0xe17   :  { %v1769_v21 = vpop.eup %1768 }
 0xe18   :  { %v1286_v1 = vadd.f32 1.0, %v1769_v21 }
 0xe1a   :  { %v1287_v2 = vmul.f32 %v1286_v1, %v1283_v61 }
 0xe1c   :  { %v1288_v5 = vpack.c.bf16 %v1287_v2, %v1287_v2 }
 0xe1e   :  { %1715 = vmatmul.mubr.msk.bf16.vlgmr.msra.gmra.mxu1 %vm593_vm9, %v1288_v5  ;;  %v1290_v53 = vrot.slane %v1288_v5, 2 }
 0xe1f   :  { %1726 = vmatprep.mubr.msk.bf16.mxu1 %vm1816_vm0, %v1815_v0 }
 0xe20   :  { %1709 = vmatmul.mubr.msk.bf16.vlgmr.msra.gmra.mxu0 %vm593_vm9, %v1290_v53 }
 0xe21   :  { %1719 = vmatpush3.bf16.msra.mxu0 %v1380_v12  ;;  %1720 = vmatprep.mubr.msk.bf16.mxu0 %vm1816_vm0, %v1815_v0 }
 0xe28   :  { %1721 = vmatmul.mubr.msk.bf16.vlgmr.msra.gmra.mxu0 %vm83_vm2, %v2074_v30 }
 0xede   :  { %v1371_v24 = vpop.f32.mrf.mxu1 }
 0xee0   :  { %v1328_v6 = vpop.f32.mrf.mxu0  ;;  %v1716_v7 = vpop.f32.mrf.mxu1 }
 0xee1   :  { %v1372_v8 = vadd.f32 %v1371_v24, %v1328_v6 }
 0xee2   :  { %v1710_v11 = vpop.f32.mrf.mxu0  ;;  %v1374_v13 = vpop.f32.mrf.mxu1 }
 0xee3   :  { %v1422_v58 = vpack.c.bf16 %v1372_v8, %v1372_v8 }
 0xee4   :  { %v1331_v14 = vpop.f32.mrf.mxu0  ;;  %v1717_v15 = vpop.f32.mrf.mxu1 }
 0xee5   :  { %v1424_v16 = vsel %vm87_vm1, %v1422_v58, 0 }
 0xee6   :  { %v1711_v17 = vpop.f32.mrf.mxu0  ;;  %1725 = vmatpush3.bf16.msra.mxu1 %v1424_v16 }
 0xee8   :  { %v1416_v0 = vpop.f32.mrf.mxu0 }
 0xee9   :  { %1727 = vmatmul.mubr.msk.bf16.vlgmr.msra.gmra.mxu1 %vm83_vm2, %v2074_v30 }
 0xeea   :  { %v1722_v18 = vpop.f32.mrf.mxu0 }
 0xeec   :  { %v1419_v19 = vpop.f32.mrf.mxu0 }
 0xeee   :  { %v1723_v22 = vpop.f32.mrf.mxu0 }
 0xfa9   :  { %v1460_v20 = vpop.f32.mrf.mxu1 }
 0xfaa   :  { %1470 = vrot.lane.b32.xlu1 %v1460_v20, %s1822_s0  ;;  %v1466_v23 = vadd.f32 %v1460_v20, %v1416_v0 }
 0xfab   :  { %v1728_v25 = vpop.f32.mrf.mxu1 }
 0xfac   :  { %1468 = vst.msk [vmem:[#allocation5 + $0x8] sm:$0xff] %vm444_vm8, %v1466_v23 }
 0xfad   :  { %v1463_v26 = vpop.f32.mrf.mxu1 }
 0xfaf   :  { %v1729_v27 = vpop.f32.mrf.mxu1 }
0x101c   :  { %v1471_v29 = vpop.permute.xlu1 %1470 }
0x101d   :  { %v1473_v31 = vadd.f32 %v1471_v29, %v1416_v0 }
0x101f   :  { %1474 = vst.msk [vmem:[#allocation5 + $0x8] sm:$0xff] %vm812_vm11, %v1473_v31 }
0x1020   :  { %1801 = shalt.err (!%p1798_p9)
}
0x1021   :  { %s1824_s28 = smov 128  }
0x1022   :  { %1486 = dma.vmem_to_hbm [thread:$0]  %s1481_s9, 256, %s2207_s15, [#allocation4], %s1824_s28, %s1824_s28, %s1822_s0  }
0x1023   :  { %1812 = dma.done.wait [#allocation4], 256  }
0x1024   :  { %1813 = vsyncadd [#allocation4], 4294967040 }
0x1025   :  { %1490 = vsyncpa [#allocation3], 1 }
0x1026   :  { %1491 = vsyncpa [#allocation4], 1 }

// kernel: tpu_custom_call.1
= control target key start
LH: loop header
LB: loop body
LE: loop exit
PB: predicated region body
PF: predicated region fallthrough
CT: control target
= control target key end

     0   :  { %20 = vsyncpa [#allocation3], 0  ;;  %s2192_s0 = inlined_call_operand.vmem [shape: f32[2,4,16], index: 0, kind: input, shape index: {}]   ;;  %s2193_s1 = inlined_call_operand.hbm [shape: bf16[4,4], index: 1, kind: input, shape index: {}]   ;;  %s2194_s2 = inlined_call_operand.vmem [shape: bf16[8,4], index: 2, kind: input, shape index: {}]   ;;  %s2195_s3 = inlined_call_operand.vmem [shape: bf16[8,4], index: 3, kind: input, shape index: {}]   ;;  %s2196_s4 = inlined_call_operand.vmem [shape: f32[8,1], index: 4, kind: input, shape index: {}]   ;;  %s2197_s5 = inlined_call_operand.vmem [shape: bf16[8,4], index: 5, kind: input, shape index: {}]   ;;  %s2198_s6 = inlined_call_operand.vmem [shape: bf16[8,4], index: 6, kind: input, shape index: {}]   ;;  %s2199_s7 = inlined_call_operand.vmem [shape: f32[8,1], index: 7, kind: input, shape index: {}]   ;;  %s2200_s8 = inlined_call_operand.vmem [shape: bf16[8,4], index: 8, kind: input, shape index: {}]   ;;  %s2201_s9 = inlined_call_operand.vmem [shape: bf16[16,18], index: 9, kind: input, shape index: {}]   ;;  %s2202_s10 = inlined_call_operand.vmem [shape: bf16[9,16], index: 10, kind: input, shape index: {}]   ;;  %s2203_s11 = inlined_call_operand.vmem [shape: bf16[9,16], index: 11, kind: input, shape index: {}]   ;;  %s2204_s12 = inlined_call_operand.vmem [shape: bf16[8,10], index: 12, kind: input, shape index: {}]   ;;  %s2205_s13 = inlined_call_operand.vmem [shape: bf16[5,8], index: 13, kind: input, shape index: {}]   ;;  %s2206_s14 = inlined_call_operand.vmem [shape: bf16[5,8], index: 14, kind: input, shape index: {}]   ;;  %s2207_s15 = inlined_call_operand.hbm [shape: f32[2,8,16], index: 15, kind: output, shape index: {}]  }
   0x1   :  { %21 = vsyncpa [#allocation4], 0  ;;  %s1814_s18 = smov [#allocation2]  }
   0x2   :  { %s30_s19 = sshll.u32 %s1814_s18, 4  ;;  %s31_s19 = int_to_ptr.vmem [resolvable:$true] %s30_s19 }
   0x3   :  { %s1778_s20 = scalar_lea.vmem %s31_s19, 32  ;;  %p1783_p1 = scmp.lt.s32.totalorder %s31_s19, %s31_s19 }
   0x4   :  { %p1779_p0 = scmp.ne.s32.totalorder %s31_s19, %s1778_s20  ;;  %p1784_p2 = scmp.lt.s32.totalorder %s1778_s20, %s1778_s20 }
   0x6   :  { %p1785_p3 = por %p1784_p2, %p1783_p1 }
   0x8   :  { %p1786_p4 = pnand %p1785_p3, %p1779_p0 }
   0xa   :  { %1789 = shalt.err (!%p1786_p4)
}
   0xb   :  { %33 = dma.hbm_to_vmem [thread:$0]  %s2193_s1, 32, %s31_s19, [#allocation3]  }
   0xc   :  { %1810 = dma.done.wait [#allocation3], 32  }
   0xd   :  { %1811 = vsyncadd [#allocation3], 4294967264  ;;  %v1815_v0 = vmov 0.0   ;;  %vm1816_vm0 = vmmov 0   ;;  %v81_v1 = vld [vmem:[%s2192_s0] sm:$0xf] }
   0xe   :  { %1574 = vmatprep.subr.bf16.mxu0 %v1815_v0  ;;  %1576 = vmatprep.mubr.msk.bf16.mxu0 %vm1816_vm0, %v1815_v0  ;;  %vm87_vm1 = vcmask 1041408   ;;  %v82_v2 = vpack.c.bf16 %v81_v1, %v81_v1  ;;  %v1918_v4 = vld [vmem:[#allocation2] sm:$0x3]  ;;  %vm83_vm2 = vcmask 31744   ;;  %vm131_vm3 = vcmask 125952   ;;  %s1820_s18 = smov 120  }
   0xf   :  { %1580 = vmatprep.subr.bf16.mxu1 %v1815_v0  ;;  %1582 = vmatprep.mubr.msk.bf16.mxu1 %vm1816_vm0, %v1815_v0  ;;  %v1930_v12 = vld [vmem:[%s2201_s9] sm:$0xff]   ;;  %vm160_vm4 = vcmask 130048   ;;  %v1817_v30 = vmov 0   ;;  %s1818_s9 = smov 119   ;;  %vm306_vm5 = vcmask 72704   ;;  %vm339_vm6 = vcmask 1043456  }
  0x10   :  { %v89_v3 = vsel %vm87_vm1, %v82_v2, 0  ;;  %1581 = vmatpush3.bf16.msra.mxu1 %v1930_v12  ;;  %1741 = vset.pattern.permute.xlu1 %v1817_v30  ;;  %v1946_v36 = vld [vmem:[%s2194_s2] sm:$0xf]  ;;  %vm340_vm7 = vcmask 1044480   ;;  %v1819_v58 = vmov 65535   ;;  %vm444_vm8 = vcmask 64512  }
  0x11   :  { %1575 = vmatpush3.bf16.msra.mxu0 %v89_v3  ;;  %1592 = vmatprep.subr.bf16.mxu1 %v1815_v0  ;;  %v68_v37 = vld [vmem:[%s2196_s4] sm:$0xff]  ;;  %v341_v59 = vsel %vm339_vm6, 4294967295, %v1819_v58  ;;  %vm593_vm9 = vcmask 39936   ;;  %vm621_vm10 = vcmask 1042432   ;;  %vm812_vm11 = vcmask 130112  }
  0x12   :  { %1586 = vmatprep.subr.bf16.mxu0 %v1815_v0  ;;  %1742 = vset.pattern.permute.xlu0 %v1817_v30  ;;  %v1960_v41 = vld [vmem:[%s2195_s3] sm:$0xf]  ;;  %v342_v61 = vsel %vm340_vm7, %v341_v59, 0 }
  0x13   :  { %v1744_v57 = vld [vmem:[%s2202_s10] sm:$0x1f]  }
  0x14   :  { %1577 = vmatmul.mubr.msk.bf16.vlgmr.msra.gmra.mxu0 %vm83_vm2, %v1918_v4  ;;  %v1745_v60 = vld [vmem:[%s2203_s11] sm:$0x1f]   ;;  %v1982_v62 = vand.u32 %v1744_v57, %v342_v61 }
  0x15   :  { %1588 = vmatprep.mubr.msk.bf16.mxu0 %vm1816_vm0, %v1815_v0  ;;  %v1984_v63 = vand.u32 %v1745_v60, %v342_v61 }
  0xd4   :  { %v125_v5 = vpop.f32.mrf.mxu0 }
  0xd5   :  { %v132_v6 = vsel %vm131_vm3, %v125_v5, 0.0  ;;  %v136_v7 = vmul.f32 %v125_v5, %v125_v5 }
  0xd6   :  { %133 = vadd.xlane.f32.xlu0 %v132_v6  ;;  %v1578_v8 = vpop.f32.mrf.mxu0 }
  0xd7   :  { %v137_v10 = vsel %vm131_vm3, %v136_v7, 0.0 }
  0xd8   :  { %v128_v9 = vpop.f32.mrf.mxu0 }
  0xda   :  { %138 = vadd.xlane.f32.xlu0 %v137_v10  ;;  %v1579_v11 = vpop.f32.mrf.mxu0 }
 0x15f   :  { %v134_v13 = vpop.xlane.xlu0 %133 }
 0x160   :  { %v135_v14 = vmul.f32 0.0625, %v134_v13 }
 0x162   :  { %v141_v16 = vmul.f32 %v135_v14, %v135_v14  ;;  %v144_v21 = vsub.f32 %v125_v5, %v135_v14 }
 0x163   :  { %v139_v15 = vpop.xlane.xlu0 %138 }
 0x164   :  { %v140_v17 = vmul.f32 0.0625, %v139_v15 }
 0x166   :  { %v142_v18 = vsub.f32 %v140_v17, %v141_v16 }
 0x168   :  { %v143_v19 = vmax.f32 %v142_v18, 0.0 }
 0x16a   :  { %v145_v20 = vadd.f32 1e-05, %v143_v19  ;;  %v78_v19 = vld [vmem:[%s2204_s12] sm:$0xf]  ;;  %s1821_s12 = smov 123  }
 0x16c   :  { %1746 = vrsqrt.f32 %v145_v20 }
 0x179   :  { %v1747_v22 = vpop.eup %1746 }
 0x17a   :  { %v147_v23 = vmul.f32 %v1747_v22, %v144_v21  ;;  %v1995_v22 = vsel %vm339_vm6, %v78_v19, 0 }
 0x17c   :  { %v149_v24 = vmul.f32 0.70710677, %v147_v23  ;;  %v148_v26 = vmul.f32 0.5, %v147_v23 }
 0x17e   :  { %1748 = verf.f32 %v149_v24 }
 0x18b   :  { %v1749_v25 = vpop.eup %1748 }
 0x18c   :  { %v151_v27 = vadd.f32 1.0, %v1749_v25 }
 0x18e   :  { %v1934_v28 = vmul.f32 %v151_v27, %v148_v26 }
 0x190   :  { %v153_v29 = vpack.c.bf16 %v1934_v28, %v1934_v28  ;;  %v438_v56 = vrot.slane %v1934_v28, 6 }
 0x192   :  { %1583 = vmatmul.mubr.msk.bf16.vlgmr.msra.gmra.mxu1 %vm160_vm4, %v153_v29 }
 0x193   :  { %1594 = vmatprep.mubr.msk.bf16.mxu1 %vm1816_vm0, %v1815_v0 }
 0x252   :  { %v198_v31 = vpop.f32.mrf.mxu1 }
 0x253   :  { %v204_v32 = vpack.c.bf16 %v198_v31, %v198_v31 }
 0x254   :  { %v1584_v33 = vpop.f32.mrf.mxu1 }
 0x255   :  { %v258_v34 = vsel %vm87_vm1, %v204_v32, 0  ;;  %206 = vrot.lane.b32.xlu1 %v204_v32, %s1818_s9 }
 0x256   :  { %v201_v35 = vpop.f32.mrf.mxu1  ;;  %1593 = vmatpush3.bf16.msra.mxu1 %v258_v34 }
 0x257   :  { %1604 = vmatprep.subr.bf16.mxu1 %v1815_v0 }
 0x258   :  { %v1585_v38 = vpop.f32.mrf.mxu1 }
 0x259   :  { %1595 = vmatmul.mubr.msk.bf16.vlgmr.msra.gmra.mxu1 %vm83_vm2, %v1946_v36  ;;  %302 = vperm.xlu1 %1741, %v68_v37  }
 0x25a   :  { %1606 = vmatprep.mubr.msk.bf16.mxu1 %vm1816_vm0, %v1815_v0  ;;  %1605 = vmatpush3.bf16.msra.mxu1 %v1982_v62 }
 0x25b   :  { %1616 = vmatprep.subr.bf16.mxu1 %v1815_v0 }
 0x2c7   :  { %v207_v39 = vpop.permute.xlu1 %206 }
 0x2c8   :  { %v212_v40 = vsel %vm87_vm1, %v207_v39, 0 }
 0x2c9   :  { %1587 = vmatpush3.bf16.msra.mxu0 %v212_v40 }
 0x2ca   :  { %1598 = vmatprep.subr.bf16.mxu0 %v1815_v0 }
 0x2cc   :  { %1589 = vmatmul.mubr.msk.bf16.vlgmr.msra.gmra.mxu0 %vm83_vm2, %v1960_v41 }
 0x2cd   :  { %1600 = vmatprep.mubr.msk.bf16.mxu0 %vm1816_vm0, %v1815_v0  ;;  %1599 = vmatpush3.bf16.msra.mxu0 %v1984_v63 }
 0x2ce   :  { %1610 = vmatprep.subr.bf16.mxu0 %v1815_v0 }
 0x2d4   :  { %v1967_v47 = vpop.permute.xlu1 %302 }
 0x319   :  { %v294_v42 = vpop.f32.mrf.mxu1 }
 0x31b   :  { %v1596_v43 = vpop.f32.mrf.mxu1 }
 0x31c   :  { %v2016_v43 = vld [vmem:[%s2197_s5] sm:$0xf] }
 0x31d   :  { %v297_v44 = vpop.f32.mrf.mxu1 }
 0x31e   :  { %v71_v44 = vld [vmem:[%s2199_s7] sm:$0xff] }
 0x31f   :  { %v1597_v45 = vpop.f32.mrf.mxu1 }
 0x38c   :  { %v248_v46 = vpop.f32.mrf.mxu0 }
 0x38d   :  { %v295_v48 = vadd.f32 %v294_v42, %v248_v46 }
 0x38e   :  { %v1590_v49 = vpop.f32.mrf.mxu0 }
 0x38f   :  { %v305_v50 = vadd.f32 %v1967_v47, %v295_v48  ;;  %v2030_v49 = vld [vmem:[%s2198_s6] sm:$0xf] }
 0x390   :  { %v251_v51 = vpop.f32.mrf.mxu0 }
 0x391   :  { %v307_v52 = vsel %vm306_vm5, %v305_v50, 0.0  ;;  %v311_v53 = vmul.f32 %v305_v50, %v305_v50 }
 0x392   :  { %308 = vadd.xlane.f32.xlu0 %v307_v52  ;;  %v1591_v54 = vpop.f32.mrf.mxu0 }
 0x393   :  { %v312_v55 = vsel %vm306_vm5, %v311_v53, 0.0 }
 0x394   :  { %313 = vadd.xlane.f32.xlu1 %v312_v55 }
 0x3a8   :  { %439 = vrot.lane.b32.xlu0 %v438_v56, %s1820_s18 }
 0x41b   :  { %v309_v1 = vpop.xlane.xlu0 %308 }
 0x41c   :  { %v310_v2 = vmul.f32 0.11111111, %v309_v1 }
 0x41d   :  { %v314_v3 = vpop.xlane.xlu1 %313 }
 0x41e   :  { %v316_v5 = vmul.f32 %v310_v2, %v310_v2  ;;  %v315_v6 = vmul.f32 0.11111111, %v314_v3  ;;  %v319_v10 = vsub.f32 %v305_v50, %v310_v2 }
 0x41f   :  { %v440_v23 = vpop.permute.xlu0 %439 }
 0x420   :  { %v317_v7 = vsub.f32 %v315_v6, %v316_v5  ;;  %v442_v24 = vsel %vm87_vm1, %v1934_v28, %v440_v23  ;;  %v79_v5 = vld [vmem:[%s2205_s13] sm:$0x7]  ;;  %v622_v6 = vsel %vm87_vm1, 4294967295, %v1819_v58 }
 0x421   :  { %v443_v25 = vpack.c.bf16 %v442_v24, %v442_v24 }
 0x422   :  { %v318_v8 = vmax.f32 %v317_v7, 0.0  ;;  %v80_v7 = vld [vmem:[%s2206_s14] sm:$0x7] }
 0x424   :  { %v320_v9 = vadd.f32 1e-05, %v318_v8  ;;  %v623_v8 = vsel %vm621_vm10, %v622_v6, 0 }
 0x426   :  { %1750 = vrsqrt.f32 %v320_v9  ;;  %v2050_v9 = vand.u32 %v623_v8, %v79_v5 }
 0x433   :  { %v1751_v11 = vpop.eup %1750 }
 0x434   :  { %v322_v13 = vmul.f32 %v1751_v11, %v319_v10  ;;  %v2052_v10 = vand.u32 %v623_v8, %v80_v7 }
 0x436   :  { %v324_v14 = vmul.f32 0.70710677, %v322_v13  ;;  %v323_v16 = vmul.f32 0.5, %v322_v13 }
 0x438   :  { %1752 = verf.f32 %v324_v14 }
 0x445   :  { %v1753_v15 = vpop.eup %1752 }
 0x446   :  { %v326_v17 = vadd.f32 1.0, %v1753_v15 }
 0x448   :  { %v327_v18 = vmul.f32 %v326_v17, %v323_v16 }
 0x44a   :  { %v328_v20 = vpack.c.bf16 %v327_v18, %v327_v18 }
 0x44c   :  { %1607 = vmatmul.mubr.msk.bf16.vlgmr.msra.gmra.mxu1 %vm306_vm5, %v328_v20  ;;  %v330_v21 = vrot.slane %v328_v20, 2 }
 0x44d   :  { %1618 = vmatprep.mubr.msk.bf16.mxu1 %vm1816_vm0, %v1815_v0 }
 0x44e   :  { %1601 = vmatmul.mubr.msk.bf16.vlgmr.msra.gmra.mxu0 %vm306_vm5, %v330_v21 }
 0x44f   :  { %1611 = vmatpush3.bf16.msra.mxu0 %v1995_v22  ;;  %1612 = vmatprep.mubr.msk.bf16.mxu0 %vm1816_vm0, %v1815_v0 }
 0x450   :  { %1622 = vmatprep.subr.bf16.mxu0 %v1815_v0 }
 0x456   :  { %1613 = vmatmul.mubr.msk.bf16.vlgmr.msra.gmra.mxu0 %vm444_vm8, %v443_v25 }
 0x457   :  { %1624 = vmatprep.mubr.msk.bf16.mxu0 %vm1816_vm0, %v1815_v0 }
 0x50c   :  { %v431_v26 = vpop.f32.mrf.mxu1 }
 0x50e   :  { %v380_v27 = vpop.f32.mrf.mxu0  ;;  %v1608_v29 = vpop.f32.mrf.mxu1 }
 0x50f   :  { %v2009_v30 = vadd.f32 %v431_v26, %v380_v27 }
 0x510   :  { %v1602_v31 = vpop.f32.mrf.mxu0  ;;  %v434_v32 = vpop.f32.mrf.mxu1 }
 0x511   :  { %v713_v25 = vadd.f32 %v2009_v30, %v1934_v28  ;;  %v2074_v30 = vld [vmem:[%s2200_s8] sm:$0xf]  ;;  %s1823_s8 = smov [#allocation5]  }
 0x512   :  { %v383_v33 = vpop.f32.mrf.mxu0  ;;  %v1609_v34 = vpop.f32.mrf.mxu1 }
 0x513   :  { %v714_v31 = vpack.c.bf16 %v713_v25, %v713_v25  ;;  %v1508_v34 = vld [vmem:[%s2192_s0 + $0x4] sm:$0xf]  ;;  %s1822_s0 = smov 8  }
 0x514   :  { %v1603_v35 = vpop.f32.mrf.mxu0  ;;  %v816_v28 = vpack.c.bf16 %v1508_v34, %v1508_v34 }
 0x515   :  { %v719_v35 = vsel %vm87_vm1, %v714_v31, 0 }
 0x516   :  { %v485_v37 = vpop.f32.mrf.mxu0 }
 0x517   :  { %v491_v38 = vpack.c.bf16 %v485_v37, %v485_v37  ;;  %v818_v37 = vsel %vm87_vm1, %v816_v28, 0 }
 0x518   :  { %v1614_v39 = vpop.f32.mrf.mxu0 }
 0x519   :  { %v545_v40 = vsel %vm87_vm1, %v491_v38, 0  ;;  %493 = vrot.lane.b32.xlu0 %v491_v38, %s1821_s12 }
 0x51a   :  { %v488_v42 = vpop.f32.mrf.mxu0  ;;  %1623 = vmatpush3.bf16.msra.mxu0 %v545_v40 }
 0x51b   :  { %1634 = vmatprep.subr.bf16.mxu0 %v1815_v0 }
 0x51c   :  { %v1615_v45 = vpop.f32.mrf.mxu0 }
 0x51d   :  { %1625 = vmatmul.mubr.msk.bf16.vlgmr.msra.gmra.mxu0 %vm83_vm2, %v2016_v43  ;;  %589 = vperm.xlu0 %1742, %v71_v44  }
 0x51e   :  { %1636 = vmatprep.mubr.msk.bf16.mxu0 %vm1816_vm0, %v1815_v0  ;;  %1635 = vmatpush3.bf16.msra.mxu0 %v2050_v9 }
 0x51f   :  { %1646 = vmatprep.subr.bf16.mxu0 %v1815_v0 }
 0x58b   :  { %v494_v46 = vpop.permute.xlu0 %493 }
 0x58c   :  { %v499_v48 = vsel %vm87_vm1, %v494_v46, 0 }
 0x58d   :  { %1617 = vmatpush3.bf16.msra.mxu1 %v499_v48 }
 0x58e   :  { %1628 = vmatprep.subr.bf16.mxu1 %v1815_v0 }
 0x590   :  { %1619 = vmatmul.mubr.msk.bf16.vlgmr.msra.gmra.mxu1 %vm83_vm2, %v2030_v49 }
 0x591   :  { %1630 = vmatprep.mubr.msk.bf16.mxu1 %vm1816_vm0, %v1815_v0  ;;  %1629 = vmatpush3.bf16.msra.mxu1 %v2052_v10 }
 0x592   :  { %1640 = vmatprep.subr.bf16.mxu1 %v1815_v0 }
 0x598   :  { %v2037_v55 = vpop.permute.xlu0 %589 }
 0x5dd   :  { %v581_v50 = vpop.f32.mrf.mxu0 }
 0x5df   :  { %v1626_v51 = vpop.f32.mrf.mxu0 }
 0x5e1   :  { %v584_v52 = vpop.f32.mrf.mxu0 }
 0x5e3   :  { %v1627_v53 = vpop.f32.mrf.mxu0 }
 0x650   :  { %v535_v54 = vpop.f32.mrf.mxu1 }
 0x651   :  { %v582_v56 = vadd.f32 %v581_v50, %v535_v54 }
 0x652   :  { %v1620_v57 = vpop.f32.mrf.mxu1 }
 0x653   :  { %v592_v59 = vadd.f32 %v2037_v55, %v582_v56 }
 0x654   :  { %v538_v60 = vpop.f32.mrf.mxu1 }
 0x655   :  { %v594_v61 = vsel %vm593_vm9, %v592_v59, 0.0  ;;  %v598_v1 = vmul.f32 %v592_v59, %v592_v59 }
 0x656   :  { %v1621_v2 = vpop.f32.mrf.mxu1  ;;  %595 = vadd.xlane.f32.xlu1 %v594_v61 }
 0x657   :  { %v599_v3 = vsel %vm593_vm9, %v598_v1, 0.0 }
 0x658   :  { %600 = vadd.xlane.f32.xlu0 %v599_v3 }
 0x6df   :  { %v596_v11 = vpop.xlane.xlu1 %595 }
 0x6e0   :  { %v597_v13 = vmul.f32 0.2, %v596_v11 }
 0x6e1   :  { %v601_v58 = vpop.xlane.xlu0 %600 }
 0x6e2   :  { %v603_v14 = vmul.f32 %v597_v13, %v597_v13  ;;  %v602_v15 = vmul.f32 0.2, %v601_v58  ;;  %v606_v19 = vsub.f32 %v592_v59, %v597_v13 }
 0x6e4   :  { %v604_v16 = vsub.f32 %v602_v15, %v603_v14 }
 0x6e6   :  { %v605_v17 = vmax.f32 %v604_v16, 0.0 }
 0x6e8   :  { %v607_v18 = vadd.f32 1e-05, %v605_v17 }
 0x6ea   :  { %1754 = vrsqrt.f32 %v607_v18 }
 0x6f7   :  { %v1755_v20 = vpop.eup %1754 }
 0x6f8   :  { %v609_v21 = vmul.f32 %v1755_v20, %v606_v19 }
 0x6fa   :  { %v611_v23 = vmul.f32 0.70710677, %v609_v21  ;;  %v610_v26 = vmul.f32 0.5, %v609_v21 }
 0x6fc   :  { %1756 = verf.f32 %v611_v23 }
 0x709   :  { %v1757_v24 = vpop.eup %1756 }
 0x70a   :  { %v613_v27 = vadd.f32 1.0, %v1757_v24 }
 0x70c   :  { %v614_v29 = vmul.f32 %v613_v27, %v610_v26 }
 0x70e   :  { %v615_v32 = vpack.c.bf16 %v614_v29, %v614_v29 }
 0x710   :  { %1637 = vmatmul.mubr.msk.bf16.vlgmr.msra.gmra.mxu0 %vm593_vm9, %v615_v32  ;;  %v617_v33 = vrot.slane %v615_v32, 2 }
 0x711   :  { %1648 = vmatprep.mubr.msk.bf16.mxu0 %vm1816_vm0, %v1815_v0 }
 0x712   :  { %1631 = vmatmul.mubr.msk.bf16.vlgmr.msra.gmra.mxu1 %vm593_vm9, %v617_v33 }
 0x713   :  { %1641 = vmatpush3.bf16.msra.mxu1 %v719_v35  ;;  %1642 = vmatprep.mubr.msk.bf16.mxu1 %vm1816_vm0, %v1815_v0 }
 0x714   :  { %1652 = vmatprep.subr.bf16.mxu1 %v1815_v0 }
 0x71a   :  { %1643 = vmatmul.mubr.msk.bf16.vlgmr.msra.gmra.mxu1 %vm83_vm2, %v2074_v30 }
 0x71b   :  { %1653 = vmatpush3.bf16.msra.mxu1 %v818_v37  ;;  %1654 = vmatprep.mubr.msk.bf16.mxu1 %vm1816_vm0, %v1815_v0 }
 0x71c   :  { %1664 = vmatprep.subr.bf16.mxu1 %v1815_v0 }
 0x722   :  { %1655 = vmatmul.mubr.msk.bf16.vlgmr.msra.gmra.mxu1 %vm83_vm2, %v1918_v4 }
 0x723   :  { %1666 = vmatprep.mubr.msk.bf16.mxu1 %vm1816_vm0, %v1815_v0 }
 0x7d0   :  { %v707_v38 = vpop.f32.mrf.mxu0 }
 0x7d2   :  { %v661_v39 = vpop.f32.mrf.mxu1  ;;  %v1638_v40 = vpop.f32.mrf.mxu0 }
 0x7d3   :  { %v708_v42 = vadd.f32 %v707_v38, %v661_v39 }
 0x7d4   :  { %v1632_v44 = vpop.f32.mrf.mxu1  ;;  %v710_v45 = vpop.f32.mrf.mxu0 }
 0x7d5   :  { %v761_v46 = vpack.c.bf16 %v708_v42, %v708_v42 }
 0x7d6   :  { %v664_v48 = vpop.f32.mrf.mxu1  ;;  %v1639_v50 = vpop.f32.mrf.mxu0 }
 0x7d7   :  { %v763_v51 = vsel %vm87_vm1, %v761_v46, 0 }
 0x7d8   :  { %v1633_v52 = vpop.f32.mrf.mxu1  ;;  %1647 = vmatpush3.bf16.msra.mxu0 %v763_v51 }
 0x7d9   :  { %1658 = vmatprep.subr.bf16.mxu0 %v1815_v0 }
 0x7da   :  { %v2088_v53 = vpop.f32.mrf.mxu1 }
 0x7db   :  { %1649 = vmatmul.mubr.msk.bf16.vlgmr.msra.gmra.mxu0 %vm83_vm2, %v2074_v30 }
 0x7dc   :  { %v1644_v4 = vpop.f32.mrf.mxu1  ;;  %1659 = vmatpush3.bf16.msra.mxu0 %v1930_v12  ;;  %1660 = vmatprep.mubr.msk.bf16.mxu0 %vm1816_vm0, %v1815_v0 }
 0x7dd   :  { %1670 = vmatprep.subr.bf16.mxu0 %v1815_v0 }
 0x7de   :  { %v758_v54 = vpop.f32.mrf.mxu1 }
 0x7e0   :  { %v1645_v56 = vpop.f32.mrf.mxu1 }
 0x7e2   :  { %v854_v57 = vpop.f32.mrf.mxu1 }
 0x7e3   :  { %v860_v59 = vsel %vm131_vm3, %v854_v57, 0.0  ;;  %v864_v60 = vmul.f32 %v854_v57, %v854_v57 }
 0x7e4   :  { %861 = vadd.xlane.f32.xlu1 %v860_v59  ;;  %v1656_v61 = vpop.f32.mrf.mxu1 }
 0x7e5   :  { %v865_v2 = vsel %vm131_vm3, %v864_v60, 0.0 }
 0x7e6   :  { %v857_v1 = vpop.f32.mrf.mxu1 }
 0x7e8   :  { %866 = vadd.xlane.f32.xlu1 %v865_v2  ;;  %v1657_v3 = vpop.f32.mrf.mxu1 }
 0x86d   :  { %v862_v5 = vpop.xlane.xlu1 %861 }
 0x86e   :  { %v863_v12 = vmul.f32 0.0625, %v862_v5 }
 0x870   :  { %v869_v7 = vmul.f32 %v863_v12, %v863_v12  ;;  %v872_v14 = vsub.f32 %v854_v57, %v863_v12 }
 0x871   :  { %v867_v6 = vpop.xlane.xlu1 %866 }
 0x872   :  { %v868_v8 = vmul.f32 0.0625, %v867_v6 }
 0x874   :  { %v870_v11 = vsub.f32 %v868_v8, %v869_v7 }
 0x876   :  { %v871_v13 = vmax.f32 %v870_v11, 0.0 }
 0x878   :  { %v873_v58 = vadd.f32 1e-05, %v871_v13 }
 0x87a   :  { %1758 = vrsqrt.f32 %v873_v58 }
 0x887   :  { %v1759_v15 = vpop.eup %1758 }
 0x888   :  { %v875_v16 = vmul.f32 %v1759_v15, %v872_v14 }
 0x88a   :  { %v877_v17 = vmul.f32 0.70710677, %v875_v16  ;;  %v876_v19 = vmul.f32 0.5, %v875_v16 }
 0x88c   :  { %1760 = verf.f32 %v877_v17 }
 0x899   :  { %v1761_v18 = vpop.eup %1760 }
 0x89a   :  { %v879_v20 = vadd.f32 1.0, %v1761_v18 }
 0x89b   :  { %v2098_v21 = vpop.f32.mrf.mxu0 }
 0x89c   :  { %v805_v23 = vadd.f32 %v2098_v21, %v2088_v53  ;;  %v2102_v24 = vmul.f32 %v879_v20, %v876_v19 }
 0x89d   :  { %v1650_v25 = vpop.f32.mrf.mxu0 }
 0x89e   :  { %806 = vst.msk [vmem:[#allocation5] sm:$0xff] %vm444_vm8, %v805_v23  ;;  %v881_v26 = vpack.c.bf16 %v2102_v24, %v2102_v24  ;;  %v1127_v52 = vrot.slane %v2102_v24, 6 }
 0x89f   :  { %v802_v27 = vpop.f32.mrf.mxu0 }
 0x8a0   :  { %1661 = vmatmul.mubr.msk.bf16.vlgmr.msra.gmra.mxu0 %vm160_vm4, %v881_v26 }
 0x8a1   :  { %v1651_v29 = vpop.f32.mrf.mxu0  ;;  %1672 = vmatprep.mubr.msk.bf16.mxu0 %vm1816_vm0, %v1815_v0 }
 0x960   :  { %v919_v31 = vpop.f32.mrf.mxu0 }
 0x961   :  { %v925_v32 = vpack.c.bf16 %v919_v31, %v919_v31 }
 0x962   :  { %v1662_v33 = vpop.f32.mrf.mxu0 }
 0x963   :  { %v973_v34 = vsel %vm87_vm1, %v925_v32, 0  ;;  %927 = vrot.lane.b32.xlu1 %v925_v32, %s1818_s9  ;;  %s1480_s9 = sshll.u32 %s1823_s8, 4  ;;  %s1481_s9 = int_to_ptr.vmem [resolvable:$true] %s1480_s9 }
 0x964   :  { %v922_v35 = vpop.f32.mrf.mxu0  ;;  %1671 = vmatpush3.bf16.msra.mxu0 %v973_v34  ;;  %s1790_s27 = scalar_lea.vmem %s1481_s9, 256  ;;  %p1795_p6 = scmp.lt.s32.totalorder %s1481_s9, %s1481_s9 }
 0x965   :  { %1682 = vmatprep.subr.bf16.mxu0 %v1815_v0  ;;  %p1791_p5 = scmp.ne.s32.totalorder %s1481_s9, %s1790_s27  ;;  %p1796_p7 = scmp.lt.s32.totalorder %s1790_s27, %s1790_s27 }
 0x966   :  { %v1663_v28 = vpop.f32.mrf.mxu0 }
 0x967   :  { %1673 = vmatmul.mubr.msk.bf16.vlgmr.msra.gmra.mxu0 %vm83_vm2, %v1946_v36  ;;  %p1797_p8 = por %p1796_p7, %p1795_p6 }
 0x968   :  { %1683 = vmatpush3.bf16.msra.mxu0 %v1982_v62  ;;  %1684 = vmatprep.mubr.msk.bf16.mxu0 %vm1816_vm0, %v1815_v0 }
 0x969   :  { %1694 = vmatprep.subr.bf16.mxu0 %v1815_v0  ;;  %p1798_p9 = pnand %p1797_p8, %p1791_p5 }
 0x9d5   :  { %v928_v37 = vpop.permute.xlu1 %927 }
 0x9d6   :  { %v930_v38 = vsel %vm87_vm1, %v928_v37, 0 }
 0x9d7   :  { %1665 = vmatpush3.bf16.msra.mxu1 %v930_v38 }
 0x9d8   :  { %1676 = vmatprep.subr.bf16.mxu1 %v1815_v0 }
 0x9da   :  { %1667 = vmatmul.mubr.msk.bf16.vlgmr.msra.gmra.mxu1 %vm83_vm2, %v1960_v41 }
 0x9db   :  { %1677 = vmatpush3.bf16.msra.mxu1 %v1984_v63  ;;  %1678 = vmatprep.mubr.msk.bf16.mxu1 %vm1816_vm0, %v1815_v0 }
 0x9dc   :  { %1688 = vmatprep.subr.bf16.mxu1 %v1815_v0 }
 0xa27   :  { %v1009_v36 = vpop.f32.mrf.mxu0 }
 0xa29   :  { %v1674_v62 = vpop.f32.mrf.mxu0 }
 0xa2b   :  { %v1012_v39 = vpop.f32.mrf.mxu0 }
 0xa2d   :  { %v1675_v40 = vpop.f32.mrf.mxu0 }
 0xa9a   :  { %v966_v42 = vpop.f32.mrf.mxu1 }
 0xa9b   :  { %v1010_v44 = vadd.f32 %v1009_v36, %v966_v42 }
 0xa9c   :  { %v1668_v45 = vpop.f32.mrf.mxu1 }
 0xa9d   :  { %v1015_v46 = vadd.f32 %v1010_v44, %v1967_v47 }
 0xa9e   :  { %v969_v48 = vpop.f32.mrf.mxu1 }
 0xa9f   :  { %v1016_v50 = vsel %vm306_vm5, %v1015_v46, 0.0  ;;  %v1020_v41 = vmul.f32 %v1015_v46, %v1015_v46 }
 0xaa0   :  { %v1669_v51 = vpop.f32.mrf.mxu1  ;;  %1017 = vadd.xlane.f32.xlu1 %v1016_v50 }
 0xaa1   :  { %v1021_v63 = vsel %vm306_vm5, %v1020_v41, 0.0 }
 0xaa2   :  { %1022 = vadd.xlane.f32.xlu0 %v1021_v63 }
 0xab8   :  { %1128 = vrot.lane.b32.xlu0 %v1127_v52, %s1820_s18 }
 0xb29   :  { %v1018_v4 = vpop.xlane.xlu1 %1017 }
 0xb2a   :  { %v1019_v54 = vmul.f32 0.11111111, %v1018_v4 }
 0xb2b   :  { %v1023_v56 = vpop.xlane.xlu0 %1022 }
 0xb2c   :  { %v1025_v57 = vmul.f32 %v1019_v54, %v1019_v54  ;;  %v1024_v59 = vmul.f32 0.11111111, %v1023_v56  ;;  %v1028_v1 = vsub.f32 %v1015_v46, %v1019_v54 }
 0xb2e   :  { %v1026_v60 = vsub.f32 %v1024_v59, %v1025_v57 }
 0xb2f   :  { %v1129_v58 = vpop.permute.xlu0 %1128 }
 0xb30   :  { %v1027_v47 = vmax.f32 %v1026_v60, 0.0  ;;  %v1131_v14 = vsel %vm87_vm1, %v2102_v24, %v1129_v58 }
 0xb31   :  { %v1132_v15 = vpack.c.bf16 %v1131_v14, %v1131_v14 }
 0xb32   :  { %v1029_v61 = vadd.f32 1e-05, %v1027_v47 }
 0xb34   :  { %1762 = vrsqrt.f32 %v1029_v61 }
 0xb41   :  { %v1763_v2 = vpop.eup %1762 }
 0xb42   :  { %v1031_v3 = vmul.f32 %v1763_v2, %v1028_v1 }
 0xb44   :  { %v1033_v5 = vmul.f32 0.70710677, %v1031_v3  ;;  %v1032_v6 = vmul.f32 0.5, %v1031_v3 }
 0xb46   :  { %1764 = verf.f32 %v1033_v5 }
 0xb53   :  { %v1765_v12 = vpop.eup %1764 }
 0xb54   :  { %v1035_v7 = vadd.f32 1.0, %v1765_v12 }
 0xb56   :  { %v1036_v8 = vmul.f32 %v1035_v7, %v1032_v6 }
 0xb58   :  { %v1037_v11 = vpack.c.bf16 %v1036_v8, %v1036_v8 }
 0xb5a   :  { %1685 = vmatmul.mubr.msk.bf16.vlgmr.msra.gmra.mxu0 %vm306_vm5, %v1037_v11  ;;  %v1039_v13 = vrot.slane %v1037_v11, 2 }
 0xb5b   :  { %1696 = vmatprep.mubr.msk.bf16.mxu0 %vm1816_vm0, %v1815_v0 }
 0xb5c   :  { %1679 = vmatmul.mubr.msk.bf16.vlgmr.msra.gmra.mxu1 %vm306_vm5, %v1039_v13 }
 0xb5d   :  { %1689 = vmatpush3.bf16.msra.mxu1 %v1995_v22  ;;  %1690 = vmatprep.mubr.msk.bf16.mxu1 %vm1816_vm0, %v1815_v0 }
 0xb5e   :  { %1700 = vmatprep.subr.bf16.mxu1 %v1815_v0 }
 0xb64   :  { %1691 = vmatmul.mubr.msk.bf16.vlgmr.msra.gmra.mxu1 %vm444_vm8, %v1132_v15 }
 0xb65   :  { %1702 = vmatprep.mubr.msk.bf16.mxu1 %vm1816_vm0, %v1815_v0 }
 0xc1a   :  { %v1120_v16 = vpop.f32.mrf.mxu0 }
 0xc1c   :  { %v1077_v17 = vpop.f32.mrf.mxu1  ;;  %v1686_v18 = vpop.f32.mrf.mxu0 }
 0xc1d   :  { %v2145_v19 = vadd.f32 %v1120_v16, %v1077_v17 }
 0xc1e   :  { %v1680_v22 = vpop.f32.mrf.mxu1  ;;  %v1123_v20 = vpop.f32.mrf.mxu0 }
 0xc1f   :  { %v1377_v47 = vadd.f32 %v2145_v19, %v2102_v24 }
 0xc20   :  { %v1080_v23 = vpop.f32.mrf.mxu1  ;;  %v1687_v25 = vpop.f32.mrf.mxu0 }
 0xc21   :  { %v1378_v3 = vpack.c.bf16 %v1377_v47, %v1377_v47 }
 0xc22   :  { %v1681_v26 = vpop.f32.mrf.mxu1 }
 0xc23   :  { %v1380_v12 = vsel %vm87_vm1, %v1378_v3, 0 }
 0xc24   :  { %v1170_v27 = vpop.f32.mrf.mxu1 }
 0xc25   :  { %v1176_v29 = vpack.c.bf16 %v1170_v27, %v1170_v27 }
 0xc26   :  { %v1692_v31 = vpop.f32.mrf.mxu1 }
 0xc27   :  { %v1224_v32 = vsel %vm87_vm1, %v1176_v29, 0  ;;  %1178 = vrot.lane.b32.xlu0 %v1176_v29, %s1821_s12 }
 0xc28   :  { %v1173_v33 = vpop.f32.mrf.mxu1  ;;  %1701 = vmatpush3.bf16.msra.mxu1 %v1224_v32 }
 0xc29   :  { %1712 = vmatprep.subr.bf16.mxu1 %v1815_v0 }
 0xc2a   :  { %v1693_v34 = vpop.f32.mrf.mxu1 }
 0xc2b   :  { %1703 = vmatmul.mubr.msk.bf16.vlgmr.msra.gmra.mxu1 %vm83_vm2, %v2016_v43 }
 0xc2c   :  { %1713 = vmatpush3.bf16.msra.mxu1 %v2050_v9  ;;  %1714 = vmatprep.mubr.msk.bf16.mxu1 %vm1816_vm0, %v1815_v0 }
 0xc2d   :  { %1724 = vmatprep.subr.bf16.mxu1 %v1815_v0 }
 0xc99   :  { %v1179_v35 = vpop.permute.xlu0 %1178 }
 0xc9a   :  { %v1181_v28 = vsel %vm87_vm1, %v1179_v35, 0 }
 0xc9b   :  { %1695 = vmatpush3.bf16.msra.mxu0 %v1181_v28 }
 0xc9c   :  { %1706 = vmatprep.subr.bf16.mxu0 %v1815_v0 }
 0xc9e   :  { %1697 = vmatmul.mubr.msk.bf16.vlgmr.msra.gmra.mxu0 %vm83_vm2, %v2030_v49 }
 0xc9f   :  { %1707 = vmatpush3.bf16.msra.mxu0 %v2052_v10  ;;  %1708 = vmatprep.mubr.msk.bf16.mxu0 %vm1816_vm0, %v1815_v0 }
 0xca0   :  { %1718 = vmatprep.subr.bf16.mxu0 %v1815_v0 }
 0xceb   :  { %v1260_v43 = vpop.f32.mrf.mxu1 }
 0xced   :  { %v1704_v9 = vpop.f32.mrf.mxu1 }
 0xcef   :  { %v1263_v37 = vpop.f32.mrf.mxu1 }
 0xcf1   :  { %v1705_v38 = vpop.f32.mrf.mxu1 }
 0xd5e   :  { %v1217_v36 = vpop.f32.mrf.mxu0 }
 0xd5f   :  { %v1261_v62 = vadd.f32 %v1260_v43, %v1217_v36 }
 0xd60   :  { %v1698_v39 = vpop.f32.mrf.mxu0 }
 0xd61   :  { %v1266_v40 = vadd.f32 %v1261_v62, %v2037_v55 }
 0xd62   :  { %v1220_v42 = vpop.f32.mrf.mxu0 }
 0xd63   :  { %v1267_v44 = vsel %vm593_vm9, %v1266_v40, 0.0  ;;  %v1271_v49 = vmul.f32 %v1266_v40, %v1266_v40 }
 0xd64   :  { %1268 = vadd.xlane.f32.xlu0 %v1267_v44  ;;  %v1699_v10 = vpop.f32.mrf.mxu0 }
 0xd65   :  { %v1272_v45 = vsel %vm593_vm9, %v1271_v49, 0.0 }
 0xd66   :  { %1273 = vadd.xlane.f32.xlu1 %v1272_v45 }
 0xd77   :  { %808 = vrot.lane.b32.xlu1 %v2098_v21, %s1822_s0 }
 0xded   :  { %v1269_v46 = vpop.xlane.xlu0 %1268 }
 0xdee   :  { %v1270_v48 = vmul.f32 0.2, %v1269_v46 }
 0xdef   :  { %v1274_v50 = vpop.xlane.xlu1 %1273 }
 0xdf0   :  { %v1276_v41 = vmul.f32 %v1270_v48, %v1270_v48  ;;  %v1275_v51 = vmul.f32 0.2, %v1274_v50  ;;  %v1279_v56 = vsub.f32 %v1266_v40, %v1270_v48 }
 0xdf2   :  { %v1277_v63 = vsub.f32 %v1275_v51, %v1276_v41 }
 0xdf3   :  { %v809_v55 = vpop.permute.xlu1 %808 }
 0xdf4   :  { %v1278_v52 = vmax.f32 %v1277_v63, 0.0  ;;  %v811_v4 = vadd.f32 %v809_v55, %v2088_v53 }
 0xdf6   :  { %v1280_v54 = vadd.f32 1e-05, %v1278_v52  ;;  %813 = vst.msk [vmem:[#allocation5] sm:$0xff] %vm812_vm11, %v811_v4 }
 0xdf8   :  { %1766 = vrsqrt.f32 %v1280_v54 }
 0xe05   :  { %v1767_v57 = vpop.eup %1766 }
 0xe06   :  { %v1282_v59 = vmul.f32 %v1767_v57, %v1279_v56 }
 0xe08   :  { %v1284_v60 = vmul.f32 0.70710677, %v1282_v59  ;;  %v1283_v61 = vmul.f32 0.5, %v1282_v59 }
 0xe0a   :  { %1768 = verf.f32 %v1284_v60 }
 0xe17   :  { %v1769_v21 = vpop.eup %1768 }
 0xe18   :  { %v1286_v1 = vadd.f32 1.0, %v1769_v21 }
 0xe1a   :  { %v1287_v2 = vmul.f32 %v1286_v1, %v1283_v61 }
 0xe1c   :  { %v1288_v5 = vpack.c.bf16 %v1287_v2, %v1287_v2 }
 0xe1e   :  { %1715 = vmatmul.mubr.msk.bf16.vlgmr.msra.gmra.mxu1 %vm593_vm9, %v1288_v5  ;;  %v1290_v53 = vrot.slane %v1288_v5, 2 }
 0xe1f   :  { %1726 = vmatprep.mubr.msk.bf16.mxu1 %vm1816_vm0, %v1815_v0 }
 0xe20   :  { %1709 = vmatmul.mubr.msk.bf16.vlgmr.msra.gmra.mxu0 %vm593_vm9, %v1290_v53 }
 0xe21   :  { %1719 = vmatpush3.bf16.msra.mxu0 %v1380_v12  ;;  %1720 = vmatprep.mubr.msk.bf16.mxu0 %vm1816_vm0, %v1815_v0 }
 0xe28   :  { %1721 = vmatmul.mubr.msk.bf16.vlgmr.msra.gmra.mxu0 %vm83_vm2, %v2074_v30 }
 0xede   :  { %v1371_v24 = vpop.f32.mrf.mxu1 }
 0xee0   :  { %v1328_v6 = vpop.f32.mrf.mxu0  ;;  %v1716_v7 = vpop.f32.mrf.mxu1 }
 0xee1   :  { %v1372_v8 = vadd.f32 %v1371_v24, %v1328_v6 }
 0xee2   :  { %v1710_v11 = vpop.f32.mrf.mxu0  ;;  %v1374_v13 = vpop.f32.mrf.mxu1 }
 0xee3   :  { %v1422_v58 = vpack.c.bf16 %v1372_v8, %v1372_v8 }
 0xee4   :  { %v1331_v14 = vpop.f32.mrf.mxu0  ;;  %v1717_v15 = vpop.f32.mrf.mxu1 }
 0xee5   :  { %v1424_v16 = vsel %vm87_vm1, %v1422_v58, 0 }
 0xee6   :  { %v1711_v17 = vpop.f32.mrf.mxu0  ;;  %1725 = vmatpush3.bf16.msra.mxu1 %v1424_v16 }
 0xee8   :  { %v1416_v0 = vpop.f32.mrf.mxu0 }
 0xee9   :  { %1727 = vmatmul.mubr.msk.bf16.vlgmr.msra.gmra.mxu1 %vm83_vm2, %v2074_v30 }
 0xeea   :  { %v1722_v18 = vpop.f32.mrf.mxu0 }
 0xeec   :  { %v1419_v19 = vpop.f32.mrf.mxu0 }
 0xeee   :  { %v1723_v22 = vpop.f32.mrf.mxu0 }
 0xfa9   :  { %v1460_v20 = vpop.f32.mrf.mxu1 }
 0xfaa   :  { %1470 = vrot.lane.b32.xlu1 %v1460_v20, %s1822_s0  ;;  %v1466_v23 = vadd.f32 %v1460_v20, %v1416_v0 }
 0xfab   :  { %v1728_v25 = vpop.f32.mrf.mxu1 }
 0xfac   :  { %1468 = vst.msk [vmem:[#allocation5 + $0x8] sm:$0xff] %vm444_vm8, %v1466_v23 }
 0xfad   :  { %v1463_v26 = vpop.f32.mrf.mxu1 }
 0xfaf   :  { %v1729_v27 = vpop.f32.mrf.mxu1 }
0x101c   :  { %v1471_v29 = vpop.permute.xlu1 %1470 }
0x101d   :  { %v1473_v31 = vadd.f32 %v1471_v29, %v1416_v0 }
0x101f   :  { %1474 = vst.msk [vmem:[#allocation5 + $0x8] sm:$0xff] %vm812_vm11, %v1473_v31 }
0x1020   :  { %1801 = shalt.err (!%p1798_p9)
}
0x1021   :  { %s1824_s28 = smov 128  }
0x1022   :  { %1486 = dma.vmem_to_hbm [thread:$0]  %s1481_s9, 256, %s2207_s15, [#allocation4], %s1824_s28, %s1824_s28, %s1822_s0  }
0x1023   :  { %1812 = dma.done.wait [#allocation4], 256  }
0x1024   :  { %1813 = vsyncadd [#allocation4], 4294967040 }
0x1025   :  { %1490 = vsyncpa [#allocation3], 1 }
0x1026   :  { %1491 = vsyncpa [#allocation4], 1 }

</bundles_post_ra>
